<compile_context>
chip_gen: v5e
topology: v5e:2x2
jax: 0.10.0
libtpu: 0.0.40
codegen_flags: <defaults>
</compile_context>

<pallas_src>
import functools

import numpy as np
import jax
import jax.numpy as jnp
from jax.experimental import pallas as pl
from jax.experimental.pallas import tpu as pltpu


def _round_up(x, m):
    return (x + m - 1) // m * m


def _erf(x):
    # Abramowitz & Stegun 7.1.26 polynomial, |err| < 1.5e-7 (f32-exact), so the
    # exact (erf-based) GELU of torch.nn.GELU() lowers with only exp/mul/add.
    p = 0.3275911
    a1, a2, a3, a4, a5 = (0.254829592, -0.284496736, 1.421413741,
                          -1.453152027, 1.061405429)
    ax = jnp.abs(x)
    t = 1.0 / (1.0 + p * ax)
    poly = ((((a5 * t + a4) * t + a3) * t + a2) * t + a1) * t
    y = 1.0 - poly * jnp.exp(-ax * ax)
    return jnp.where(x >= 0, y, -y)


def _gelu(x):
    # exact GELU (PyTorch nn.GELU default): 0.5 * x * (1 + erf(x / sqrt(2)))
    return 0.5 * x * (1.0 + _erf(x * 0.7071067811865476))


def _upconv_kernel(x1r_ref, x2_ref, wt_ref, bt_ref,
                   w1_ref, b1_ref, s1_ref, h1_ref,
                   w2_ref, b2_ref, s2_ref, h2_ref,
                   out_ref, xp1_ref, xp2_ref, *, K, left):
    T, Cp = out_ref.shape
    right = K - 1 - left

    # Zero only the (K-1) halo rows of the conv scratch; interior rows are
    # fully overwritten every step.
    if left > 0:
        xp1_ref[:left, :] = jnp.zeros((left, 2 * Cp), xp1_ref.dtype)
        xp2_ref[:left, :] = jnp.zeros((left, Cp), xp2_ref.dtype)
    if right > 0:
        xp1_ref[left + T:, :] = jnp.zeros((right, 2 * Cp), xp1_ref.dtype)
        xp2_ref[left + T:, :] = jnp.zeros((right, Cp), xp2_ref.dtype)

    # ---- ConvTranspose1d(kernel=2, stride=2): up[t] = x1[t//2] @ Wt[t%2] + bt.
    # x1r already has each x1 row duplicated (done in the wrapper), so both
    # phases are plain MXU matmuls and a cheap parity select interleaves them.
    x1r = x1r_ref[...]
    ye = jnp.dot(x1r, wt_ref[0], preferred_element_type=jnp.float32)
    yo = jnp.dot(x1r, wt_ref[1], preferred_element_type=jnp.float32)
    parity = jax.lax.broadcasted_iota(jnp.int32, (T, Cp), 0) & 1
    up = jnp.where(parity == 0, ye, yo) + bt_ref[...]

    # ---- concat([up, x2], channels) staged once into a padded scratch so the
    # first 'same' conv is a single (T, 2Cp) x (2Cp, Cp) matmul per tap.
    xp1_ref[left:left + T, :Cp] = up.astype(xp1_ref.dtype)
    xp1_ref[left:left + T, Cp:] = x2_ref[...]

    acc = jnp.dot(xp1_ref[0:T, :], w1_ref[0], preferred_element_type=jnp.float32)
    for k in range(1, K):                      # static unroll over taps
        acc = acc + jnp.dot(xp1_ref[k:k + T, :], w1_ref[k],
                            preferred_element_type=jnp.float32)
    # BatchNorm1d folded to per-channel scale/shift (inference mode) + GELU.
    # TODO(synk): train-mode BatchNorm (batch statistics) would need a
    # cross-batch reduction pass; inference-mode running stats are used here.
    z = _gelu((acc + b1_ref[...]) * s1_ref[...] + h1_ref[...])

    xp2_ref[left:left + T, :] = z.astype(xp2_ref.dtype)
    acc2 = jnp.dot(xp2_ref[0:T, :], w2_ref[0], preferred_element_type=jnp.float32)
    for k in range(1, K):
        acc2 = acc2 + jnp.dot(xp2_ref[k:k + T, :], w2_ref[k],
                              preferred_element_type=jnp.float32)
    z2 = _gelu((acc2 + b2_ref[...]) * s2_ref[...] + h2_ref[...])
    out_ref[...] = z2.astype(out_ref.dtype)


def init_params(key, in_channels, out_channels, kernel_size):
    cin, cout, K = in_channels, out_channels, kernel_size
    ks = jax.random.split(key, 12)

    def u(k, shape, fan_in):
        bound = 1.0 / float(fan_in) ** 0.5
        return jax.random.uniform(k, shape, jnp.float32, -bound, bound)

    p = {}
    # ConvTranspose1d(cin, cout, 2, stride=2); torch weight (cin, cout, 2)
    # stored here as (2, cin, cout): wt[k, ic, oc] == W_torch[ic, oc, k]
    p["wt"] = u(ks[0], (2, cin, cout), cin * 2)
    p["bt"] = u(ks[1], (1, cout), cin * 2)
    # Conv1d(2*cout, cout, K, padding='same'); torch weight (cout, 2*cout, K)
    # stored as (K, 2*cout, cout): w1[k, ic, oc] == W_torch[oc, ic, k]
    p["w1"] = u(ks[2], (K, 2 * cout, cout), 2 * cout * K)
    p["b1"] = u(ks[3], (1, cout), 2 * cout * K)
    # BatchNorm1d(cout) #1 : gamma, beta, running_mean, running_var
    p["g1"] = 1.0 + 0.1 * jax.random.normal(ks[4], (1, cout), jnp.float32)
    p["be1"] = 0.1 * jax.random.normal(ks[5], (1, cout), jnp.float32)
    p["m1"] = 0.1 * jax.random.normal(ks[6], (1, cout), jnp.float32)
    p["v1"] = jnp.abs(1.0 + 0.1 * jax.random.normal(ks[7], (1, cout), jnp.float32))
    # Conv1d(cout, cout, K, padding='same'), stored as (K, cout, cout)
    p["w2"] = u(ks[8], (K, cout, cout), cout * K)
    p["b2"] = u(ks[9], (1, cout), cout * K)
    # BatchNorm1d(cout) #2
    p["g2"] = 1.0 + 0.1 * jax.random.normal(ks[10], (1, cout), jnp.float32)
    p["be2"] = 0.1 * jax.random.normal(ks[11], (1, cout), jnp.float32)
    p["m2"] = jnp.zeros((1, cout), jnp.float32)
    p["v2"] = jnp.ones((1, cout), jnp.float32)
    return p


def upconv_forward(x1_ncl, x2_ncl, params, *, kernel_size):
    """x1_ncl: (B, Cin, L), x2_ncl: (B, Cout, 2L)  ->  (B, Cout, 2L), PyTorch NCL."""
    B, Cin, L = x1_ncl.shape
    B2, Cout, T = x2_ncl.shape
    assert B2 == B and T == 2 * L
    K = kernel_size
    left = (K - 1) // 2          # PyTorch 'same': left=(K-1)//2, right=K-1-left
    eps = 1e-5
    Cp = _round_up(Cout, 128)    # lane-dense channel dim
    pc = Cp - Cout

    # channels-last + bf16 MXU operands (f32 accumulation in-kernel)
    x1 = jnp.transpose(x1_ncl, (0, 2, 1))                       # (B, L, Cin)
    x1r = jnp.repeat(x1, 2, axis=1).astype(jnp.bfloat16)        # (B, 2L, Cin)
    x2 = jnp.transpose(x2_ncl, (0, 2, 1))                       # (B, 2L, Cout)
    x2 = jnp.pad(x2, ((0, 0), (0, 0), (0, pc))).astype(jnp.bfloat16)

    # fold inference-mode BatchNorm into per-channel scale / shift
    s1 = params["g1"] * jax.lax.rsqrt(params["v1"] + eps)
    h1 = params["be1"] - params["m1"] * s1
    s2 = params["g2"] * jax.lax.rsqrt(params["v2"] + eps)
    h2 = params["be2"] - params["m2"] * s2

    # zero-pad all channel dims to Cp (padded lanes stay exactly zero end-to-end
    # and are sliced off after the kernel)
    wt = jnp.pad(params["wt"], ((0, 0), (0, 0), (0, pc))).astype(jnp.bfloat16)
    bt = jnp.pad(params["bt"], ((0, 0), (0, pc)))
    w1 = jnp.zeros((K, 2 * Cp, Cp), jnp.float32)
    w1 = w1.at[:, :Cout, :Cout].set(params["w1"][:, :Cout, :])        # 'up' channels
    w1 = w1.at[:, Cp:Cp + Cout, :Cout].set(params["w1"][:, Cout:, :])  # 'x2' channels
    w1 = w1.astype(jnp.bfloat16)
    b1 = jnp.pad(params["b1"], ((0, 0), (0, pc)))
    w2 = jnp.pad(params["w2"], ((0, 0), (0, pc), (0, pc))).astype(jnp.bfloat16)
    b2 = jnp.pad(params["b2"], ((0, 0), (0, pc)))
    s1p = jnp.pad(s1, ((0, 0), (0, pc)))
    h1p = jnp.pad(h1, ((0, 0), (0, pc)))
    s2p = jnp.pad(s2, ((0, 0), (0, pc)))
    h2p = jnp.pad(h2, ((0, 0), (0, pc)))
    const_inputs = (wt, bt, w1, b1, s1p, h1p, w2, b2, s2p, h2p)

    # explicit VMEM budget + advisory cost estimate
    P = T + K - 1
    bf2, f4 = 2, 4
    vmem_bytes = (2 * T * Cin * bf2 + 2 * T * Cp * bf2 + 2 * T * Cp * f4    # pipelined I/O
                  + (2 * Cin * Cp + K * 2 * Cp * Cp + K * Cp * Cp) * bf2    # weights
                  + 7 * Cp * f4                                             # bias/scale/shift
                  + P * 3 * Cp * bf2)                                       # conv scratch
    vmem_limit = int(min(128 * 1024 * 1024, max(32 * 1024 * 1024, 2 * vmem_bytes)))

    flops = B * (2 * 2 * T * Cin * Cp            # two transpose-conv phase matmuls
                 + 2 * K * T * (2 * Cp) * Cp     # conv #1
                 + 2 * K * T * Cp * Cp)          # conv #2
    bytes_accessed = (x1r.size * bf2 + x2.size * bf2 + B * T * Cp * f4
                      + sum(int(np.prod(a.shape)) * a.dtype.itemsize
                            for a in const_inputs))
    cost = pl.CostEstimate(flops=int(flops), transcendentals=int(2 * B * T * Cp),
                           bytes_accessed=int(bytes_accessed))

    kernel = functools.partial(_upconv_kernel, K=K, left=left)
    out_shape = jax.ShapeDtypeStruct((B, T, Cp), jnp.float32)
    scratch = [pltpu.VMEM((P, 2 * Cp), jnp.bfloat16),
               pltpu.VMEM((P, Cp), jnp.bfloat16)]
    x1r_spec = pl.BlockSpec((None, T, Cin), lambda b: (b, 0, 0))
    x2_spec = pl.BlockSpec((None, T, Cp), lambda b: (b, 0, 0))
    out_spec = pl.BlockSpec((None, T, Cp), lambda b: (b, 0, 0))

    def run(single_buffer_consts):
        def const_spec(a):
            zeros = (0,) * a.ndim
            if single_buffer_consts:
                # grid-invariant params: one VMEM buffer instead of two
                return pl.BlockSpec(a.shape, lambda b, _z=zeros: _z,
                                    pipeline_mode=pl.Buffered(1))
            return pl.BlockSpec(a.shape, lambda b, _z=zeros: _z)

        return pl.pallas_call(
            kernel,
            out_shape=out_shape,
            grid=(B,),
            in_specs=[x1r_spec, x2_spec] + [const_spec(a) for a in const_inputs],
            out_specs=out_spec,
            scratch_shapes=scratch,
            compiler_params=pltpu.CompilerParams(
                dimension_semantics=("parallel",),     # batch across TensorCores
                vmem_limit_bytes=vmem_limit),
            cost_estimate=cost,
        )(x1r, x2, *const_inputs)

    try:
        out = run(True)
    except Exception:
        # pl.Buffered(1) single-buffering unavailable on this jax/backend:
        # fall back to default double-buffered constant inputs (same numerics).
        out = run(False)

    # back to PyTorch NCL and drop channel padding
    return jnp.transpose(out, (0, 2, 1))[:, :Cout, :]


def upconv_reference(x1_ncl, x2_ncl, params, *, kernel_size):
    """Pure-jnp (non-Pallas) f32 reference with identical conventions."""
    B, Cin, L = x1_ncl.shape
    _, Cout, T = x2_ncl.shape
    K = kernel_size
    left = (K - 1) // 2
    eps = 1e-5
    x1 = jnp.transpose(x1_ncl, (0, 2, 1))
    x2 = jnp.transpose(x2_ncl, (0, 2, 1))
    up = (jnp.einsum("blc,kcd->blkd", x1, params["wt"]) + params["bt"]).reshape(B, T, Cout)

    def conv_same(x, w):                    # x: (B,T,IC), w: (K,IC,OC)
        xp = jnp.pad(x, ((0, 0), (left, K - 1 - left), (0, 0)))
        return sum(jnp.einsum("btc,cd->btd", xp[:, k:k + T, :], w[k]) for k in range(K))

    s1 = params["g1"] * jax.lax.rsqrt(params["v1"] + eps)
    h1 = params["be1"] - params["m1"] * s1
    s2 = params["g2"] * jax.lax.rsqrt(params["v2"] + eps)
    h2 = params["be2"] - params["m2"] * s2
    z = _gelu((conv_same(jnp.concatenate([up, x2], axis=-1), params["w1"])
               + params["b1"]) * s1 + h1)
    z = _gelu((conv_same(z, params["w2"]) + params["b2"]) * s2 + h2)
    return jnp.transpose(z, (0, 2, 1))


if __name__ == "__main__":
    key = jax.random.PRNGKey(0)

    def run_case(B, Cin, Cout, L, K, case_key):
        k_x1, k_x2, k_p = jax.random.split(case_key, 3)
        x1 = jax.random.normal(k_x1, (B, Cin, L), jnp.float32)         # PyTorch NCL
        x2 = jax.random.normal(k_x2, (B, Cout, 2 * L), jnp.float32)    # skip branch
        params = init_params(k_p, Cin, Cout, K)
        out = upconv_forward(x1, x2, params, kernel_size=K)
        jax.block_until_ready(out)
        assert out.shape == (B, Cout, 2 * L) and out.dtype == jnp.float32
        assert bool(jnp.isfinite(out).all())
        ref = upconv_reference(x1, x2, params, kernel_size=K)
        np.testing.assert_allclose(np.asarray(out), np.asarray(ref),
                                   rtol=5e-2, atol=5e-2)

    run_case(B=2, Cin=8, Cout=4, L=16, K=3, case_key=jax.random.fold_in(key, 0))
    run_case(B=1, Cin=5, Cout=3, L=8, K=4, case_key=jax.random.fold_in(key, 1))  # even-K 'same'
    print("KERNEL_OK")
</pallas_src>

<mosaic_0001>
module attributes {stable_mosaic.version = 11 : i64} {
  func.func @_upconv_kernel(%arg0: i32, %arg1: memref<1x32x8xbf16, #tpu.memory_space<vmem>>, %arg2: memref<1x32x128xbf16, #tpu.memory_space<vmem>>, %arg3: memref<2x8x128xbf16, #tpu.memory_space<vmem>>, %arg4: memref<1x128xf32, #tpu.memory_space<vmem>>, %arg5: memref<3x256x128xbf16, #tpu.memory_space<vmem>>, %arg6: memref<1x128xf32, #tpu.memory_space<vmem>>, %arg7: memref<1x128xf32, #tpu.memory_space<vmem>>, %arg8: memref<1x128xf32, #tpu.memory_space<vmem>>, %arg9: memref<3x128x128xbf16, #tpu.memory_space<vmem>>, %arg10: memref<1x128xf32, #tpu.memory_space<vmem>>, %arg11: memref<1x128xf32, #tpu.memory_space<vmem>>, %arg12: memref<1x128xf32, #tpu.memory_space<vmem>>, %arg13: memref<1x32x128xf32, #tpu.memory_space<vmem>>, %arg14: memref<34x256xbf16, #tpu.memory_space<vmem>>, %arg15: memref<34x128xbf16, #tpu.memory_space<vmem>>) attributes {dimension_semantics = [#tpu.dimension_semantics<parallel>], iteration_bounds = array<i64: 2>, scalar_prefetch = 0 : i64, scratch_operands = 2 : i64, tpu.core_type = #tpu.core_type<tc>, window_params = [{transform_indices = @transform_0, window_bounds = array<i64: 1, 32, 8>}, {transform_indices = @transform_1, window_bounds = array<i64: 1, 32, 128>}, {pipeline_mode = #tpu.pipeline_mode<synchronous>, transform_indices = @transform_2, window_bounds = array<i64: 2, 8, 128>}, {pipeline_mode = #tpu.pipeline_mode<synchronous>, transform_indices = @transform_3, window_bounds = array<i64: 1, 128>}, {pipeline_mode = #tpu.pipeline_mode<synchronous>, transform_indices = @transform_4, window_bounds = array<i64: 3, 256, 128>}, {pipeline_mode = #tpu.pipeline_mode<synchronous>, transform_indices = @transform_5, window_bounds = array<i64: 1, 128>}, {pipeline_mode = #tpu.pipeline_mode<synchronous>, transform_indices = @transform_6, window_bounds = array<i64: 1, 128>}, {pipeline_mode = #tpu.pipeline_mode<synchronous>, transform_indices = @transform_7, window_bounds = array<i64: 1, 128>}, {pipeline_mode = #tpu.pipeline_mode<synchronous>, transform_indices = @transform_8, window_bounds = array<i64: 3, 128, 128>}, {pipeline_mode = #tpu.pipeline_mode<synchronous>, transform_indices = @transform_9, window_bounds = array<i64: 1, 128>}, {pipeline_mode = #tpu.pipeline_mode<synchronous>, transform_indices = @transform_10, window_bounds = array<i64: 1, 128>}, {pipeline_mode = #tpu.pipeline_mode<synchronous>, transform_indices = @transform_11, window_bounds = array<i64: 1, 128>}, {transform_indices = @transform_12, window_bounds = array<i64: 1, 32, 128>}]} {
    %cst = arith.constant 0.000000e+00 : bf16
    %0 = vector.broadcast %cst : bf16 to vector<1x256xbf16>
    %c0 = arith.constant 0 : index
    %c0_0 = arith.constant 0 : index
    %1 = vector.load %arg14[%c0, %c0_0] : memref<34x256xbf16, #tpu.memory_space<vmem>>, vector<1x256xbf16>
    tpu.vector_store %arg14[%c0, %c0_0], %0 {strides = array<i32>} : memref<34x256xbf16, #tpu.memory_space<vmem>>, vector<1x256xbf16>,
    %cst_1 = arith.constant 0.000000e+00 : bf16
    %2 = vector.broadcast %cst_1 : bf16 to vector<1x128xbf16>
    %c0_2 = arith.constant 0 : index
    %c0_3 = arith.constant 0 : index
    %3 = vector.load %arg15[%c0_2, %c0_3] : memref<34x128xbf16, #tpu.memory_space<vmem>>, vector<1x128xbf16>
    tpu.vector_store %arg15[%c0_2, %c0_3], %2 {strides = array<i32>} : memref<34x128xbf16, #tpu.memory_space<vmem>>, vector<1x128xbf16>,
    %cst_4 = arith.constant 0.000000e+00 : bf16
    %4 = vector.broadcast %cst_4 : bf16 to vector<1x256xbf16>
    %c33 = arith.constant 33 : index
    %c0_5 = arith.constant 0 : index
    %5 = vector.load %arg14[%c33, %c0_5] : memref<34x256xbf16, #tpu.memory_space<vmem>>, vector<1x256xbf16>
    tpu.vector_store %arg14[%c33, %c0_5], %4 {strides = array<i32>} : memref<34x256xbf16, #tpu.memory_space<vmem>>, vector<1x256xbf16>,
    %cst_6 = arith.constant 0.000000e+00 : bf16
    %6 = vector.broadcast %cst_6 : bf16 to vector<1x128xbf16>
    %c33_7 = arith.constant 33 : index
    %c0_8 = arith.constant 0 : index
    %7 = vector.load %arg15[%c33_7, %c0_8] : memref<34x128xbf16, #tpu.memory_space<vmem>>, vector<1x128xbf16>
    tpu.vector_store %arg15[%c33_7, %c0_8], %6 {strides = array<i32>} : memref<34x128xbf16, #tpu.memory_space<vmem>>, vector<1x128xbf16>,
    %c0_9 = arith.constant 0 : index
    %c0_10 = arith.constant 0 : index
    %c0_11 = arith.constant 0 : index
    %8 = vector.load %arg1[%c0_9, %c0_10, %c0_11] : memref<1x32x8xbf16, #tpu.memory_space<vmem>>, vector<1x32x8xbf16>
    %9 = vector.shape_cast %8 : vector<1x32x8xbf16> to vector<32x8xbf16>
    %c0_12 = arith.constant 0 : index
    %c0_13 = arith.constant 0 : index
    %c0_14 = arith.constant 0 : index
    %10 = vector.load %arg3[%c0_12, %c0_13, %c0_14] : memref<2x8x128xbf16, #tpu.memory_space<vmem>>, vector<1x8x128xbf16>
    %11 = vector.shape_cast %10 : vector<1x8x128xbf16> to vector<8x128xbf16>
    %cst_15 = arith.constant dense<0.000000e+00> : vector<32x128xf32>
    %12 = tpu.matmul %9, %11, %cst_15 {dimension_numbers = #tpu.dot_dimension_numbers<[1], [0], [0], [1], [0, 0, 1, 1], [], []>} : vector<32x8xbf16>, vector<8x128xbf16>, vector<32x128xf32> -> vector<32x128xf32>
    %c1 = arith.constant 1 : index
    %c0_16 = arith.constant 0 : index
    %c0_17 = arith.constant 0 : index
    %13 = vector.load %arg3[%c1, %c0_16, %c0_17] : memref<2x8x128xbf16, #tpu.memory_space<vmem>>, vector<1x8x128xbf16>
    %14 = vector.shape_cast %13 : vector<1x8x128xbf16> to vector<8x128xbf16>
    %cst_18 = arith.constant dense<0.000000e+00> : vector<32x128xf32>
    %15 = tpu.matmul %9, %14, %cst_18 {dimension_numbers = #tpu.dot_dimension_numbers<[1], [0], [0], [1], [0, 0, 1, 1], [], []>} : vector<32x8xbf16>, vector<8x128xbf16>, vector<32x128xf32> -> vector<32x128xf32>
    %16 = tpu.iota {dimensions = array<i32: 0>} : vector<32x128xi32>
    %c1_i32 = arith.constant 1 : i32
    %17 = vector.broadcast %c1_i32 : i32 to vector<32x128xi32>
    %18 = arith.andi %16, %17 : vector<32x128xi32>
    %c0_i32 = arith.constant 0 : i32
    %19 = vector.broadcast %c0_i32 : i32 to vector<32x128xi32>
    %20 = arith.cmpi eq, %18, %19 : vector<32x128xi32>
    %21 = arith.select %20, %12, %15 : vector<32x128xi1>, vector<32x128xf32>
    %c0_19 = arith.constant 0 : index
    %c0_20 = arith.constant 0 : index
    %22 = vector.load %arg4[%c0_19, %c0_20] : memref<1x128xf32, #tpu.memory_space<vmem>>, vector<1x128xf32>
    %23 = vector.broadcast %22 : vector<1x128xf32> to vector<32x128xf32>
    %24 = arith.addf %21, %23 : vector<32x128xf32>
    %25 = arith.truncf %24 : vector<32x128xf32> to vector<32x128xbf16>
    %c1_21 = arith.constant 1 : index
    %c0_22 = arith.constant 0 : index
    %26 = vector.load %arg14[%c1_21, %c0_22] : memref<34x256xbf16, #tpu.memory_space<vmem>>, vector<32x128xbf16>
    tpu.vector_store %arg14[%c1_21, %c0_22], %25 {strides = array<i32>} : memref<34x256xbf16, #tpu.memory_space<vmem>>, vector<32x128xbf16>,
    %c0_23 = arith.constant 0 : index
    %c0_24 = arith.constant 0 : index
    %c0_25 = arith.constant 0 : index
    %27 = vector.load %arg2[%c0_23, %c0_24, %c0_25] : memref<1x32x128xbf16, #tpu.memory_space<vmem>>, vector<1x32x128xbf16>
    %28 = vector.shape_cast %27 : vector<1x32x128xbf16> to vector<32x128xbf16>
    %c1_26 = arith.constant 1 : index
    %c128 = arith.constant 128 : index
    %29 = vector.load %arg14[%c1_26, %c128] : memref<34x256xbf16, #tpu.memory_space<vmem>>, vector<32x128xbf16>
    tpu.vector_store %arg14[%c1_26, %c128], %28 {strides = array<i32>} : memref<34x256xbf16, #tpu.memory_space<vmem>>, vector<32x128xbf16>,
    %c0_27 = arith.constant 0 : index
    %c0_28 = arith.constant 0 : index
    %30 = vector.load %arg14[%c0_27, %c0_28] : memref<34x256xbf16, #tpu.memory_space<vmem>>, vector<32x256xbf16>
    %c0_29 = arith.constant 0 : index
    %c0_30 = arith.constant 0 : index
    %c0_31 = arith.constant 0 : index
    %31 = vector.load %arg5[%c0_29, %c0_30, %c0_31] : memref<3x256x128xbf16, #tpu.memory_space<vmem>>, vector<1x256x128xbf16>
    %32 = vector.shape_cast %31 : vector<1x256x128xbf16> to vector<256x128xbf16>
    %cst_32 = arith.constant dense<0.000000e+00> : vector<32x128xf32>
    %33 = tpu.matmul %30, %32, %cst_32 {dimension_numbers = #tpu.dot_dimension_numbers<[1], [0], [0], [1], [0, 0, 1, 1], [], []>} : vector<32x256xbf16>, vector<256x128xbf16>, vector<32x128xf32> -> vector<32x128xf32>
    %c1_33 = arith.constant 1 : index
    %c0_34 = arith.constant 0 : index
    %34 = vector.load %arg14[%c1_33, %c0_34] : memref<34x256xbf16, #tpu.memory_space<vmem>>, vector<32x256xbf16>
    %c1_35 = arith.constant 1 : index
    %c0_36 = arith.constant 0 : index
    %c0_37 = arith.constant 0 : index
    %35 = vector.load %arg5[%c1_35, %c0_36, %c0_37] : memref<3x256x128xbf16, #tpu.memory_space<vmem>>, vector<1x256x128xbf16>
    %36 = vector.shape_cast %35 : vector<1x256x128xbf16> to vector<256x128xbf16>
    %cst_38 = arith.constant dense<0.000000e+00> : vector<32x128xf32>
    %37 = tpu.matmul %34, %36, %cst_38 {dimension_numbers = #tpu.dot_dimension_numbers<[1], [0], [0], [1], [0, 0, 1, 1], [], []>} : vector<32x256xbf16>, vector<256x128xbf16>, vector<32x128xf32> -> vector<32x128xf32>
    %38 = arith.addf %33, %37 : vector<32x128xf32>
    %c2 = arith.constant 2 : index
    %c0_39 = arith.constant 0 : index
    %39 = vector.load %arg14[%c2, %c0_39] : memref<34x256xbf16, #tpu.memory_space<vmem>>, vector<32x256xbf16>
    %c2_40 = arith.constant 2 : index
    %c0_41 = arith.constant 0 : index
    %c0_42 = arith.constant 0 : index
    %40 = vector.load %arg5[%c2_40, %c0_41, %c0_42] : memref<3x256x128xbf16, #tpu.memory_space<vmem>>, vector<1x256x128xbf16>
    %41 = vector.shape_cast %40 : vector<1x256x128xbf16> to vector<256x128xbf16>
    %cst_43 = arith.constant dense<0.000000e+00> : vector<32x128xf32>
    %42 = tpu.matmul %39, %41, %cst_43 {dimension_numbers = #tpu.dot_dimension_numbers<[1], [0], [0], [1], [0, 0, 1, 1], [], []>} : vector<32x256xbf16>, vector<256x128xbf16>, vector<32x128xf32> -> vector<32x128xf32>
    %43 = arith.addf %38, %42 : vector<32x128xf32>
    %c0_44 = arith.constant 0 : index
    %c0_45 = arith.constant 0 : index
    %44 = vector.load %arg6[%c0_44, %c0_45] : memref<1x128xf32, #tpu.memory_space<vmem>>, vector<1x128xf32>
    %45 = vector.broadcast %44 : vector<1x128xf32> to vector<32x128xf32>
    %46 = arith.addf %43, %45 : vector<32x128xf32>
    %c0_46 = arith.constant 0 : index
    %c0_47 = arith.constant 0 : index
    %47 = vector.load %arg7[%c0_46, %c0_47] : memref<1x128xf32, #tpu.memory_space<vmem>>, vector<1x128xf32>
    %48 = vector.broadcast %47 : vector<1x128xf32> to vector<32x128xf32>
    %49 = arith.mulf %46, %48 : vector<32x128xf32>
    %c0_48 = arith.constant 0 : index
    %c0_49 = arith.constant 0 : index
    %50 = vector.load %arg8[%c0_48, %c0_49] : memref<1x128xf32, #tpu.memory_space<vmem>>, vector<1x128xf32>
    %51 = vector.broadcast %50 : vector<1x128xf32> to vector<32x128xf32>
    %52 = arith.addf %49, %51 : vector<32x128xf32>
    %cst_50 = arith.constant 5.000000e-01 : f32
    %53 = vector.broadcast %cst_50 : f32 to vector<32x128xf32>
    %54 = arith.mulf %53, %52 : vector<32x128xf32>
    %cst_51 = arith.constant 0.707106769 : f32
    %55 = vector.broadcast %cst_51 : f32 to vector<32x128xf32>
    %56 = arith.mulf %52, %55 : vector<32x128xf32>
    %57 = math.absf %56 : vector<32x128xf32>
    %cst_52 = arith.constant 0.327591091 : f32
    %58 = vector.broadcast %cst_52 : f32 to vector<32x128xf32>
    %59 = arith.mulf %58, %57 : vector<32x128xf32>
    %cst_53 = arith.constant 1.000000e+00 : f32
    %60 = vector.broadcast %cst_53 : f32 to vector<32x128xf32>
    %61 = arith.addf %60, %59 : vector<32x128xf32>
    %cst_54 = arith.constant 1.000000e+00 : f32
    %62 = vector.broadcast %cst_54 : f32 to vector<32x128xf32>
    %63 = arith.divf %62, %61 : vector<32x128xf32>
    %cst_55 = arith.constant 1.06140542 : f32
    %64 = vector.broadcast %cst_55 : f32 to vector<32x128xf32>
    %65 = arith.mulf %64, %63 : vector<32x128xf32>
    %cst_56 = arith.constant -1.45315206 : f32
    %66 = vector.broadcast %cst_56 : f32 to vector<32x128xf32>
    %67 = arith.addf %65, %66 : vector<32x128xf32>
    %68 = arith.mulf %67, %63 : vector<32x128xf32>
    %cst_57 = arith.constant 1.42141378 : f32
    %69 = vector.broadcast %cst_57 : f32 to vector<32x128xf32>
    %70 = arith.addf %68, %69 : vector<32x128xf32>
    %71 = arith.mulf %70, %63 : vector<32x128xf32>
    %cst_58 = arith.constant -0.284496725 : f32
    %72 = vector.broadcast %cst_58 : f32 to vector<32x128xf32>
    %73 = arith.addf %71, %72 : vector<32x128xf32>
    %74 = arith.mulf %73, %63 : vector<32x128xf32>
    %cst_59 = arith.constant 0.254829586 : f32
    %75 = vector.broadcast %cst_59 : f32 to vector<32x128xf32>
    %76 = arith.addf %74, %75 : vector<32x128xf32>
    %77 = arith.mulf %76, %63 : vector<32x128xf32>
    %cst_60 = arith.constant 0.000000e+00 : f32
    %78 = vector.broadcast %cst_60 : f32 to vector<32x128xf32>
    %79 = arith.subf %78, %57 : vector<32x128xf32>
    %80 = arith.mulf %79, %57 : vector<32x128xf32>
    %81 = math.exp %80 : vector<32x128xf32>
    %82 = arith.mulf %77, %81 : vector<32x128xf32>
    %cst_61 = arith.constant 1.000000e+00 : f32
    %83 = vector.broadcast %cst_61 : f32 to vector<32x128xf32>
    %84 = arith.subf %83, %82 : vector<32x128xf32>
    %cst_62 = arith.constant 0.000000e+00 : f32
    %85 = vector.broadcast %cst_62 : f32 to vector<32x128xf32>
    %86 = arith.cmpf oge, %56, %85 : vector<32x128xf32>
    %cst_63 = arith.constant 0.000000e+00 : f32
    %87 = vector.broadcast %cst_63 : f32 to vector<32x128xf32>
    %88 = arith.subf %87, %84 : vector<32x128xf32>
    %89 = arith.select %86, %84, %88 : vector<32x128xi1>, vector<32x128xf32>
    %cst_64 = arith.constant 1.000000e+00 : f32
    %90 = vector.broadcast %cst_64 : f32 to vector<32x128xf32>
    %91 = arith.addf %90, %89 : vector<32x128xf32>
    %92 = arith.mulf %54, %91 : vector<32x128xf32>
    %93 = arith.truncf %92 : vector<32x128xf32> to vector<32x128xbf16>
    %c1_65 = arith.constant 1 : index
    %c0_66 = arith.constant 0 : index
    %94 = vector.load %arg15[%c1_65, %c0_66] : memref<34x128xbf16, #tpu.memory_space<vmem>>, vector<32x128xbf16>
    tpu.vector_store %arg15[%c1_65, %c0_66], %93 {strides = array<i32>} : memref<34x128xbf16, #tpu.memory_space<vmem>>, vector<32x128xbf16>,
    %c0_67 = arith.constant 0 : index
    %c0_68 = arith.constant 0 : index
    %95 = vector.load %arg15[%c0_67, %c0_68] : memref<34x128xbf16, #tpu.memory_space<vmem>>, vector<32x128xbf16>
    %c0_69 = arith.constant 0 : index
    %c0_70 = arith.constant 0 : index
    %c0_71 = arith.constant 0 : index
    %96 = vector.load %arg9[%c0_69, %c0_70, %c0_71] : memref<3x128x128xbf16, #tpu.memory_space<vmem>>, vector<1x128x128xbf16>
    %97 = vector.shape_cast %96 : vector<1x128x128xbf16> to vector<128x128xbf16>
    %cst_72 = arith.constant dense<0.000000e+00> : vector<32x128xf32>
    %98 = tpu.matmul %95, %97, %cst_72 {dimension_numbers = #tpu.dot_dimension_numbers<[1], [0], [0], [1], [0, 0, 1, 1], [], []>} : vector<32x128xbf16>, vector<128x128xbf16>, vector<32x128xf32> -> vector<32x128xf32>
    %c1_73 = arith.constant 1 : index
    %c0_74 = arith.constant 0 : index
    %99 = vector.load %arg15[%c1_73, %c0_74] : memref<34x128xbf16, #tpu.memory_space<vmem>>, vector<32x128xbf16>
    %c1_75 = arith.constant 1 : index
    %c0_76 = arith.constant 0 : index
    %c0_77 = arith.constant 0 : index
    %100 = vector.load %arg9[%c1_75, %c0_76, %c0_77] : memref<3x128x128xbf16, #tpu.memory_space<vmem>>, vector<1x128x128xbf16>
    %101 = vector.shape_cast %100 : vector<1x128x128xbf16> to vector<128x128xbf16>
    %cst_78 = arith.constant dense<0.000000e+00> : vector<32x128xf32>
    %102 = tpu.matmul %99, %101, %cst_78 {dimension_numbers = #tpu.dot_dimension_numbers<[1], [0], [0], [1], [0, 0, 1, 1], [], []>} : vector<32x128xbf16>, vector<128x128xbf16>, vector<32x128xf32> -> vector<32x128xf32>
    %103 = arith.addf %98, %102 : vector<32x128xf32>
    %c2_79 = arith.constant 2 : index
    %c0_80 = arith.constant 0 : index
    %104 = vector.load %arg15[%c2_79, %c0_80] : memref<34x128xbf16, #tpu.memory_space<vmem>>, vector<32x128xbf16>
    %c2_81 = arith.constant 2 : index
    %c0_82 = arith.constant 0 : index
    %c0_83 = arith.constant 0 : index
    %105 = vector.load %arg9[%c2_81, %c0_82, %c0_83] : memref<3x128x128xbf16, #tpu.memory_space<vmem>>, vector<1x128x128xbf16>
    %106 = vector.shape_cast %105 : vector<1x128x128xbf16> to vector<128x128xbf16>
    %cst_84 = arith.constant dense<0.000000e+00> : vector<32x128xf32>
    %107 = tpu.matmul %104, %106, %cst_84 {dimension_numbers = #tpu.dot_dimension_numbers<[1], [0], [0], [1], [0, 0, 1, 1], [], []>} : vector<32x128xbf16>, vector<128x128xbf16>, vector<32x128xf32> -> vector<32x128xf32>
    %108 = arith.addf %103, %107 : vector<32x128xf32>
    %c0_85 = arith.constant 0 : index
    %c0_86 = arith.constant 0 : index
    %109 = vector.load %arg10[%c0_85, %c0_86] : memref<1x128xf32, #tpu.memory_space<vmem>>, vector<1x128xf32>
    %110 = vector.broadcast %109 : vector<1x128xf32> to vector<32x128xf32>
    %111 = arith.addf %108, %110 : vector<32x128xf32>
    %c0_87 = arith.constant 0 : index
    %c0_88 = arith.constant 0 : index
    %112 = vector.load %arg11[%c0_87, %c0_88] : memref<1x128xf32, #tpu.memory_space<vmem>>, vector<1x128xf32>
    %113 = vector.broadcast %112 : vector<1x128xf32> to vector<32x128xf32>
    %114 = arith.mulf %111, %113 : vector<32x128xf32>
    %c0_89 = arith.constant 0 : index
    %c0_90 = arith.constant 0 : index
    %115 = vector.load %arg12[%c0_89, %c0_90] : memref<1x128xf32, #tpu.memory_space<vmem>>, vector<1x128xf32>
    %116 = vector.broadcast %115 : vector<1x128xf32> to vector<32x128xf32>
    %117 = arith.addf %114, %116 : vector<32x128xf32>
    %cst_91 = arith.constant 5.000000e-01 : f32
    %118 = vector.broadcast %cst_91 : f32 to vector<32x128xf32>
    %119 = arith.mulf %118, %117 : vector<32x128xf32>
    %cst_92 = arith.constant 0.707106769 : f32
    %120 = vector.broadcast %cst_92 : f32 to vector<32x128xf32>
    %121 = arith.mulf %117, %120 : vector<32x128xf32>
    %122 = math.absf %121 : vector<32x128xf32>
    %cst_93 = arith.constant 0.327591091 : f32
    %123 = vector.broadcast %cst_93 : f32 to vector<32x128xf32>
    %124 = arith.mulf %123, %122 : vector<32x128xf32>
    %cst_94 = arith.constant 1.000000e+00 : f32
    %125 = vector.broadcast %cst_94 : f32 to vector<32x128xf32>
    %126 = arith.addf %125, %124 : vector<32x128xf32>
    %cst_95 = arith.constant 1.000000e+00 : f32
    %127 = vector.broadcast %cst_95 : f32 to vector<32x128xf32>
    %128 = arith.divf %127, %126 : vector<32x128xf32>
    %cst_96 = arith.constant 1.06140542 : f32
    %129 = vector.broadcast %cst_96 : f32 to vector<32x128xf32>
    %130 = arith.mulf %129, %128 : vector<32x128xf32>
    %cst_97 = arith.constant -1.45315206 : f32
    %131 = vector.broadcast %cst_97 : f32 to vector<32x128xf32>
    %132 = arith.addf %130, %131 : vector<32x128xf32>
    %133 = arith.mulf %132, %128 : vector<32x128xf32>
    %cst_98 = arith.constant 1.42141378 : f32
    %134 = vector.broadcast %cst_98 : f32 to vector<32x128xf32>
    %135 = arith.addf %133, %134 : vector<32x128xf32>
    %136 = arith.mulf %135, %128 : vector<32x128xf32>
    %cst_99 = arith.constant -0.284496725 : f32
    %137 = vector.broadcast %cst_99 : f32 to vector<32x128xf32>
    %138 = arith.addf %136, %137 : vector<32x128xf32>
    %139 = arith.mulf %138, %128 : vector<32x128xf32>
    %cst_100 = arith.constant 0.254829586 : f32
    %140 = vector.broadcast %cst_100 : f32 to vector<32x128xf32>
    %141 = arith.addf %139, %140 : vector<32x128xf32>
    %142 = arith.mulf %141, %128 : vector<32x128xf32>
    %cst_101 = arith.constant 0.000000e+00 : f32
    %143 = vector.broadcast %cst_101 : f32 to vector<32x128xf32>
    %144 = arith.subf %143, %122 : vector<32x128xf32>
    %145 = arith.mulf %144, %122 : vector<32x128xf32>
    %146 = math.exp %145 : vector<32x128xf32>
    %147 = arith.mulf %142, %146 : vector<32x128xf32>
    %cst_102 = arith.constant 1.000000e+00 : f32
    %148 = vector.broadcast %cst_102 : f32 to vector<32x128xf32>
    %149 = arith.subf %148, %147 : vector<32x128xf32>
    %cst_103 = arith.constant 0.000000e+00 : f32
    %150 = vector.broadcast %cst_103 : f32 to vector<32x128xf32>
    %151 = arith.cmpf oge, %121, %150 : vector<32x128xf32>
    %cst_104 = arith.constant 0.000000e+00 : f32
    %152 = vector.broadcast %cst_104 : f32 to vector<32x128xf32>
    %153 = arith.subf %152, %149 : vector<32x128xf32>
    %154 = arith.select %151, %149, %153 : vector<32x128xi1>, vector<32x128xf32>
    %cst_105 = arith.constant 1.000000e+00 : f32
    %155 = vector.broadcast %cst_105 : f32 to vector<32x128xf32>
    %156 = arith.addf %155, %154 : vector<32x128xf32>
    %157 = arith.mulf %119, %156 : vector<32x128xf32>
    %c0_106 = arith.constant 0 : index
    %c0_107 = arith.constant 0 : index
    %c0_108 = arith.constant 0 : index
    %158 = vector.load %arg13[%c0_106, %c0_107, %c0_108] : memref<1x32x128xf32, #tpu.memory_space<vmem>>, vector<1x32x128xf32>
    %159 = vector.shape_cast %158 : vector<1x32x128xf32> to vector<32x128xf32>
    %160 = vector.shape_cast %157 : vector<32x128xf32> to vector<1x32x128xf32>
    tpu.vector_store %arg13[%c0_106, %c0_107, %c0_108], %160 {strides = array<i32>} : memref<1x32x128xf32, #tpu.memory_space<vmem>>, vector<1x32x128xf32>,
    return
  }
  func.func @transform_0(%arg0: i32) -> (i32, i32, i32) {
    %c0_i32 = arith.constant 0 : i32
    %c0_i32_0 = arith.constant 0 : i32
    %c0_i32_1 = arith.constant 0 : i32
    return %arg0, %c0_i32, %c0_i32_0 : i32, i32, i32
  }
  func.func @transform_1(%arg0: i32) -> (i32, i32, i32) {
    %c0_i32 = arith.constant 0 : i32
    %c0_i32_0 = arith.constant 0 : i32
    %c0_i32_1 = arith.constant 0 : i32
    return %arg0, %c0_i32, %c0_i32_0 : i32, i32, i32
  }
  func.func @transform_2(%arg0: i32) -> (i32, i32, i32) {
    %c0_i32 = arith.constant 0 : i32
    %c0_i32_0 = arith.constant 0 : i32
    %c0_i32_1 = arith.constant 0 : i32
    %c0_i32_2 = arith.constant 0 : i32
    return %c0_i32, %c0_i32_0, %c0_i32_1 : i32, i32, i32
  }
  func.func @transform_3(%arg0: i32) -> (i32, i32) {
    %c0_i32 = arith.constant 0 : i32
    %c0_i32_0 = arith.constant 0 : i32
    %c0_i32_1 = arith.constant 0 : i32
    return %c0_i32, %c0_i32_0 : i32, i32
  }
  func.func @transform_4(%arg0: i32) -> (i32, i32, i32) {
    %c0_i32 = arith.constant 0 : i32
    %c0_i32_0 = arith.constant 0 : i32
    %c0_i32_1 = arith.constant 0 : i32
    %c0_i32_2 = arith.constant 0 : i32
    return %c0_i32, %c0_i32_0, %c0_i32_1 : i32, i32, i32
  }
  func.func @transform_5(%arg0: i32) -> (i32, i32) {
    %c0_i32 = arith.constant 0 : i32
    %c0_i32_0 = arith.constant 0 : i32
    %c0_i32_1 = arith.constant 0 : i32
    return %c0_i32, %c0_i32_0 : i32, i32
  }
  func.func @transform_6(%arg0: i32) -> (i32, i32) {
    %c0_i32 = arith.constant 0 : i32
    %c0_i32_0 = arith.constant 0 : i32
    %c0_i32_1 = arith.constant 0 : i32
    return %c0_i32, %c0_i32_0 : i32, i32
  }
  func.func @transform_7(%arg0: i32) -> (i32, i32) {
    %c0_i32 = arith.constant 0 : i32
    %c0_i32_0 = arith.constant 0 : i32
    %c0_i32_1 = arith.constant 0 : i32
    return %c0_i32, %c0_i32_0 : i32, i32
  }
  func.func @transform_8(%arg0: i32) -> (i32, i32, i32) {
    %c0_i32 = arith.constant 0 : i32
    %c0_i32_0 = arith.constant 0 : i32
    %c0_i32_1 = arith.constant 0 : i32
    %c0_i32_2 = arith.constant 0 : i32
    return %c0_i32, %c0_i32_0, %c0_i32_1 : i32, i32, i32
  }
  func.func @transform_9(%arg0: i32) -> (i32, i32) {
    %c0_i32 = arith.constant 0 : i32
    %c0_i32_0 = arith.constant 0 : i32
    %c0_i32_1 = arith.constant 0 : i32
    return %c0_i32, %c0_i32_0 : i32, i32
  }
  func.func @transform_10(%arg0: i32) -> (i32, i32) {
    %c0_i32 = arith.constant 0 : i32
    %c0_i32_0 = arith.constant 0 : i32
    %c0_i32_1 = arith.constant 0 : i32
    return %c0_i32, %c0_i32_0 : i32, i32
  }
  func.func @transform_11(%arg0: i32) -> (i32, i32) {
    %c0_i32 = arith.constant 0 : i32
    %c0_i32_0 = arith.constant 0 : i32
    %c0_i32_1 = arith.constant 0 : i32
    return %c0_i32, %c0_i32_0 : i32, i32
  }
  func.func @transform_12(%arg0: i32) -> (i32, i32, i32) {
    %c0_i32 = arith.constant 0 : i32
    %c0_i32_0 = arith.constant 0 : i32
    %c0_i32_1 = arith.constant 0 : i32
    return %arg0, %c0_i32, %c0_i32_0 : i32, i32, i32
  }
}

module attributes {stable_mosaic.version = 11 : i64} {
  func.func @_upconv_kernel(%arg0: i32, %arg1: memref<1x32x8xbf16, #tpu.memory_space<vmem>>, %arg2: memref<1x32x128xbf16, #tpu.memory_space<vmem>>, %arg3: memref<2x8x128xbf16, #tpu.memory_space<vmem>>, %arg4: memref<1x128xf32, #tpu.memory_space<vmem>>, %arg5: memref<3x256x128xbf16, #tpu.memory_space<vmem>>, %arg6: memref<1x128xf32, #tpu.memory_space<vmem>>, %arg7: memref<1x128xf32, #tpu.memory_space<vmem>>, %arg8: memref<1x128xf32, #tpu.memory_space<vmem>>, %arg9: memref<3x128x128xbf16, #tpu.memory_space<vmem>>, %arg10: memref<1x128xf32, #tpu.memory_space<vmem>>, %arg11: memref<1x128xf32, #tpu.memory_space<vmem>>, %arg12: memref<1x128xf32, #tpu.memory_space<vmem>>, %arg13: memref<1x32x128xf32, #tpu.memory_space<vmem>>, %arg14: memref<34x256xbf16, #tpu.memory_space<vmem>>, %arg15: memref<34x128xbf16, #tpu.memory_space<vmem>>) attributes {dimension_semantics = [#tpu.dimension_semantics<parallel>], iteration_bounds = array<i64: 2>, scalar_prefetch = 0 : i64, scratch_operands = 2 : i64, tpu.core_type = #tpu.core_type<tc>, window_params = [{transform_indices = @transform_0, window_bounds = array<i64: 1, 32, 8>}, {transform_indices = @transform_1, window_bounds = array<i64: 1, 32, 128>}, {pipeline_mode = #tpu.pipeline_mode<synchronous>, transform_indices = @transform_2, window_bounds = array<i64: 2, 8, 128>}, {pipeline_mode = #tpu.pipeline_mode<synchronous>, transform_indices = @transform_3, window_bounds = array<i64: 1, 128>}, {pipeline_mode = #tpu.pipeline_mode<synchronous>, transform_indices = @transform_4, window_bounds = array<i64: 3, 256, 128>}, {pipeline_mode = #tpu.pipeline_mode<synchronous>, transform_indices = @transform_5, window_bounds = array<i64: 1, 128>}, {pipeline_mode = #tpu.pipeline_mode<synchronous>, transform_indices = @transform_6, window_bounds = array<i64: 1, 128>}, {pipeline_mode = #tpu.pipeline_mode<synchronous>, transform_indices = @transform_7, window_bounds = array<i64: 1, 128>}, {pipeline_mode = #tpu.pipeline_mode<synchronous>, transform_indices = @transform_8, window_bounds = array<i64: 3, 128, 128>}, {pipeline_mode = #tpu.pipeline_mode<synchronous>, transform_indices = @transform_9, window_bounds = array<i64: 1, 128>}, {pipeline_mode = #tpu.pipeline_mode<synchronous>, transform_indices = @transform_10, window_bounds = array<i64: 1, 128>}, {pipeline_mode = #tpu.pipeline_mode<synchronous>, transform_indices = @transform_11, window_bounds = array<i64: 1, 128>}, {transform_indices = @transform_12, window_bounds = array<i64: 1, 32, 128>}]} {
    %cst = arith.constant 0.000000e+00 : bf16
    %0 = vector.broadcast %cst : bf16 to vector<1x256xbf16>
    %c0 = arith.constant 0 : index
    %c0_0 = arith.constant 0 : index
    %1 = vector.load %arg14[%c0, %c0_0] : memref<34x256xbf16, #tpu.memory_space<vmem>>, vector<1x256xbf16>
    tpu.vector_store %arg14[%c0, %c0_0], %0 {strides = array<i32>} : memref<34x256xbf16, #tpu.memory_space<vmem>>, vector<1x256xbf16>,
    %cst_1 = arith.constant 0.000000e+00 : bf16
    %2 = vector.broadcast %cst_1 : bf16 to vector<1x128xbf16>
    %c0_2 = arith.constant 0 : index
    %c0_3 = arith.constant 0 : index
    %3 = vector.load %arg15[%c0_2, %c0_3] : memref<34x128xbf16, #tpu.memory_space<vmem>>, vector<1x128xbf16>
    tpu.vector_store %arg15[%c0_2, %c0_3], %2 {strides = array<i32>} : memref<34x128xbf16, #tpu.memory_space<vmem>>, vector<1x128xbf16>,
    %cst_4 = arith.constant 0.000000e+00 : bf16
    %4 = vector.broadcast %cst_4 : bf16 to vector<1x256xbf16>
    %c33 = arith.constant 33 : index
    %c0_5 = arith.constant 0 : index
    %5 = vector.load %arg14[%c33, %c0_5] : memref<34x256xbf16, #tpu.memory_space<vmem>>, vector<1x256xbf16>
    tpu.vector_store %arg14[%c33, %c0_5], %4 {strides = array<i32>} : memref<34x256xbf16, #tpu.memory_space<vmem>>, vector<1x256xbf16>,
    %cst_6 = arith.constant 0.000000e+00 : bf16
    %6 = vector.broadcast %cst_6 : bf16 to vector<1x128xbf16>
    %c33_7 = arith.constant 33 : index
    %c0_8 = arith.constant 0 : index
    %7 = vector.load %arg15[%c33_7, %c0_8] : memref<34x128xbf16, #tpu.memory_space<vmem>>, vector<1x128xbf16>
    tpu.vector_store %arg15[%c33_7, %c0_8], %6 {strides = array<i32>} : memref<34x128xbf16, #tpu.memory_space<vmem>>, vector<1x128xbf16>,
    %c0_9 = arith.constant 0 : index
    %c0_10 = arith.constant 0 : index
    %c0_11 = arith.constant 0 : index
    %8 = vector.load %arg1[%c0_9, %c0_10, %c0_11] : memref<1x32x8xbf16, #tpu.memory_space<vmem>>, vector<1x32x8xbf16>
    %9 = vector.shape_cast %8 : vector<1x32x8xbf16> to vector<32x8xbf16>
    %c0_12 = arith.constant 0 : index
    %c0_13 = arith.constant 0 : index
    %c0_14 = arith.constant 0 : index
    %10 = vector.load %arg3[%c0_12, %c0_13, %c0_14] : memref<2x8x128xbf16, #tpu.memory_space<vmem>>, vector<1x8x128xbf16>
    %11 = vector.shape_cast %10 : vector<1x8x128xbf16> to vector<8x128xbf16>
    %cst_15 = arith.constant dense<0.000000e+00> : vector<32x128xf32>
    %12 = tpu.matmul %9, %11, %cst_15 {dimension_numbers = #tpu.dot_dimension_numbers<[1], [0], [0], [1], [0, 0, 1, 1], [], []>} : vector<32x8xbf16>, vector<8x128xbf16>, vector<32x128xf32> -> vector<32x128xf32>
    %c1 = arith.constant 1 : index
    %c0_16 = arith.constant 0 : index
    %c0_17 = arith.constant 0 : index
    %13 = vector.load %arg3[%c1, %c0_16, %c0_17] : memref<2x8x128xbf16, #tpu.memory_space<vmem>>, vector<1x8x128xbf16>
    %14 = vector.shape_cast %13 : vector<1x8x128xbf16> to vector<8x128xbf16>
    %cst_18 = arith.constant dense<0.000000e+00> : vector<32x128xf32>
    %15 = tpu.matmul %9, %14, %cst_18 {dimension_numbers = #tpu.dot_dimension_numbers<[1], [0], [0], [1], [0, 0, 1, 1], [], []>} : vector<32x8xbf16>, vector<8x128xbf16>, vector<32x128xf32> -> vector<32x128xf32>
    %16 = tpu.iota {dimensions = array<i32: 0>} : vector<32x128xi32>
    %c1_i32 = arith.constant 1 : i32
    %17 = vector.broadcast %c1_i32 : i32 to vector<32x128xi32>
    %18 = arith.andi %16, %17 : vector<32x128xi32>
    %c0_i32 = arith.constant 0 : i32
    %19 = vector.broadcast %c0_i32 : i32 to vector<32x128xi32>
    %20 = arith.cmpi eq, %18, %19 : vector<32x128xi32>
    %21 = arith.select %20, %12, %15 : vector<32x128xi1>, vector<32x128xf32>
    %c0_19 = arith.constant 0 : index
    %c0_20 = arith.constant 0 : index
    %22 = vector.load %arg4[%c0_19, %c0_20] : memref<1x128xf32, #tpu.memory_space<vmem>>, vector<1x128xf32>
    %23 = vector.broadcast %22 : vector<1x128xf32> to vector<32x128xf32>
    %24 = arith.addf %21, %23 : vector<32x128xf32>
    %25 = arith.truncf %24 : vector<32x128xf32> to vector<32x128xbf16>
    %c1_21 = arith.constant 1 : index
    %c0_22 = arith.constant 0 : index
    %26 = vector.load %arg14[%c1_21, %c0_22] : memref<34x256xbf16, #tpu.memory_space<vmem>>, vector<32x128xbf16>
    tpu.vector_store %arg14[%c1_21, %c0_22], %25 {strides = array<i32>} : memref<34x256xbf16, #tpu.memory_space<vmem>>, vector<32x128xbf16>,
    %c0_23 = arith.constant 0 : index
    %c0_24 = arith.constant 0 : index
    %c0_25 = arith.constant 0 : index
    %27 = vector.load %arg2[%c0_23, %c0_24, %c0_25] : memref<1x32x128xbf16, #tpu.memory_space<vmem>>, vector<1x32x128xbf16>
    %28 = vector.shape_cast %27 : vector<1x32x128xbf16> to vector<32x128xbf16>
    %c1_26 = arith.constant 1 : index
    %c128 = arith.constant 128 : index
    %29 = vector.load %arg14[%c1_26, %c128] : memref<34x256xbf16, #tpu.memory_space<vmem>>, vector<32x128xbf16>
    tpu.vector_store %arg14[%c1_26, %c128], %28 {strides = array<i32>} : memref<34x256xbf16, #tpu.memory_space<vmem>>, vector<32x128xbf16>,
    %c0_27 = arith.constant 0 : index
    %c0_28 = arith.constant 0 : index
    %30 = vector.load %arg14[%c0_27, %c0_28] : memref<34x256xbf16, #tpu.memory_space<vmem>>, vector<32x256xbf16>
    %c0_29 = arith.constant 0 : index
    %c0_30 = arith.constant 0 : index
    %c0_31 = arith.constant 0 : index
    %31 = vector.load %arg5[%c0_29, %c0_30, %c0_31] : memref<3x256x128xbf16, #tpu.memory_space<vmem>>, vector<1x256x128xbf16>
    %32 = vector.shape_cast %31 : vector<1x256x128xbf16> to vector<256x128xbf16>
    %cst_32 = arith.constant dense<0.000000e+00> : vector<32x128xf32>
    %33 = tpu.matmul %30, %32, %cst_32 {dimension_numbers = #tpu.dot_dimension_numbers<[1], [0], [0], [1], [0, 0, 1, 1], [], []>} : vector<32x256xbf16>, vector<256x128xbf16>, vector<32x128xf32> -> vector<32x128xf32>
    %c1_33 = arith.constant 1 : index
    %c0_34 = arith.constant 0 : index
    %34 = vector.load %arg14[%c1_33, %c0_34] : memref<34x256xbf16, #tpu.memory_space<vmem>>, vector<32x256xbf16>
    %c1_35 = arith.constant 1 : index
    %c0_36 = arith.constant 0 : index
    %c0_37 = arith.constant 0 : index
    %35 = vector.load %arg5[%c1_35, %c0_36, %c0_37] : memref<3x256x128xbf16, #tpu.memory_space<vmem>>, vector<1x256x128xbf16>
    %36 = vector.shape_cast %35 : vector<1x256x128xbf16> to vector<256x128xbf16>
    %cst_38 = arith.constant dense<0.000000e+00> : vector<32x128xf32>
    %37 = tpu.matmul %34, %36, %cst_38 {dimension_numbers = #tpu.dot_dimension_numbers<[1], [0], [0], [1], [0, 0, 1, 1], [], []>} : vector<32x256xbf16>, vector<256x128xbf16>, vector<32x128xf32> -> vector<32x128xf32>
    %38 = arith.addf %33, %37 : vector<32x128xf32>
    %c2 = arith.constant 2 : index
    %c0_39 = arith.constant 0 : index
    %39 = vector.load %arg14[%c2, %c0_39] : memref<34x256xbf16, #tpu.memory_space<vmem>>, vector<32x256xbf16>
    %c2_40 = arith.constant 2 : index
    %c0_41 = arith.constant 0 : index
    %c0_42 = arith.constant 0 : index
    %40 = vector.load %arg5[%c2_40, %c0_41, %c0_42] : memref<3x256x128xbf16, #tpu.memory_space<vmem>>, vector<1x256x128xbf16>
    %41 = vector.shape_cast %40 : vector<1x256x128xbf16> to vector<256x128xbf16>
    %cst_43 = arith.constant dense<0.000000e+00> : vector<32x128xf32>
    %42 = tpu.matmul %39, %41, %cst_43 {dimension_numbers = #tpu.dot_dimension_numbers<[1], [0], [0], [1], [0, 0, 1, 1], [], []>} : vector<32x256xbf16>, vector<256x128xbf16>, vector<32x128xf32> -> vector<32x128xf32>
    %43 = arith.addf %38, %42 : vector<32x128xf32>
    %c0_44 = arith.constant 0 : index
    %c0_45 = arith.constant 0 : index
    %44 = vector.load %arg6[%c0_44, %c0_45] : memref<1x128xf32, #tpu.memory_space<vmem>>, vector<1x128xf32>
    %45 = vector.broadcast %44 : vector<1x128xf32> to vector<32x128xf32>
    %46 = arith.addf %43, %45 : vector<32x128xf32>
    %c0_46 = arith.constant 0 : index
    %c0_47 = arith.constant 0 : index
    %47 = vector.load %arg7[%c0_46, %c0_47] : memref<1x128xf32, #tpu.memory_space<vmem>>, vector<1x128xf32>
    %48 = vector.broadcast %47 : vector<1x128xf32> to vector<32x128xf32>
    %49 = arith.mulf %46, %48 : vector<32x128xf32>
    %c0_48 = arith.constant 0 : index
    %c0_49 = arith.constant 0 : index
    %50 = vector.load %arg8[%c0_48, %c0_49] : memref<1x128xf32, #tpu.memory_space<vmem>>, vector<1x128xf32>
    %51 = vector.broadcast %50 : vector<1x128xf32> to vector<32x128xf32>
    %52 = arith.addf %49, %51 : vector<32x128xf32>
    %cst_50 = arith.constant 5.000000e-01 : f32
    %53 = vector.broadcast %cst_50 : f32 to vector<32x128xf32>
    %54 = arith.mulf %53, %52 : vector<32x128xf32>
    %cst_51 = arith.constant 0.707106769 : f32
    %55 = vector.broadcast %cst_51 : f32 to vector<32x128xf32>
    %56 = arith.mulf %52, %55 : vector<32x128xf32>
    %57 = math.absf %56 : vector<32x128xf32>
    %cst_52 = arith.constant 0.327591091 : f32
    %58 = vector.broadcast %cst_52 : f32 to vector<32x128xf32>
    %59 = arith.mulf %58, %57 : vector<32x128xf32>
    %cst_53 = arith.constant 1.000000e+00 : f32
    %60 = vector.broadcast %cst_53 : f32 to vector<32x128xf32>
    %61 = arith.addf %60, %59 : vector<32x128xf32>
    %cst_54 = arith.constant 1.000000e+00 : f32
    %62 = vector.broadcast %cst_54 : f32 to vector<32x128xf32>
    %63 = arith.divf %62, %61 : vector<32x128xf32>
    %cst_55 = arith.constant 1.06140542 : f32
    %64 = vector.broadcast %cst_55 : f32 to vector<32x128xf32>
    %65 = arith.mulf %64, %63 : vector<32x128xf32>
    %cst_56 = arith.constant -1.45315206 : f32
    %66 = vector.broadcast %cst_56 : f32 to vector<32x128xf32>
    %67 = arith.addf %65, %66 : vector<32x128xf32>
    %68 = arith.mulf %67, %63 : vector<32x128xf32>
    %cst_57 = arith.constant 1.42141378 : f32
    %69 = vector.broadcast %cst_57 : f32 to vector<32x128xf32>
    %70 = arith.addf %68, %69 : vector<32x128xf32>
    %71 = arith.mulf %70, %63 : vector<32x128xf32>
    %cst_58 = arith.constant -0.284496725 : f32
    %72 = vector.broadcast %cst_58 : f32 to vector<32x128xf32>
    %73 = arith.addf %71, %72 : vector<32x128xf32>
    %74 = arith.mulf %73, %63 : vector<32x128xf32>
    %cst_59 = arith.constant 0.254829586 : f32
    %75 = vector.broadcast %cst_59 : f32 to vector<32x128xf32>
    %76 = arith.addf %74, %75 : vector<32x128xf32>
    %77 = arith.mulf %76, %63 : vector<32x128xf32>
    %cst_60 = arith.constant 0.000000e+00 : f32
    %78 = vector.broadcast %cst_60 : f32 to vector<32x128xf32>
    %79 = arith.subf %78, %57 : vector<32x128xf32>
    %80 = arith.mulf %79, %57 : vector<32x128xf32>
    %81 = math.exp %80 : vector<32x128xf32>
    %82 = arith.mulf %77, %81 : vector<32x128xf32>
    %cst_61 = arith.constant 1.000000e+00 : f32
    %83 = vector.broadcast %cst_61 : f32 to vector<32x128xf32>
    %84 = arith.subf %83, %82 : vector<32x128xf32>
    %cst_62 = arith.constant 0.000000e+00 : f32
    %85 = vector.broadcast %cst_62 : f32 to vector<32x128xf32>
    %86 = arith.cmpf oge, %56, %85 : vector<32x128xf32>
    %cst_63 = arith.constant 0.000000e+00 : f32
    %87 = vector.broadcast %cst_63 : f32 to vector<32x128xf32>
    %88 = arith.subf %87, %84 : vector<32x128xf32>
    %89 = arith.select %86, %84, %88 : vector<32x128xi1>, vector<32x128xf32>
    %cst_64 = arith.constant 1.000000e+00 : f32
    %90 = vector.broadcast %cst_64 : f32 to vector<32x128xf32>
    %91 = arith.addf %90, %89 : vector<32x128xf32>
    %92 = arith.mulf %54, %91 : vector<32x128xf32>
    %93 = arith.truncf %92 : vector<32x128xf32> to vector<32x128xbf16>
    %c1_65 = arith.constant 1 : index
    %c0_66 = arith.constant 0 : index
    %94 = vector.load %arg15[%c1_65, %c0_66] : memref<34x128xbf16, #tpu.memory_space<vmem>>, vector<32x128xbf16>
    tpu.vector_store %arg15[%c1_65, %c0_66], %93 {strides = array<i32>} : memref<34x128xbf16, #tpu.memory_space<vmem>>, vector<32x128xbf16>,
    %c0_67 = arith.constant 0 : index
    %c0_68 = arith.constant 0 : index
    %95 = vector.load %arg15[%c0_67, %c0_68] : memref<34x128xbf16, #tpu.memory_space<vmem>>, vector<32x128xbf16>
    %c0_69 = arith.constant 0 : index
    %c0_70 = arith.constant 0 : index
    %c0_71 = arith.constant 0 : index
    %96 = vector.load %arg9[%c0_69, %c0_70, %c0_71] : memref<3x128x128xbf16, #tpu.memory_space<vmem>>, vector<1x128x128xbf16>
    %97 = vector.shape_cast %96 : vector<1x128x128xbf16> to vector<128x128xbf16>
    %cst_72 = arith.constant dense<0.000000e+00> : vector<32x128xf32>
    %98 = tpu.matmul %95, %97, %cst_72 {dimension_numbers = #tpu.dot_dimension_numbers<[1], [0], [0], [1], [0, 0, 1, 1], [], []>} : vector<32x128xbf16>, vector<128x128xbf16>, vector<32x128xf32> -> vector<32x128xf32>
    %c1_73 = arith.constant 1 : index
    %c0_74 = arith.constant 0 : index
    %99 = vector.load %arg15[%c1_73, %c0_74] : memref<34x128xbf16, #tpu.memory_space<vmem>>, vector<32x128xbf16>
    %c1_75 = arith.constant 1 : index
    %c0_76 = arith.constant 0 : index
    %c0_77 = arith.constant 0 : index
    %100 = vector.load %arg9[%c1_75, %c0_76, %c0_77] : memref<3x128x128xbf16, #tpu.memory_space<vmem>>, vector<1x128x128xbf16>
    %101 = vector.shape_cast %100 : vector<1x128x128xbf16> to vector<128x128xbf16>
    %cst_78 = arith.constant dense<0.000000e+00> : vector<32x128xf32>
    %102 = tpu.matmul %99, %101, %cst_78 {dimension_numbers = #tpu.dot_dimension_numbers<[1], [0], [0], [1], [0, 0, 1, 1], [], []>} : vector<32x128xbf16>, vector<128x128xbf16>, vector<32x128xf32> -> vector<32x128xf32>
    %103 = arith.addf %98, %102 : vector<32x128xf32>
    %c2_79 = arith.constant 2 : index
    %c0_80 = arith.constant 0 : index
    %104 = vector.load %arg15[%c2_79, %c0_80] : memref<34x128xbf16, #tpu.memory_space<vmem>>, vector<32x128xbf16>
    %c2_81 = arith.constant 2 : index
    %c0_82 = arith.constant 0 : index
    %c0_83 = arith.constant 0 : index
    %105 = vector.load %arg9[%c2_81, %c0_82, %c0_83] : memref<3x128x128xbf16, #tpu.memory_space<vmem>>, vector<1x128x128xbf16>
    %106 = vector.shape_cast %105 : vector<1x128x128xbf16> to vector<128x128xbf16>
    %cst_84 = arith.constant dense<0.000000e+00> : vector<32x128xf32>
    %107 = tpu.matmul %104, %106, %cst_84 {dimension_numbers = #tpu.dot_dimension_numbers<[1], [0], [0], [1], [0, 0, 1, 1], [], []>} : vector<32x128xbf16>, vector<128x128xbf16>, vector<32x128xf32> -> vector<32x128xf32>
    %108 = arith.addf %103, %107 : vector<32x128xf32>
    %c0_85 = arith.constant 0 : index
    %c0_86 = arith.constant 0 : index
    %109 = vector.load %arg10[%c0_85, %c0_86] : memref<1x128xf32, #tpu.memory_space<vmem>>, vector<1x128xf32>
    %110 = vector.broadcast %109 : vector<1x128xf32> to vector<32x128xf32>
    %111 = arith.addf %108, %110 : vector<32x128xf32>
    %c0_87 = arith.constant 0 : index
    %c0_88 = arith.constant 0 : index
    %112 = vector.load %arg11[%c0_87, %c0_88] : memref<1x128xf32, #tpu.memory_space<vmem>>, vector<1x128xf32>
    %113 = vector.broadcast %112 : vector<1x128xf32> to vector<32x128xf32>
    %114 = arith.mulf %111, %113 : vector<32x128xf32>
    %c0_89 = arith.constant 0 : index
    %c0_90 = arith.constant 0 : index
    %115 = vector.load %arg12[%c0_89, %c0_90] : memref<1x128xf32, #tpu.memory_space<vmem>>, vector<1x128xf32>
    %116 = vector.broadcast %115 : vector<1x128xf32> to vector<32x128xf32>
    %117 = arith.addf %114, %116 : vector<32x128xf32>
    %cst_91 = arith.constant 5.000000e-01 : f32
    %118 = vector.broadcast %cst_91 : f32 to vector<32x128xf32>
    %119 = arith.mulf %118, %117 : vector<32x128xf32>
    %cst_92 = arith.constant 0.707106769 : f32
    %120 = vector.broadcast %cst_92 : f32 to vector<32x128xf32>
    %121 = arith.mulf %117, %120 : vector<32x128xf32>
    %122 = math.absf %121 : vector<32x128xf32>
    %cst_93 = arith.constant 0.327591091 : f32
    %123 = vector.broadcast %cst_93 : f32 to vector<32x128xf32>
    %124 = arith.mulf %123, %122 : vector<32x128xf32>
    %cst_94 = arith.constant 1.000000e+00 : f32
    %125 = vector.broadcast %cst_94 : f32 to vector<32x128xf32>
    %126 = arith.addf %125, %124 : vector<32x128xf32>
    %cst_95 = arith.constant 1.000000e+00 : f32
    %127 = vector.broadcast %cst_95 : f32 to vector<32x128xf32>
    %128 = arith.divf %127, %126 : vector<32x128xf32>
    %cst_96 = arith.constant 1.06140542 : f32
    %129 = vector.broadcast %cst_96 : f32 to vector<32x128xf32>
    %130 = arith.mulf %129, %128 : vector<32x128xf32>
    %cst_97 = arith.constant -1.45315206 : f32
    %131 = vector.broadcast %cst_97 : f32 to vector<32x128xf32>
    %132 = arith.addf %130, %131 : vector<32x128xf32>
    %133 = arith.mulf %132, %128 : vector<32x128xf32>
    %cst_98 = arith.constant 1.42141378 : f32
    %134 = vector.broadcast %cst_98 : f32 to vector<32x128xf32>
    %135 = arith.addf %133, %134 : vector<32x128xf32>
    %136 = arith.mulf %135, %128 : vector<32x128xf32>
    %cst_99 = arith.constant -0.284496725 : f32
    %137 = vector.broadcast %cst_99 : f32 to vector<32x128xf32>
    %138 = arith.addf %136, %137 : vector<32x128xf32>
    %139 = arith.mulf %138, %128 : vector<32x128xf32>
    %cst_100 = arith.constant 0.254829586 : f32
    %140 = vector.broadcast %cst_100 : f32 to vector<32x128xf32>
    %141 = arith.addf %139, %140 : vector<32x128xf32>
    %142 = arith.mulf %141, %128 : vector<32x128xf32>
    %cst_101 = arith.constant 0.000000e+00 : f32
    %143 = vector.broadcast %cst_101 : f32 to vector<32x128xf32>
    %144 = arith.subf %143, %122 : vector<32x128xf32>
    %145 = arith.mulf %144, %122 : vector<32x128xf32>
    %146 = math.exp %145 : vector<32x128xf32>
    %147 = arith.mulf %142, %146 : vector<32x128xf32>
    %cst_102 = arith.constant 1.000000e+00 : f32
    %148 = vector.broadcast %cst_102 : f32 to vector<32x128xf32>
    %149 = arith.subf %148, %147 : vector<32x128xf32>
    %cst_103 = arith.constant 0.000000e+00 : f32
    %150 = vector.broadcast %cst_103 : f32 to vector<32x128xf32>
    %151 = arith.cmpf oge, %121, %150 : vector<32x128xf32>
    %cst_104 = arith.constant 0.000000e+00 : f32
    %152 = vector.broadcast %cst_104 : f32 to vector<32x128xf32>
    %153 = arith.subf %152, %149 : vector<32x128xf32>
    %154 = arith.select %151, %149, %153 : vector<32x128xi1>, vector<32x128xf32>
    %cst_105 = arith.constant 1.000000e+00 : f32
    %155 = vector.broadcast %cst_105 : f32 to vector<32x128xf32>
    %156 = arith.addf %155, %154 : vector<32x128xf32>
    %157 = arith.mulf %119, %156 : vector<32x128xf32>
    %c0_106 = arith.constant 0 : index
    %c0_107 = arith.constant 0 : index
    %c0_108 = arith.constant 0 : index
    %158 = vector.load %arg13[%c0_106, %c0_107, %c0_108] : memref<1x32x128xf32, #tpu.memory_space<vmem>>, vector<1x32x128xf32>
    %159 = vector.shape_cast %158 : vector<1x32x128xf32> to vector<32x128xf32>
    %160 = vector.shape_cast %157 : vector<32x128xf32> to vector<1x32x128xf32>
    tpu.vector_store %arg13[%c0_106, %c0_107, %c0_108], %160 {strides = array<i32>} : memref<1x32x128xf32, #tpu.memory_space<vmem>>, vector<1x32x128xf32>,
    return
  }
  func.func @transform_0(%arg0: i32) -> (i32, i32, i32) {
    %c0_i32 = arith.constant 0 : i32
    %c0_i32_0 = arith.constant 0 : i32
    %c0_i32_1 = arith.constant 0 : i32
    return %arg0, %c0_i32, %c0_i32_0 : i32, i32, i32
  }
  func.func @transform_1(%arg0: i32) -> (i32, i32, i32) {
    %c0_i32 = arith.constant 0 : i32
    %c0_i32_0 = arith.constant 0 : i32
    %c0_i32_1 = arith.constant 0 : i32
    return %arg0, %c0_i32, %c0_i32_0 : i32, i32, i32
  }
  func.func @transform_2(%arg0: i32) -> (i32, i32, i32) {
    %c0_i32 = arith.constant 0 : i32
    %c0_i32_0 = arith.constant 0 : i32
    %c0_i32_1 = arith.constant 0 : i32
    %c0_i32_2 = arith.constant 0 : i32
    return %c0_i32, %c0_i32_0, %c0_i32_1 : i32, i32, i32
  }
  func.func @transform_3(%arg0: i32) -> (i32, i32) {
    %c0_i32 = arith.constant 0 : i32
    %c0_i32_0 = arith.constant 0 : i32
    %c0_i32_1 = arith.constant 0 : i32
    return %c0_i32, %c0_i32_0 : i32, i32
  }
  func.func @transform_4(%arg0: i32) -> (i32, i32, i32) {
    %c0_i32 = arith.constant 0 : i32
    %c0_i32_0 = arith.constant 0 : i32
    %c0_i32_1 = arith.constant 0 : i32
    %c0_i32_2 = arith.constant 0 : i32
    return %c0_i32, %c0_i32_0, %c0_i32_1 : i32, i32, i32
  }
  func.func @transform_5(%arg0: i32) -> (i32, i32) {
    %c0_i32 = arith.constant 0 : i32
    %c0_i32_0 = arith.constant 0 : i32
    %c0_i32_1 = arith.constant 0 : i32
    return %c0_i32, %c0_i32_0 : i32, i32
  }
  func.func @transform_6(%arg0: i32) -> (i32, i32) {
    %c0_i32 = arith.constant 0 : i32
    %c0_i32_0 = arith.constant 0 : i32
    %c0_i32_1 = arith.constant 0 : i32
    return %c0_i32, %c0_i32_0 : i32, i32
  }
  func.func @transform_7(%arg0: i32) -> (i32, i32) {
    %c0_i32 = arith.constant 0 : i32
    %c0_i32_0 = arith.constant 0 : i32
    %c0_i32_1 = arith.constant 0 : i32
    return %c0_i32, %c0_i32_0 : i32, i32
  }
  func.func @transform_8(%arg0: i32) -> (i32, i32, i32) {
    %c0_i32 = arith.constant 0 : i32
    %c0_i32_0 = arith.constant 0 : i32
    %c0_i32_1 = arith.constant 0 : i32
    %c0_i32_2 = arith.constant 0 : i32
    return %c0_i32, %c0_i32_0, %c0_i32_1 : i32, i32, i32
  }
  func.func @transform_9(%arg0: i32) -> (i32, i32) {
    %c0_i32 = arith.constant 0 : i32
    %c0_i32_0 = arith.constant 0 : i32
    %c0_i32_1 = arith.constant 0 : i32
    return %c0_i32, %c0_i32_0 : i32, i32
  }
  func.func @transform_10(%arg0: i32) -> (i32, i32) {
    %c0_i32 = arith.constant 0 : i32
    %c0_i32_0 = arith.constant 0 : i32
    %c0_i32_1 = arith.constant 0 : i32
    return %c0_i32, %c0_i32_0 : i32, i32
  }
  func.func @transform_11(%arg0: i32) -> (i32, i32) {
    %c0_i32 = arith.constant 0 : i32
    %c0_i32_0 = arith.constant 0 : i32
    %c0_i32_1 = arith.constant 0 : i32
    return %c0_i32, %c0_i32_0 : i32, i32
  }
  func.func @transform_12(%arg0: i32) -> (i32, i32, i32) {
    %c0_i32 = arith.constant 0 : i32
    %c0_i32_0 = arith.constant 0 : i32
    %c0_i32_1 = arith.constant 0 : i32
    return %arg0, %c0_i32, %c0_i32_0 : i32, i32, i32
  }
}

</mosaic_0001>

<bundles_post_ra>
// kernel: tpu_custom_call.1
= control target key start
LH: loop header
LB: loop body
LE: loop exit
PB: predicated region body
PF: predicated region fallthrough
CT: control target
= control target key end

     0   :  { %17 = vsyncpa [#allocation5], 0  ;;  %s3297_s0 = inlined_call_operand.vmem [shape: bf16[2,32,8], index: 0, kind: input, shape index: {}]   ;;  %s3298_s1 = inlined_call_operand.vmem [shape: bf16[2,32,128], index: 1, kind: input, shape index: {}]   ;;  %s3299_s2 = inlined_call_operand.vmem [shape: bf16[2,8,128], index: 2, kind: input, shape index: {}]   ;;  %s3300_s3 = inlined_call_operand.vmem [shape: f32[1,128], index: 3, kind: input, shape index: {}]   ;;  %s3301_s4 = inlined_call_operand.hbm [shape: bf16[3,256,128], index: 4, kind: input, shape index: {}]   ;;  %s3302_s5 = inlined_call_operand.vmem [shape: f32[1,128], index: 5, kind: input, shape index: {}]   ;;  %s3303_s6 = inlined_call_operand.vmem [shape: f32[1,128], index: 6, kind: input, shape index: {}]   ;;  %s3304_s7 = inlined_call_operand.vmem [shape: f32[1,128], index: 7, kind: input, shape index: {}]   ;;  %s3305_s8 = inlined_call_operand.hbm [shape: bf16[3,128,128], index: 8, kind: input, shape index: {}]   ;;  %s3306_s9 = inlined_call_operand.vmem [shape: f32[1,128], index: 9, kind: input, shape index: {}]   ;;  %s3307_s10 = inlined_call_operand.vmem [shape: f32[1,128], index: 10, kind: input, shape index: {}]   ;;  %s3308_s11 = inlined_call_operand.vmem [shape: f32[1,128], index: 11, kind: input, shape index: {}]   ;;  %s3309_s12 = inlined_call_operand.hbm [shape: f32[2,32,128], index: 12, kind: output, shape index: {}]  }
   0x1   :  { %18 = vsyncpa [#allocation8], 0 }
   0x2   :  { %19 = vsyncpa [#allocation6], 0 }
   0x3   :  { %21 = vsyncpa [#allocation6 + $0x1], 0  ;;  %s2872_s21 = smov 0   ;;  %s2874_s22 = smov 0  }
   0x4   :  { %s2876_s23 = smov 0   ;;  %s2878_s24 = smov 0  }
   0x5 LB: > { %3313 = sst [smem:[#allocation13_spill]] %s2795_s23  ;;  %s2893_s25 = sadd.s32 4294967295, %s2799_s24   ;;  %s2799_s24 = sphi %s2878_s24, %s3329_s24   ;;  %s2795_s23 = sphi %s2876_s23, %s3331_s23   ;;  %s2791_s22 = sphi %s2874_s22, %s3333_s22   ;;  %s2787_s21 = sphi %s2872_s21, %s3332_s21  }
   0x6   : > { %s2140_s26 = sadd.s32 4294967294, %s2799_s24   ;;  %s2897_s27 = sadd.s32 1, %s2799_s24  }
   0x7   : > { %3314 = sst [smem:[#allocation14_spill]] %s2897_s27  ;;  %s296_s28 = sadd.s32 1, %s2795_s23 }
   0x8   : > { %s293_s29 = ssub.s32 %s2799_s24, %s2897_s27  ;;  %p306_p0 = scmp.ne.s32.totalorder %s2795_s23, %s2791_s22 }
   0x9   : > { %p294_p1 = scmp.eq.s32.totalorder %s293_s29, 0  ;;  %p307_p2 = scmp.eq.s32.totalorder %s2893_s25, 1 }
   0xa   : > { %p312_p3 = scmp.ne.s32.totalorder %s2791_s22, %s2787_s21  ;;  %p313_p4 = scmp.eq.s32.totalorder %s2140_s26, 1 }
   0xb   : > { %s2908_s30 = scalar_select %p294_p1, %s2795_s23, %s296_s28  }
   0xc   : > { %p2910_p5 = por %p307_p2, %p306_p0  ;;  %p2914_p6 = por %p313_p4, %p312_p3 }
   0xd   : > { %3315 = sst [smem:[#allocation15_spill]] %s2908_s30  ;;  %p2141_p7 = scmp.ge.s32.totalorder %s2799_s24, 1 }
   0xe   : > { %p320_p8 = scmp.lt.s32.totalorder %s2799_s24, 3  ;;  %p2587_p9 = scmp.eq.s32.totalorder %s2893_s25, 0 }
   0xf   : > { %s337_s18 = sshll.u32 %s3301_s4, 4  ;;  %s2801_s19 = smov [#allocation4]   ;;  %s338_s18 = int_to_ptr.hbm [resolvable:$true] %s337_s18 }
  0x10   : > { %p2921_p10 = pnand %p2141_p7, %p320_p8  ;;  %s339_s20 = sshll.u32 %s2801_s19, 4  ;;  %s340_s20 = int_to_ptr.vmem [resolvable:$true] %s339_s20 }
  0x11   : > { %s360_s29 = sshll.u32 %s3305_s8, 4  ;;  %s2802_s30 = smov 64   ;;  %s361_s29 = int_to_ptr.hbm [resolvable:$true] %s360_s29 }
  0x12   : > { %p2576_p11 = pneg %p2921_p10  ;;  %s2803_s23 = smov 4  }
  0x13   : > { %s2804_s27 = smov [#allocation7]   ;;  %403 = sbr.rel (%p2921_p10) target bundleno = 712 (0x2c8), region = 68 }
  0x14   : > { %p2577_p12 = pnand %p2587_p9, %p2576_p11  ;;  %s362_s16 = sshll.u32 %s2804_s27, 4  ;;  %s363_s16 = int_to_ptr.vmem [resolvable:$true] %s362_s16 }
  0x16   : > { %2579 = dma.hbm_to_vmem [thread:$0]  (!%p2577_p12), %s338_s18, 6144, %s340_s20, [#allocation5], %s2802_s30, %s2802_s30, %s2803_s23  }
  0x17   : > { %2582 = dma.hbm_to_vmem [thread:$0]  (!%p2577_p12), %s361_s29, 3072, %s363_s16, [#allocation8], %s2802_s30, %s2802_s30, %s2803_s23  }
  0x18   : > { %2774 = dma.done.wait (%p2587_p9), [#allocation5], 6144  }
  0x19   : > { %2776 = vsyncadd (%p2587_p9), [#allocation5], 4294961152 }
  0x1a   : > { %2778 = dma.done.wait (%p2587_p9), [#allocation8], 3072  }
  0x1b   : > { %2780 = vsyncadd (%p2587_p9), [#allocation8], 4294964224  ;;  %p456_p13 = scmp.lt.s32.totalorder %s2893_s25, 1  ;;  %vm467_vm0 = vcmask 1040384   ;;  %vm468_vm1 = vsmask.f32 256  ;;  %v560_v63 = vlaneseq }
  0x1c   : > { %vm2947_vm2 = vmand %vm467_vm0, %vm468_vm1  ;;  %vm470_vm3 = vcmask 1044484   ;;  %vm471_vm4 = vsmask.f32 4352  ;;  %vm482_vm6 = vsmask.f32 7954  ;;  %vm513_vm12 = vcmask 1043456  }
  0x1d   : > { %s457_s23 = scalar_select %p456_p13, %s2893_s25, 1  ;;  %vm2952_vm5 = vmand %vm470_vm3, %vm471_vm4  ;;  %vm480_vm8 = vsmask.f32 7938  ;;  %vm589_vm13 = vsmask.f32 4368  ;;  %vm506_vm14 = vcmask 64512  }
  0x1e   : > { %vm473_vm7 = vmor %vm2952_vm5, %vm2947_vm2  ;;  %v474_v3 = vld [vmem:[#allocation2] sm:$0x11]  ;;  %v477_v4 = vld [vmem:[#allocation3] sm:$0x1]  ;;  %s453_s30 = sand.u32 1, %s2791_s22   ;;  %s2550_s18 = sshll.u32 %s2893_s25, 5 }
  0x1f   : > { %s2471_s27 = sshll.u32 %s457_s23, 4  ;;  %vm2961_vm9 = vmand %vm467_vm0, %vm480_vm8  ;;  %v485_v5 = vld [vmem:[#allocation2 + $0x20] sm:$0x11]  ;;  %v475_v6 = vsel %vm473_vm7, 0, %v474_v3  ;;  %v478_v7 = vsel %vm2947_vm2, 0, %v477_v4  ;;  %v2484_v50 = vld [vmem:[#allocation4 + $0x38] sm:$0xff]  ;;  %s2040_s26 = scalar_lea.hbm %s3309_s12, %s2550_s18 }
  0x20   : > { %vm483_vm10 = vmand %vm470_vm3, %vm482_vm6  ;;  %s465_s17 = scalar_lea.vmem %s3298_s1, %s2471_s27  ;;  %s2973_s20 = scalar_lea.vmem %s3297_s0, %s2471_s27  ;;  %v488_v9 = vld [vmem:[#allocation3 + $0x10] sm:$0x1]  ;;  %476 = vst [vmem:[#allocation2] sm:$0x11] %v475_v6  ;;  %v495_v11 = vld [vmem:[%s3299_s2] sm:$0xf] }
  0x21   : > { %vm484_vm11 = vmor %vm483_vm10, %vm2961_vm9  ;;  %v489_v10 = vsel %vm2961_vm9, 0, %v488_v9  ;;  %479 = vst [vmem:[#allocation3] sm:$0x1] %v478_v7  ;;  %v515_v12 = vsel %vm513_vm12, %v495_v11, 0  ;;  %v642_v13 = vld [vmem:[%s465_s17] sm:$0xf] }
  0x22   : > { %v486_v8 = vsel %vm484_vm11, 0, %v485_v5  ;;  %v2473_v14 = vld [vmem:[%s2973_s20] sm:$0xff]  ;;  %524 = vmatpush.bf16.msra.mxu0 %v515_v12  ;;  %v644_v16 = vld [vmem:[%s465_s17 + $0x8] sm:$0xf]  ;;  %490 = vst [vmem:[#allocation3 + $0x10] sm:$0x1] %v489_v10  ;;  %vm2991_vm15 = vmand %vm513_vm12, %vm480_vm8 }
  0x23   : > { %487 = vst [vmem:[#allocation2 + $0x20] sm:$0x11] %v486_v8  ;;  %v643_v15 = vld [vmem:[%s465_s17 + $0x4] sm:$0xf]  ;;  %v645_v17 = vld [vmem:[%s465_s17 + $0xc] sm:$0xf]  ;;  %vm2997_vm0 = vmor %vm468_vm1, %vm589_vm13 }
  0x24   : > { %v647_v18 = vshrl.u32 %v642_v13, 16  ;;  %v650_v19 = vshll.u32 %v642_v13, 16  ;;  %v655_v20 = vshrl.u32 %v643_v15, 16  ;;  %v658_v21 = vshll.u32 %v643_v15, 16  ;;  %v2163_v24 = vld [vmem:[%s3299_s2 + $0x4] sm:$0xf] }
  0x25   : > { %v664_v22 = vshrl.u32 %v644_v16, 16  ;;  %v667_v23 = vshll.u32 %v644_v16, 16  ;;  %v673_v26 = vshrl.u32 %v645_v17, 16  ;;  %v676_v27 = vshll.u32 %v645_v17, 16  ;;  %2161 = vmatmul.msk.bf16.vlgmr.msra.gmra.mxu0 %vm506_vm14, %v2473_v14  ;;  %v2474_v49 = vld [vmem:[%s2973_s20 + $0x8] sm:$0xff]  ;;  %v2492_v51 = vld [vmem:[#allocation4 + $0x78] sm:$0xff] }
  0x26   : > { %v649_v25 = vrot.slane %v647_v18, 7  ;;  %v539_v28 = vsel %vm513_vm12, %v2163_v24, 0  ;;  %v657_v30 = vrot.slane %v655_v20, 7  ;;  %1065 = vmatpush.bf16.msrb.mxu0 %v2484_v50  ;;  %v2483_v52 = vld [vmem:[#allocation4 + $0x30] sm:$0xff]  ;;  %v2508_v54 = vld [vmem:[#allocation4 + $0xf8] sm:$0xff]  ;;  %v2482_v55 = vld [vmem:[#allocation4 + $0x28] sm:$0xff] }
  0x27   : > { %v666_v31 = vrot.slane %v664_v22, 7  ;;  %548 = vmatpush.bf16.msra.mxu1 %v539_v28  ;;  %v675_v35 = vrot.slane %v673_v26, 7  ;;  %v686_v36 = vld [vmem:[#allocation2 + $0x4] sm:$0xf]  ;;  %v2491_v53 = vld [vmem:[#allocation4 + $0x70] sm:$0xff]  ;;  %946 = vmatpush.bf16.msra.mxu3 %v2508_v54  ;;  %v2481_v58 = vld [vmem:[#allocation4 + $0x20] sm:$0xff] }
  0x28   : > { %v652_v33 = vor.u32 %v650_v19, %v649_v25  ;;  %v653_v34 = vrot.slane %v649_v25, 4  ;;  %v660_v37 = vor.u32 %v658_v21, %v657_v30  ;;  %v662_v38 = vrot.slane %v657_v30, 4  ;;  %v2490_v56 = vld [vmem:[#allocation4 + $0x68] sm:$0xff]  ;;  %v2507_v57 = vld [vmem:[#allocation4 + $0xf0] sm:$0xff]  ;;  %v2489_v59 = vld [vmem:[#allocation4 + $0x60] sm:$0xff]  ;;  %s2148_s15 = sshll.u32 %s453_s30, 5 }
  0x29   : > { %v669_v39 = vor.u32 %v667_v23, %v666_v31  ;;  %v671_v40 = vrot.slane %v666_v31, 4  ;;  %v678_v41 = vor.u32 %v676_v27, %v675_v35  ;;  %v680_v42 = vrot.slane %v675_v35, 4  ;;  %v2506_v60 = vld [vmem:[#allocation4 + $0xe8] sm:$0xff]  ;;  %v2480_v61 = vld [vmem:[#allocation4 + $0x18] sm:$0xff]  ;;  %v2505_v2 = vld [vmem:[#allocation4 + $0xe0] sm:$0xff]  ;;  %s3251_s17 = scalar_lea.vmem [#allocation9], %s2148_s15 }
  0x2a   : > { %v687_v43 = vsel %vm2991_vm15, %v652_v33, %v686_v36  ;;  %v692_v44 = vld [vmem:[#allocation2 + $0x24] sm:$0x1]  ;;  %2164 = vmatmul.msk.bf16.vlgmr.msra.gmra.mxu1 %vm506_vm14, %v2473_v14  ;;  %v661_v45 = vsel %vm2997_vm0, %v653_v34, %v660_v37  ;;  %1066 = vmatpush.bf16.msrb.mxu0 %v2483_v52  ;;  %v2488_v62 = vld [vmem:[#allocation4 + $0x58] sm:$0xff]  ;;  %v2479_v3 = vld [vmem:[#allocation4 + $0x10] sm:$0xff]  ;;  %v561_v5 = vshrl.u32 %v560_v63, 7  ;;  %vm1142_vm7 = vcmask 1046528  }
  0x2b   : > { %v670_v46 = vsel %vm2997_vm0, %v662_v38, %v669_v39  ;;  %688 = vst [vmem:[#allocation2 + $0x4] sm:$0xf] %v687_v43  ;;  %v679_v47 = vsel %vm2997_vm0, %v671_v40, %v678_v41  ;;  %v693_v48 = vsel %vm2947_vm2, %v680_v42, %v692_v44  ;;  %1084 = vmatpush.bf16.msrb.mxu1 %v2492_v51  ;;  %v2500_v1 = vld [vmem:[#allocation4 + $0xb8] sm:$0xff]  ;;  %v2487_v4 = vld [vmem:[#allocation4 + $0x50] sm:$0xff]  ;;  %v2478_v8 = vld [vmem:[#allocation4 + $0x8] sm:$0xff]  ;;  %s2041_s28 = sshll.u32 %s3251_s17, 4  ;;  %s2042_s28 = int_to_ptr.vmem [resolvable:$true] %s2041_s28 }
  0x2c   : > { %689 = vst [vmem:[#allocation2 + $0xc] sm:$0xf] %v661_v45  ;;  %947 = vmatpush.bf16.msra.mxu3 %v2507_v57  ;;  %927 = vmatpush.bf16.msra.mxu2 %v2500_v1  ;;  %v2499_v6 = vld [vmem:[#allocation4 + $0xb0] sm:$0xff]  ;;  %v2504_v7 = vld [vmem:[#allocation4 + $0xd8] sm:$0xff]  ;;  %v2486_v9 = vld [vmem:[#allocation4 + $0x48] sm:$0xff]  ;;  %v565_v10 = vand.u32 1, %v561_v5 }
  0x2d   : > { %690 = vst [vmem:[#allocation2 + $0x14] sm:$0xf] %v670_v46  ;;  %v2498_v12 = vld [vmem:[#allocation4 + $0xa8] sm:$0xff]  ;;  %v2503_v13 = vld [vmem:[#allocation4 + $0xd0] sm:$0xff]  ;;  %v2477_v14 = vld [vmem:[#allocation4] sm:$0xff]  ;;  %v562_v17 = vadd.s32 8, %v561_v5 }
  0x2e   : > { %691 = vst [vmem:[#allocation2 + $0x1c] sm:$0xf] %v679_v47  ;;  %1067 = vmatpush.bf16.msrb.mxu0 %v2482_v55  ;;  %v2485_v15 = vld [vmem:[#allocation4 + $0x40] sm:$0xff]  ;;  %vm569_vm1 = vcmp.eq.s32.totalorder %v565_v10, 0  ;;  %v2502_v20 = vld [vmem:[#allocation4 + $0xc8] sm:$0xff]  ;;  %v2496_v26 = vld [vmem:[#allocation4 + $0x98] sm:$0xff] }
  0x2f   : > { %694 = vst [vmem:[#allocation2 + $0x24] sm:$0x1] %v693_v48  ;;  %1085 = vmatpush.bf16.msrb.mxu1 %v2491_v53  ;;  %v3018_v16 = vld [vmem:[%s3300_s3] ss:$0 sm:$0xff]  ;;  %v566_v23 = vand.u32 1, %v562_v17  ;;  %v563_v30 = vadd.s32 16, %v561_v5 }
  0x30   : > { %948 = vmatpush.bf16.msra.mxu3 %v2506_v60  ;;  %928 = vmatpush.bf16.msra.mxu2 %v2499_v6  ;;  %v2497_v19 = vld [vmem:[#allocation4 + $0xa0] sm:$0xff]  ;;  %v2495_v35 = vld [vmem:[#allocation4 + $0x90] sm:$0xff]  ;;  %v2524_v36 = vld [vmem:[#allocation4 + $0x178] sm:$0xff]  ;;  %v564_v48 = vadd.s32 24, %v561_v5  ;;  %vm786_vm6 = vsmask.f32 7424 }
  0x31   : > { %v2501_v27 = vld [vmem:[#allocation4 + $0xc0] sm:$0xff]  ;;  %vm570_vm3 = vcmp.eq.s32.totalorder %v566_v23, 0  ;;  %v567_v41 = vand.u32 1, %v563_v30  ;;  %v2494_v42 = vld [vmem:[#allocation4 + $0x88] sm:$0xff]  ;;  %v2523_v43 = vld [vmem:[#allocation4 + $0x170] sm:$0xff]  ;;  %s2043_s29 = sshll.u32 %s2040_s26, 4  ;;  %s2044_s29 = int_to_ptr.hbm [resolvable:$true] %s2043_s29 }
  0x32   : > { %1068 = vmatpush.bf16.msrb.mxu0 %v2481_v58  ;;  %v633_v37 = vld [vmem:[#allocation2] sm:$0xf]  ;;  %v2522_v53 = vld [vmem:[#allocation4 + $0x168] sm:$0xff]  ;;  %v568_v58 = vand.u32 1, %v564_v48  ;;  %v2515_v5 = vld [vmem:[#allocation4 + $0x130] sm:$0xff]  ;;  %s2029_s25 = scalar_lea.sflag [#allocation6], %s453_s30 }
  0x33   : > { %1086 = vmatpush.bf16.msrb.mxu1 %v2490_v56  ;;  %vm571_vm4 = vcmp.eq.s32.totalorder %v567_v41, 0  ;;  %v2520_v6 = vld [vmem:[#allocation4 + $0x158] sm:$0xff]  ;;  %s2743_s16 = sshra.s32 %s2044_s29, 4  ;;  %s2749_s18 = scalar_lea.hbm %s3309_s12, 64  ;;  %s2744_s16 = int_to_ptr.hbm [resolvable:$true] %s2743_s16 }
  0x34   : > { %949 = vmatpush.bf16.msra.mxu3 %v2505_v2  ;;  %929 = vmatpush.bf16.msra.mxu2 %v2498_v12  ;;  %vm572_vm5 = vcmp.eq.s32.totalorder %v568_v58, 0  ;;  %s2745_s23 = scalar_lea.hbm %s2744_s16, 32  ;;  %p2750_p3 = scmp.lt.s32.totalorder %s2744_s16, %s3309_s12 }
  0x35   : > { %2162 = vmatmul.msk.bf16.gmra.mxu0 %vm506_vm14, %v2474_v49  ;;  %p2746_p0 = scmp.ne.s32.totalorder %s2744_s16, %s2745_s23  ;;  %p2751_p4 = scmp.lt.s32.totalorder %s2749_s18, %s2745_s23 }
  0x36   : > { %1069 = vmatpush.bf16.msrb.mxu0 %v2480_v61  ;;  %v2516_v61 = vld [vmem:[#allocation4 + $0x138] sm:$0xff] }
  0x37   : > { %1087 = vmatpush.bf16.msrb.mxu1 %v2489_v59  ;;  %p2747_p1 = pnand %p2746_p0, %p2910_p5  ;;  %p2752_p7 = por %p2751_p4, %p2750_p3 }
  0x38   : > { %950 = vmatpush.bf16.msra.mxu3 %v2504_v7  ;;  %930 = vmatpush.bf16.msra.mxu2 %v2497_v19 }
  0x39   : > { %p2748_p2 = pneg %p2747_p1 }
  0x3a   : > { %2165 = vmatmul.msk.bf16.gmra.mxu1 %vm506_vm14, %v2474_v49  ;;  %1070 = vmatpush.bf16.msrb.mxu0 %v2479_v3  ;;  %v2493_v49 = vld [vmem:[#allocation4 + $0x80] sm:$0xff] }
  0x3b   : > { %1088 = vmatpush.bf16.msrb.mxu1 %v2488_v62  ;;  %v2521_v62 = vld [vmem:[#allocation4 + $0x160] sm:$0xff]  ;;  %p2753_p8 = pnand %p2752_p7, %p2748_p2 }
  0x3c   : > { %951 = vmatpush.bf16.msra.mxu3 %v2503_v13  ;;  %931 = vmatpush.bf16.msra.mxu2 %v2496_v26  ;;  %v2518_v26 = vld [vmem:[#allocation4 + $0x148] sm:$0xff] }
  0x3e   : > { %1071 = vmatpush.bf16.msrb.mxu0 %v2478_v8  ;;  %v2475_v8 = vld [vmem:[#allocation2 + $0x14] sm:$0xf] }
  0x3f   : > { %1089 = vmatpush.bf16.msrb.mxu1 %v2487_v4 }
  0x40   : > { %952 = vmatpush.bf16.msra.mxu3 %v2502_v20  ;;  %932 = vmatpush.bf16.msra.mxu2 %v2495_v35 }
  0x42   : > { %1072 = vmatpush.bf16.msrb.mxu0 %v2477_v14  ;;  %v2514_v14 = vld [vmem:[#allocation4 + $0x128] sm:$0xff] }
  0x43   : > { %1090 = vmatpush.bf16.msrb.mxu1 %v2486_v9  ;;  %v2170_v9 = vld [vmem:[#allocation2 + $0x18] sm:$0xf0] }
  0x44   : > { %953 = vmatpush.bf16.msra.mxu3 %v2501_v27  ;;  %933 = vmatpush.bf16.msra.mxu2 %v2494_v42  ;;  %v3032_v20 = vor.u32 %v2475_v8, %v2170_v9 }
  0x46   : > { %v807_v30 = vshll.u32 %v3032_v20, 16 }
  0x47   : > { %1091 = vmatpush.bf16.msrb.mxu1 %v2485_v15  ;;  %v2519_v15 = vld [vmem:[#allocation4 + $0x150] sm:$0xff] }
  0x48   : > { %1272 = vmatpush.bf16.msrb.mxu3 %v2524_v36  ;;  %934 = vmatpush.bf16.msra.mxu2 %v2493_v49  ;;  %v809_v41 = vrot.slane %v807_v30, 1 }
  0x4c   : > { %1273 = vmatpush.bf16.msrb.mxu3 %v2523_v43  ;;  %1253 = vmatpush.bf16.msrb.mxu2 %v2516_v61 }
  0x50   : > { %1274 = vmatpush.bf16.msrb.mxu3 %v2522_v53  ;;  %1254 = vmatpush.bf16.msrb.mxu2 %v2515_v5 }
  0x54   : > { %1275 = vmatpush.bf16.msrb.mxu3 %v2521_v62  ;;  %1255 = vmatpush.bf16.msrb.mxu2 %v2514_v14 }
  0x58   : > { %1276 = vmatpush.bf16.msrb.mxu3 %v2520_v6 }
  0x5c   : > { %1277 = vmatpush.bf16.msrb.mxu3 %v2519_v15 }
  0x60   : > { %1278 = vmatpush.bf16.msrb.mxu3 %v2518_v26 }
  0xa2   : > { %v526_v11 = vpop.f32.mrf.mxu0 }
  0xa7   : > { %v550_v18 = vpop.f32.mrf.mxu1 }
  0xa8   : > { %v573_v21 = vsel %vm569_vm1, %v526_v11, %v550_v18 }
  0xa9   : > { %v581_v22 = vadd.f32 %v3018_v16, %v573_v21 }
  0xaa   : > { %v528_v25 = vpop.f32.mrf.mxu0 }
  0xab   : > { %v585_v24 = vpack.c.bf16 %v581_v22, %v581_v22 }
  0xad   : > { %v592_v28 = vshrl.u32 %v585_v24, 16  ;;  %v595_v33 = vshll.u32 %v585_v24, 16 }
  0xaf   : > { %v594_v31 = vrot.slane %v592_v28, 7  ;;  %v552_v34 = vpop.f32.mrf.mxu1 }
  0xb0   : > { %v574_v38 = vsel %vm570_vm3, %v528_v25, %v552_v34  ;;  %v2513_v25 = vld [vmem:[#allocation4 + $0x120] sm:$0xff] }
  0xb1   : > { %v597_v39 = vor.u32 %v595_v33, %v594_v31  ;;  %v582_v40 = vadd.f32 %v3018_v16, %v574_v38  ;;  %v598_v55 = vrot.slane %v594_v31, 4  ;;  %v639_v34 = vld [vmem:[#allocation2 + $0x20] sm:$0x1]  ;;  %1256 = vmatpush.bf16.msrb.mxu2 %v2513_v25 }
  0xb2   : > { %v531_v46 = vpop.f32.mrf.mxu0 }
  0xb3   : > { %v634_v44 = vsel %vm2991_vm15, %v597_v39, %v633_v37  ;;  %v586_v45 = vpack.c.bf16 %v582_v40, %v582_v40 }
  0xb4   : > { %635 = vst [vmem:[#allocation2] sm:$0xf] %v634_v44  ;;  %v2512_v44 = vld [vmem:[#allocation4 + $0x118] sm:$0xff] }
  0xb5   : > { %v600_v47 = vshrl.u32 %v586_v45, 16  ;;  %v603_v51 = vshll.u32 %v586_v45, 16  ;;  %v2517_v45 = vld [vmem:[#allocation4 + $0x140] sm:$0xff]  ;;  %1257 = vmatpush.bf16.msrb.mxu2 %v2512_v44 }
  0xb6   : > { %1279 = vmatpush.bf16.msrb.mxu3 %v2517_v45 }
  0xb7   : > { %v602_v50 = vrot.slane %v600_v47, 7  ;;  %v555_v52 = vpop.f32.mrf.mxu1  ;;  %v2511_v47 = vld [vmem:[#allocation4 + $0x110] sm:$0xff] }
  0xb8   : > { %v575_v54 = vsel %vm571_vm4, %v531_v46, %v555_v52 }
  0xb9   : > { %v605_v56 = vor.u32 %v603_v51, %v602_v50  ;;  %v583_v57 = vadd.f32 %v3018_v16, %v575_v54  ;;  %v607_v10 = vrot.slane %v602_v50, 4  ;;  %1258 = vmatpush.bf16.msrb.mxu2 %v2511_v47  ;;  %v2510_v50 = vld [vmem:[#allocation4 + $0x108] sm:$0xff] }
  0xba   : > { %v533_v1 = vpop.f32.mrf.mxu0 }
  0xbb   : > { %v606_v59 = vsel %vm2997_vm0, %v598_v55, %v605_v56  ;;  %v587_v60 = vpack.c.bf16 %v583_v57, %v583_v57  ;;  %v695_v13 = vld [vmem:[#allocation2] sm:$0xff] }
  0xbc   : > { %636 = vst [vmem:[#allocation2 + $0x8] sm:$0xf] %v606_v59  ;;  %v770_v21 = vunpack.c.l.b16 %v695_v13  ;;  %v771_v23 = vunpack.c.h.b16 %v695_v13  ;;  %v2509_v57 = vld [vmem:[#allocation4 + $0x100] sm:$0xff] }
  0xbd   : > { %v609_v63 = vshrl.u32 %v587_v60, 16  ;;  %v612_v3 = vshll.u32 %v587_v60, 16  ;;  %1259 = vmatpush.bf16.msrb.mxu2 %v2510_v50  ;;  %v819_v60 = vshrl.u32 %v3032_v20, 16  ;;  %v1103_v8 = vld [vmem:[#allocation2] sm:$0xee] }
  0xbe   : > { %v2632_v50 = vld [vmem:[%s3303_s6] ss:$0 sm:$0xff] }
  0xbf   : > { %v611_v2 = vrot.slane %v609_v63, 7  ;;  %v557_v4 = vpop.f32.mrf.mxu1 }
  0xc0   : > { %v576_v7 = vsel %vm572_vm5, %v533_v1, %v557_v4 }
  0xc1   : > { %v614_v11 = vor.u32 %v612_v3, %v611_v2  ;;  %v584_v12 = vadd.f32 %v3018_v16, %v576_v7  ;;  %v616_v36 = vrot.slane %v611_v2, 4  ;;  %1260 = vmatpush.bf16.msrb.mxu2 %v2509_v57  ;;  %v821_v3 = vor.u32 %v819_v60, %v809_v41 }
  0xc3   : > { %v615_v17 = vsel %vm2997_vm0, %v607_v10, %v614_v11  ;;  %v588_v18 = vpack.c.bf16 %v584_v12, %v584_v12  ;;  %v3030_v19 = vld [vmem:[#allocation2 + $0x8] sm:$0xff]  ;;  %v1139_v11 = vunpack.c.h.b16 %v1103_v8 }
  0xc4   : > { %637 = vst [vmem:[#allocation2 + $0x10] sm:$0xf] %v615_v17  ;;  %v772_v22 = vunpack.c.l.b16 %v3030_v19  ;;  %v773_v16 = vunpack.c.h.b16 %v3030_v19 }
  0xc5   : > { %v618_v24 = vshrl.u32 %v588_v18, 16  ;;  %v621_v33 = vshll.u32 %v588_v18, 16  ;;  %v1147_v18 = vrot.slane %v3032_v20, 1 }
  0xc6   : > { %v780_v27 = vpack.c.b16 %v772_v22, %v770_v21  ;;  %v781_v28 = vpack.c.b16 %v773_v16, %v771_v23  ;;  %v1141_v14 = vpack.c.b16 %v773_v16, %v1139_v11  ;;  %v1138_v23 = vunpack.c.l.b16 %v1103_v8 }
  0xc7   : > { %v620_v31 = vrot.slane %v618_v24, 7 }
  0xc8   : > { %1073 = vmatmul.bf16.vlgmr.msrb.gmra.mxu0 %v780_v27  ;;  %1092 = vmatmul.bf16.vlgmr.msrb.gmra.mxu1 %v781_v28  ;;  %v802_v35 = vshll.u32 %v781_v28, 16  ;;  %v800_v39 = vshrl.u32 %v781_v28, 16  ;;  %v790_v49 = vshll.u32 %v780_v27, 16  ;;  %v788_v58 = vshrl.u32 %v780_v27, 16 }
  0xc9   : > { %v623_v37 = vor.u32 %v621_v33, %v620_v31  ;;  %v625_v38 = vrot.slane %v620_v31, 4  ;;  %v1146_v17 = vrot.slane %v1141_v14, 1  ;;  %v1140_v24 = vpack.c.b16 %v772_v22, %v1138_v23 }
  0xca   : > { %v804_v40 = vrot.slane %v802_v35, 1  ;;  %v792_v54 = vrot.slane %v790_v49, 1 }
  0xcb   : > { %v624_v42 = vsel %vm2997_vm0, %v616_v36, %v623_v37  ;;  %v640_v43 = vsel %vm2947_vm2, %v625_v38, %v639_v34  ;;  %v2168_v51 = vld [vmem:[#allocation2 + $0x10] sm:$0xf]  ;;  %v1148_v21 = vsel %vm1142_vm7, %v1146_v17, %v1147_v18  ;;  %v1143_v26 = vrot.slane %v1140_v24, 1 }
  0xcc   : > { %638 = vst [vmem:[#allocation2 + $0x18] sm:$0xf] %v624_v42  ;;  %v805_v46 = vor.u32 %v804_v40, %v800_v39  ;;  %v793_v62 = vor.u32 %v792_v54, %v788_v58 }
  0xcd   : > { %641 = vst [vmem:[#allocation2 + $0x20] sm:$0x1] %v640_v43 }
  0xce   : > { %v810_v48 = vsel %vm786_vm6, %v805_v46, %v809_v41 }
  0xcf   : > { %954 = vmatmul.bf16.vlgmr.msra.gmra.mxu3 %v810_v48  ;;  %v2631_v48 = vld [vmem:[%s3302_s5] ss:$0 sm:$0xff] }
  0xd3   : > { %v2476_v52 = vld [vmem:[#allocation2 + $0x14] sm:$0xf0] }
  0xd4   : > { %v2169_v53 = vor.u32 %v2476_v52, %v2168_v51  ;;  %v731_v55 = vld [vmem:[#allocation2 + $0x20] sm:$0x11] }
  0xd5   : > { %v779_v56 = vunpack.c.h.b16 %v731_v55  ;;  %v778_v4 = vunpack.c.l.b16 %v731_v55  ;;  %v3069_v55 = vld [vmem:[%s3304_s7] ss:$0 sm:$0xff] }
  0xd6   : > { %v795_v59 = vshll.u32 %v2169_v53, 16  ;;  %v811_v10 = vshrl.u32 %v2169_v53, 16  ;;  %v1144_v25 = vrot.slane %v2169_v53, 1 }
  0xd7   : > { %v785_v61 = vpack.c.b16 %v779_v56, %v779_v56  ;;  %v784_v7 = vpack.c.b16 %v778_v4, %v778_v4 }
  0xd8   : > { %1078 = vmatmul.bf16.gmra.mxu0 %v2169_v53  ;;  %v797_v63 = vrot.slane %v795_v59, 1  ;;  %1097 = vmatmul.bf16.gmra.mxu1 %v3032_v20  ;;  %v1145_v27 = vsel %vm1142_vm7, %v1143_v26, %v1144_v25 }
  0xd9   : > { %v823_v1 = vshll.u32 %v785_v61, 16  ;;  %v815_v9 = vshll.u32 %v784_v7, 16  ;;  %v1151_v28 = vrot.slane %v785_v61, 1  ;;  %v1149_v30 = vrot.slane %v784_v7, 1 }
  0xda   : > { %v798_v2 = vsel %vm786_vm6, %v793_v62, %v797_v63  ;;  %v813_v12 = vor.u32 %v811_v10, %v797_v63 }
  0xdb   : > { %935 = vmatmul.bf16.vlgmr.msra.gmra.mxu2 %v798_v2  ;;  %v825_v5 = vrot.slane %v823_v1, 1  ;;  %v817_v13 = vrot.slane %v815_v9, 1  ;;  %v1152_v16 = vsel %vm1142_vm7, %v1147_v18, %v1151_v28  ;;  %v1150_v20 = vsel %vm1142_vm7, %v1144_v25, %v1149_v30 }
  0xdd   : > { %v826_v6 = vsel %vm786_vm6, %v821_v3, %v825_v5  ;;  %v818_v15 = vsel %vm786_vm6, %v813_v12, %v817_v13 }
  0xdf   : > { %959 = vmatmul.bf16.gmra.mxu3 %v826_v6 }
  0xeb   : > { %940 = vmatmul.bf16.gmra.mxu2 %v818_v15 }
  0xef   : > { %1280 = vmatmul.bf16.vlgmr.msrb.gmra.mxu3 %v1148_v21 }
  0xfb   : > { %1261 = vmatmul.bf16.vlgmr.msrb.gmra.mxu2 %v1145_v27 }
  0xff   : > { %1285 = vmatmul.bf16.gmra.mxu3 %v1152_v16 }
 0x10b   : > { %1266 = vmatmul.bf16.gmra.mxu2 %v1150_v20 }
 0x145   : > { %v1074_v37 = vpop.f32.mrf.mxu0  ;;  %v1093_v40 = vpop.f32.mrf.mxu1 }
 0x14d   : > { %v1076_v43 = vpop.f32.mrf.mxu0  ;;  %v1095_v51 = vpop.f32.mrf.mxu1 }
 0x152   : > { %v955_v31 = vpop.f32.mrf.mxu3 }
 0x155   : > { %v1079_v61 = vpop.f32.mrf.mxu0  ;;  %v1098_v2 = vpop.f32.mrf.mxu1 }
 0x15a   : > { %v957_v33 = vpop.f32.mrf.mxu3 }
 0x15d   : > { %v1081_v15 = vpop.f32.mrf.mxu0  ;;  %v1100_v23 = vpop.f32.mrf.mxu1 }
 0x15e   : > { %v936_v34 = vpop.f32.mrf.mxu2 }
 0x15f   : > { %v956_v39 = vadd.f32 %v955_v31, %v936_v34 }
 0x161   : > { %v1075_v42 = vadd.f32 %v1074_v37, %v956_v39 }
 0x162   : > { %v960_v35 = vpop.f32.mrf.mxu3 }
 0x163   : > { %v1094_v46 = vadd.f32 %v1093_v40, %v1075_v42 }
 0x166   : > { %v938_v36 = vpop.f32.mrf.mxu2 }
 0x167   : > { %v958_v45 = vadd.f32 %v957_v33, %v938_v36 }
 0x169   : > { %v1077_v53 = vadd.f32 %v1076_v43, %v958_v45  ;;  %v2532_v45 = vld [vmem:[#allocation7 + $0x30] sm:$0xff] }
 0x16a   : > { %v962_v19 = vpop.f32.mrf.mxu3 }
 0x16b   : > { %v1096_v59 = vadd.f32 %v1095_v51, %v1077_v53 }
 0x16e   : > { %v941_v22 = vpop.f32.mrf.mxu2 }
 0x16f   : > { %v961_v62 = vadd.f32 %v960_v35, %v941_v22  ;;  %v2533_v22 = vld [vmem:[#allocation7 + $0x38] sm:$0xff] }
 0x170   : > { %1722 = vmatpush.bf16.msra.mxu1 %v2533_v22 }
 0x171   : > { %v1080_v5 = vadd.f32 %v1079_v61, %v961_v62 }
 0x172   : > { %v1281_v41 = vpop.f32.mrf.mxu3 }
 0x173   : > { %v1099_v14 = vadd.f32 %v1098_v2, %v1080_v5 }
 0x174   : > { %1723 = vmatpush.bf16.msra.mxu1 %v2532_v45 }
 0x176   : > { %v943_v38 = vpop.f32.mrf.mxu2 }
 0x177   : > { %v963_v10 = vadd.f32 %v962_v19, %v943_v38 }
 0x179   : > { %v1082_v21 = vadd.f32 %v1081_v15, %v963_v10 }
 0x17a   : > { %v1283_v52 = vpop.f32.mrf.mxu3 }
 0x17b   : > { %v1101_v20 = vadd.f32 %v1100_v23, %v1082_v21 }
 0x17e   : > { %v1262_v44 = vpop.f32.mrf.mxu2 }
 0x17f   : > { %v1282_v47 = vadd.f32 %v1281_v41, %v1262_v44 }
 0x181   : > { %v1291_v49 = vadd.f32 %v1282_v47, %v1094_v46 }
 0x182   : > { %v1286_v6 = vpop.f32.mrf.mxu3 }
 0x183   : > { %v1299_v54 = vadd.f32 %v2631_v48, %v1291_v49 }
 0x185   : > { %v1307_v56 = vmul.f32 %v2632_v50, %v1299_v54 }
 0x186   : > { %v1264_v57 = vpop.f32.mrf.mxu2 }
 0x187   : > { %v3072_v58 = vadd.f32 %v3069_v55, %v1307_v56  ;;  %v1284_v60 = vadd.f32 %v1283_v52, %v1264_v57 }
 0x189   : > { %v3075_v63 = vmul.f32 0.70710677, %v3072_v58  ;;  %v1292_v1 = vadd.f32 %v1284_v60, %v1096_v59  ;;  %v2531_v59 = vld [vmem:[#allocation7 + $0x28] sm:$0xff] }
 0x18a   : > { %v1288_v27 = vpop.f32.mrf.mxu3  ;;  %1724 = vmatpush.bf16.msra.mxu1 %v2531_v59 }
 0x18b   : > { %v3078_v3 = vand.u32 2147483647, %v3075_v63  ;;  %v1300_v4 = vadd.f32 %v2631_v48, %v1292_v1 }
 0x18d   : > { %v1331_v7 = vmul.f32 0.3275911, %v3078_v3  ;;  %v1308_v8 = vmul.f32 %v2632_v50, %v1300_v4  ;;  %v1435_v52 = vsub.f32 0.0, %v3078_v3 }
 0x18e   : > { %v1267_v9 = vpop.f32.mrf.mxu2 }
 0x18f   : > { %v1335_v11 = vadd.f32 1.0, %v1331_v7  ;;  %v3082_v12 = vadd.f32 %v3069_v55, %v1308_v8  ;;  %v1287_v13 = vadd.f32 %v1286_v6, %v1267_v9  ;;  %v1439_v62 = vmul.f32 %v1435_v52, %v3078_v3  ;;  %v2530_v6 = vld [vmem:[#allocation7 + $0x20] sm:$0xff]  ;;  %v2548_v52 = vld [vmem:[#allocation7 + $0xb0] sm:$0xff] }
 0x190   : > { %1725 = vmatpush.bf16.msra.mxu1 %v2530_v6 }
 0x191   : > { %2637 = vrcp.f32 %v1335_v11  ;;  %v3085_v17 = vmul.f32 0.70710677, %v3082_v12  ;;  %v1293_v18 = vadd.f32 %v1287_v13, %v1099_v14  ;;  %v1350_v37 = vand.u32 2147483648, %v1335_v11 }
 0x192   : > { %v1348_v40 = vand.u32 2147483647, %v1335_v11  ;;  %vm1344_vm9 = vweird.f32 %v1335_v11  ;;  %v1443_v13 = vmul.f32 1.442695, %v1439_v62 }
 0x193   : > { %v3088_v24 = vand.u32 2147483647, %v3085_v17  ;;  %v1301_v25 = vadd.f32 %v2631_v48, %v1293_v18  ;;  %v1351_v46 = vor.u32 1.1754944e-38, %v1350_v37 }
 0x194   : > { %vm1349_vm11 = vcmp.eq.f32.partialorder %v1348_v40, 8.507059e+37 }
 0x195   : > { %v1332_v26 = vmul.f32 0.3275911, %v3088_v24  ;;  %v1309_v28 = vmul.f32 %v2632_v50, %v1301_v25  ;;  %v1436_v3 = vsub.f32 0.0, %v3088_v24  ;;  %v2529_v25 = vld [vmem:[#allocation7 + $0x18] sm:$0xff] }
 0x196   : > { %v1269_v16 = vpop.f32.mrf.mxu2  ;;  %1726 = vmatpush.bf16.msra.mxu1 %v2529_v25 }
 0x197   : > { %v2638_v30 = vpop.eup %2637  ;;  %v1289_v31 = vadd.f32 %v1288_v27, %v1269_v16  ;;  %v1336_v34 = vadd.f32 1.0, %v1332_v26  ;;  %v3092_v35 = vadd.f32 %v3069_v55, %v1309_v28  ;;  %v1440_v28 = vmul.f32 %v1436_v3, %v3088_v24  ;;  %v2541_v24 = vld [vmem:[#allocation7 + $0x78] sm:$0xff] }
 0x198   : > { %v1340_v33 = vmul.f32 %v2638_v30, %v1335_v11  ;;  %vm1345_vm8 = vweird.f32 %v2638_v30  ;;  %1653 = vmatpush.bf16.msra.mxu0 %v2541_v24 }
 0x199   : > { %v1294_v36 = vadd.f32 %v1289_v31, %v1101_v20  ;;  %2639 = vrcp.f32 %v1336_v34  ;;  %v3095_v38 = vmul.f32 0.70710677, %v3092_v35  ;;  %vm1346_vm10 = vmor %vm1344_vm9, %vm1345_vm8  ;;  %v1363_v2 = vand.u32 2147483647, %v1336_v34 }
 0x19a   : > { %v1341_v19 = vsub.f32 1.0, %v1340_v33  ;;  %vm1359_vm13 = vweird.f32 %v1336_v34 }
 0x19b   : > { %v1302_v41 = vadd.f32 %v2631_v48, %v1294_v36  ;;  %v3098_v42 = vand.u32 2147483647, %v3095_v38  ;;  %vm1364_vm1 = vcmp.eq.f32.partialorder %v1363_v2, 8.507059e+37  ;;  %v2528_v36 = vld [vmem:[#allocation7 + $0x10] sm:$0xff] }
 0x19c   : > { %v1342_v39 = vmul.f32 %v2638_v30, %v1341_v19  ;;  %v2549_v19 = vld [vmem:[#allocation7 + $0xb8] sm:$0xff]  ;;  %1727 = vmatpush.bf16.msra.mxu1 %v2528_v36 }
 0x19d   : > { %v1310_v44 = vmul.f32 %v2632_v50, %v1302_v41  ;;  %v1333_v47 = vmul.f32 0.3275911, %v3098_v42  ;;  %1817 = vmatpush.bf16.msra.mxu2 %v2549_v19  ;;  %v1437_v45 = vsub.f32 0.0, %v3098_v42  ;;  %2558 = vmatpush.bf16.msra.mxu3 %v2549_v19 }
 0x19e   : > { %v1343_v43 = vadd.f32 %v2638_v30, %v1342_v39  ;;  %v1445_v39 = vmul.f32 1.442695, %v1440_v28 }
 0x19f   : > { %v2640_v49 = vpop.eup %2639  ;;  %v3103_v53 = vadd.f32 %v3069_v55, %v1310_v44  ;;  %v3107_v56 = vadd.f32 1.0, %v1333_v47  ;;  %v1365_v55 = vand.u32 2147483648, %v1336_v34 }
 0x1a0   : > { %v1347_v51 = vsel %vm1346_vm10, %v2638_v30, %v1343_v43  ;;  %v1355_v54 = vmul.f32 %v2640_v49, %v1336_v34  ;;  %vm1360_vm12 = vweird.f32 %v2640_v49 }
 0x1a1   : > { %v3105_v48 = vsel %vm1349_vm11, %v1351_v46, %v1347_v51  ;;  %v3111_v57 = vmul.f32 0.70710677, %v3103_v53  ;;  %2641 = vrcp.f32 %v3107_v56  ;;  %vm1361_vm14 = vmor %vm1359_vm13, %vm1360_vm12  ;;  %v1366_v10 = vor.u32 1.1754944e-38, %v1365_v55  ;;  %v2527_v51 = vld [vmem:[#allocation7 + $0x8] sm:$0xff]  ;;  %1818 = vmatpush.bf16.msra.mxu2 %v2548_v52  ;;  %2559 = vmatpush.bf16.msra.mxu3 %v2548_v52 }
 0x1a2   : > { %v1399_v50 = vmul.f32 1.0614054, %v3105_v48  ;;  %v1356_v60 = vsub.f32 1.0, %v1355_v54  ;;  %v1380_v20 = vand.u32 2147483648, %v3107_v56  ;;  %v1378_v34 = vand.u32 2147483647, %v3107_v56  ;;  %1728 = vmatpush.bf16.msra.mxu1 %v2527_v51 }
 0x1a3   : > { %v3116_v4 = vand.u32 2147483647, %v3111_v57  ;;  %vm1374_vm4 = vweird.f32 %v3107_v56  ;;  %v1441_v55 = vmul.f32 %v1437_v45, %v3098_v42  ;;  %vm1459_vm11 = vcmp.ge.f32.partialorder %v3075_v63, 0.0  ;;  %v2544_v51 = vld [vmem:[#allocation7 + $0x90] sm:$0xff] }
 0x1a4   : > { %v1403_v61 = vadd.f32 -1.4531521, %v1399_v50  ;;  %v1357_v1 = vmul.f32 %v2640_v49, %v1356_v60  ;;  %v1381_v44 = vor.u32 1.1754944e-38, %v1380_v20  ;;  %vm1379_vm8 = vcmp.eq.f32.partialorder %v1378_v34, 8.507059e+37  ;;  %v2538_v34 = vld [vmem:[#allocation7 + $0x60] sm:$0xff] }
 0x1a5   : > { %v1334_v8 = vmul.f32 0.3275911, %v3116_v4  ;;  %v1438_v63 = vsub.f32 0.0, %v3116_v4 }
 0x1a6   : > { %v1407_v5 = vmul.f32 %v1403_v61, %v3105_v48  ;;  %v1358_v7 = vadd.f32 %v2640_v49, %v1357_v1 }
 0x1a7   : > { %v2642_v11 = vpop.eup %2641  ;;  %v3121_v15 = vadd.f32 1.0, %v1334_v8  ;;  %v2526_v8 = vld [vmem:[#allocation7] sm:$0xff] }
 0x1a8   : > { %v1411_v9 = vadd.f32 1.4214138, %v1407_v5  ;;  %v1362_v14 = vsel %vm1361_vm14, %v2640_v49, %v1358_v7  ;;  %v1370_v23 = vmul.f32 %v2642_v11, %v3107_v56  ;;  %vm1375_vm3 = vweird.f32 %v2642_v11  ;;  %1729 = vmatpush.bf16.msra.mxu1 %v2526_v8  ;;  %v2535_v8 = vld [vmem:[#allocation7 + $0x48] sm:$0xff] }
 0x1a9   : > { %v3124_v21 = vsel %vm1364_vm1, %v1366_v10, %v1362_v14  ;;  %2643 = vrcp.f32 %v3121_v15  ;;  %vm1376_vm5 = vmor %vm1374_vm4, %vm1375_vm3  ;;  %v1393_v1 = vand.u32 2147483647, %v3121_v15  ;;  %v1395_v2 = vand.u32 2147483648, %v3121_v15  ;;  %v2539_v14 = vld [vmem:[#allocation7 + $0x68] sm:$0xff] }
 0x1aa   : > { %v1415_v18 = vmul.f32 %v1411_v9, %v3105_v48  ;;  %v1400_v26 = vmul.f32 1.0614054, %v3124_v21  ;;  %v1371_v16 = vsub.f32 1.0, %v1370_v23  ;;  %2645 = vpow2.f32 %v1443_v13  ;;  %v2547_v9 = vld [vmem:[#allocation7 + $0xa8] sm:$0xff] }
 0x1ab   : > { %2647 = vpow2.f32 %v1445_v39  ;;  %v1319_v10 = vmul.f32 0.5, %v3072_v58  ;;  %vm1389_vm10 = vweird.f32 %v3121_v15  ;;  %1819 = vmatpush.bf16.msra.mxu2 %v2547_v9  ;;  %v1447_v23 = vmul.f32 1.442695, %v1441_v55  ;;  %2560 = vmatpush.bf16.msra.mxu3 %v2547_v9  ;;  %v2545_v39 = vld [vmem:[#allocation7 + $0x98] sm:$0xff] }
 0x1ac   : > { %v1419_v27 = vadd.f32 -0.28449672, %v1415_v18  ;;  %v1404_v30 = vadd.f32 -1.4531521, %v1400_v26  ;;  %v1372_v33 = vmul.f32 %v2642_v11, %v1371_v16  ;;  %v1396_v25 = vor.u32 1.1754944e-38, %v1395_v2  ;;  %v2546_v16 = vld [vmem:[#allocation7 + $0xa0] sm:$0xff] }
 0x1ad   : > { %vm1394_vm13 = vcmp.eq.f32.partialorder %v1393_v1, 8.507059e+37  ;;  %2649 = vpow2.f32 %v1447_v23  ;;  %vm1460_vm14 = vcmp.ge.f32.partialorder %v3085_v17, 0.0  ;;  %v2543_v1 = vld [vmem:[#allocation7 + $0x88] sm:$0xff]  ;;  %vm1461_vm1 = vcmp.ge.f32.partialorder %v3095_v38, 0.0 }
 0x1ae   : > { %v1423_v31 = vmul.f32 %v1419_v27, %v3105_v48  ;;  %v1408_v22 = vmul.f32 %v1404_v30, %v3124_v21  ;;  %v1373_v40 = vadd.f32 %v2642_v11, %v1372_v33 }
 0x1af   : > { %v2644_v41 = vpop.eup %2643  ;;  %1820 = vmatpush.bf16.msra.mxu2 %v2546_v16  ;;  %2561 = vmatpush.bf16.msra.mxu3 %v2546_v16 }
 0x1b0   : > { %v1427_v37 = vadd.f32 0.2548296, %v1423_v31  ;;  %v1412_v43 = vadd.f32 1.4214138, %v1408_v22  ;;  %v1377_v47 = vsel %vm1376_vm5, %v2642_v11, %v1373_v40  ;;  %v1385_v49 = vmul.f32 %v2644_v41, %v3121_v15  ;;  %v2646_v54 = vpop.eup %2645 }
 0x1b1   : > { %v3139_v50 = vsel %vm1379_vm8, %v1381_v44, %v1377_v47  ;;  %vm1390_vm9 = vweird.f32 %v2644_v41  ;;  %v2648_v58 = vpop.eup %2647  ;;  %v2537_v44 = vld [vmem:[#allocation7 + $0x58] sm:$0xff] }
 0x1b2   : > { %v1431_v46 = vmul.f32 %v1427_v37, %v3105_v48  ;;  %v1416_v56 = vmul.f32 %v1412_v43, %v3124_v21  ;;  %v1401_v60 = vmul.f32 1.0614054, %v3139_v50  ;;  %v1386_v61 = vsub.f32 1.0, %v1385_v49  ;;  %v2540_v48 = vld [vmem:[#allocation7 + $0x70] sm:$0xff]  ;;  %vm1391_vm12 = vmor %vm1389_vm10, %vm1390_vm9 }
 0x1b3   : > { %1654 = vmatpush.bf16.msra.mxu0 %v2540_v48  ;;  %1821 = vmatpush.bf16.msra.mxu2 %v2545_v39  ;;  %v2650_v17 = vpop.eup %2649 }
 0x1b4   : > { %v1451_v59 = vmul.f32 %v2646_v54, %v1431_v46  ;;  %v1420_v62 = vadd.f32 -0.28449672, %v1416_v56  ;;  %v1405_v6 = vadd.f32 -1.4531521, %v1401_v60  ;;  %v1387_v7 = vmul.f32 %v2644_v41, %v1386_v61  ;;  %2562 = vmatpush.bf16.msra.mxu3 %v2545_v39  ;;  %v1523_v60 = vld [vmem:[#allocation3] sm:$0xf] }
 0x1b5   : > { %v1320_v61 = vmul.f32 0.5, %v3082_v12 }
 0x1b6   : > { %v1455_v5 = vsub.f32 1.0, %v1451_v59  ;;  %v1424_v3 = vmul.f32 %v1420_v62, %v3124_v21  ;;  %v1409_v13 = vmul.f32 %v1405_v6, %v3139_v50  ;;  %v1388_v42 = vadd.f32 %v2644_v41, %v1387_v7 }
 0x1b7   : > { %1655 = vmatpush.bf16.msra.mxu0 %v2539_v14  ;;  %1822 = vmatpush.bf16.msra.mxu2 %v2544_v51  ;;  %v2534_v14 = vld [vmem:[#allocation7 + $0x40] sm:$0xff] }
 0x1b8   : > { %v1463_v11 = vsub.f32 0.0, %v1455_v5  ;;  %v1428_v18 = vadd.f32 0.2548296, %v1424_v3  ;;  %v1413_v27 = vadd.f32 1.4214138, %v1409_v13  ;;  %v1392_v28 = vsel %vm1391_vm12, %v2644_v41, %v1388_v42  ;;  %2563 = vmatpush.bf16.msra.mxu3 %v2544_v51  ;;  %v2542_v42 = vld [vmem:[#allocation7 + $0x80] sm:$0xff] }
 0x1b9   : > { %v3152_v20 = vsel %vm1394_vm13, %v1396_v25, %v1392_v28 }
 0x1ba   : > { %v1467_v26 = vsel %vm1459_vm11, %v1455_v5, %v1463_v11  ;;  %v1432_v15 = vmul.f32 %v1428_v18, %v3124_v21  ;;  %v1417_v31 = vmul.f32 %v1413_v27, %v3139_v50  ;;  %v1402_v33 = vmul.f32 1.0614054, %v3152_v20 }
 0x1bb   : > { %v1471_v30 = vadd.f32 1.0, %v1467_v26  ;;  %1656 = vmatpush.bf16.msra.mxu0 %v2538_v34  ;;  %v1442_v21 = vmul.f32 %v1438_v63, %v3116_v4  ;;  %v2536_v4 = vld [vmem:[#allocation7 + $0x50] sm:$0xff]  ;;  %1823 = vmatpush.bf16.msra.mxu2 %v2543_v1  ;;  %v1321_v26 = vmul.f32 0.5, %v3092_v35 }
 0x1bc   : > { %v1452_v19 = vmul.f32 %v2648_v58, %v1432_v15  ;;  %v1421_v22 = vadd.f32 -0.28449672, %v1417_v31  ;;  %v1406_v37 = vadd.f32 -1.4531521, %v1402_v33  ;;  %2564 = vmatpush.bf16.msra.mxu3 %v2543_v1 }
 0x1bd   : > { %v1475_v36 = vmul.f32 %v1471_v30, %v1319_v10  ;;  %v1449_v59 = vmul.f32 1.442695, %v1442_v21 }
 0x1be   : > { %v1456_v24 = vsub.f32 1.0, %v1452_v19  ;;  %v1425_v41 = vmul.f32 %v1421_v22, %v3139_v50  ;;  %v1410_v43 = vmul.f32 %v1406_v37, %v3152_v20  ;;  %v1322_v19 = vmul.f32 0.5, %v3103_v53 }
 0x1bf   : > { %v1479_v40 = vpack.c.bf16 %v1475_v36, %v1475_v36  ;;  %1657 = vmatpush.bf16.msra.mxu0 %v2537_v44  ;;  %2651 = vpow2.f32 %v1449_v59  ;;  %1824 = vmatpush.bf16.msra.mxu2 %v2542_v42 }
 0x1c0   : > { %v1464_v46 = vsub.f32 0.0, %v1456_v24  ;;  %v1429_v47 = vadd.f32 0.2548296, %v1425_v41  ;;  %v1414_v49 = vadd.f32 1.4214138, %v1410_v43  ;;  %2565 = vmatpush.bf16.msra.mxu3 %v2542_v42 }
 0x1c1   : > { %v1484_v45 = vshrl.u32 %v1479_v40, 16  ;;  %v1487_v54 = vshll.u32 %v1479_v40, 16 }
 0x1c2   : > { %v1468_v56 = vsel %vm1460_vm14, %v1456_v24, %v1464_v46  ;;  %v1433_v62 = vmul.f32 %v1429_v47, %v3139_v50  ;;  %v1418_v55 = vmul.f32 %v1414_v49, %v3152_v20 }
 0x1c3   : > { %v1486_v52 = vrot.slane %v1484_v45, 7  ;;  %v1472_v48 = vadd.f32 1.0, %v1468_v56  ;;  %1658 = vmatpush.bf16.msra.mxu0 %v2536_v4 }
 0x1c4   : > { %v1453_v6 = vmul.f32 %v2650_v17, %v1433_v62  ;;  %v1422_v7 = vadd.f32 -0.28449672, %v1418_v55 }
 0x1c5   : > { %v1489_v2 = vor.u32 %v1487_v54, %v1486_v52  ;;  %v1476_v5 = vmul.f32 %v1472_v48, %v1320_v61  ;;  %v2652_v58 = vpop.eup %2651  ;;  %v1490_v28 = vrot.slane %v1486_v52, 4 }
 0x1c6   : > { %v1457_v10 = vsub.f32 1.0, %v1453_v6  ;;  %v1426_v50 = vmul.f32 %v1422_v7, %v3152_v20 }
 0x1c7   : > { %v1524_v9 = vsel %vm2991_vm15, %v1489_v2, %v1523_v60  ;;  %v1480_v12 = vpack.c.bf16 %v1476_v5, %v1476_v5  ;;  %1659 = vmatpush.bf16.msra.mxu0 %v2535_v8  ;;  %vm1462_vm15 = vcmp.ge.f32.partialorder %v3111_v57, 0.0  ;;  %v1529_v57 = vld [vmem:[#allocation3 + $0x10] sm:$0x1] }
 0x1c8   : > { %1525 = vst [vmem:[#allocation3] sm:$0xf] %v1524_v9  ;;  %v1465_v11 = vsub.f32 0.0, %v1457_v10  ;;  %v1430_v13 = vadd.f32 0.2548296, %v1426_v50 }
 0x1c9   : > { %v1492_v3 = vshrl.u32 %v1480_v12, 16  ;;  %v1495_v23 = vshll.u32 %v1480_v12, 16 }
 0x1ca   : > { %v1469_v29 = vsel %vm1461_vm1, %v1457_v10, %v1465_v11  ;;  %v1434_v25 = vmul.f32 %v1430_v13, %v3152_v20 }
 0x1cb   : > { %v1494_v18 = vrot.slane %v1492_v3, 7  ;;  %v1473_v27 = vadd.f32 1.0, %v1469_v29  ;;  %1660 = vmatpush.bf16.msra.mxu0 %v2534_v14  ;;  %v2634_v14 = vld [vmem:[%s3306_s9] ss:$0 sm:$0xff] }
 0x1cc   : > { %v1454_v30 = vmul.f32 %v2652_v58, %v1434_v25  ;;  %v2635_v25 = vld [vmem:[%s3307_s10] ss:$0 sm:$0xff] }
 0x1cd   : > { %v1497_v16 = vor.u32 %v1495_v23, %v1494_v18  ;;  %v1477_v15 = vmul.f32 %v1473_v27, %v1321_v26  ;;  %v1499_v37 = vrot.slane %v1494_v18, 4  ;;  %v2636_v26 = vld [vmem:[%s3308_s11] ss:$0 sm:$0xff] }
 0x1ce   : > { %v1458_v63 = vsub.f32 1.0, %v1454_v30 }
 0x1cf   : > { %v1498_v38 = vsel %vm2997_vm0, %v1490_v28, %v1497_v16  ;;  %v1481_v31 = vpack.c.bf16 %v1477_v15, %v1477_v15  ;;  %v2556_v56 = vld [vmem:[#allocation3] sm:$0xe] }
 0x1d0   : > { %1526 = vst [vmem:[#allocation3 + $0x4] sm:$0xf] %v1498_v38  ;;  %v1466_v33 = vsub.f32 0.0, %v1458_v63 }
 0x1d1   : > { %v1501_v34 = vshrl.u32 %v1481_v31, 16  ;;  %v1504_v35 = vshll.u32 %v1481_v31, 16 }
 0x1d2   : > { %v1470_v20 = vsel %vm1462_vm15, %v1458_v63, %v1466_v33 }
 0x1d3   : > { %v1503_v36 = vrot.slane %v1501_v34, 7  ;;  %v1474_v22 = vadd.f32 1.0, %v1470_v20 }
 0x1d5   : > { %v1506_v39 = vor.u32 %v1504_v35, %v1503_v36  ;;  %v1478_v40 = vmul.f32 %v1474_v22, %v1322_v19  ;;  %v1508_v46 = vrot.slane %v1503_v36, 4 }
 0x1d7   : > { %v2552_v24 = vld [vmem:[#allocation3] sm:$0xff]   ;;  %v1507_v21 = vsel %vm2997_vm0, %v1499_v37, %v1506_v39  ;;  %v1482_v41 = vpack.c.bf16 %v1478_v40, %v1478_v40 }
 0x1d8   : > { %1730 = vmatmul.bf16.vlgmr.msra.gmra.mxu1 %v2552_v24  ;;  %1527 = vst [vmem:[#allocation3 + $0x8] sm:$0xf] %v1507_v21  ;;  %v2555_v52 = vld [vmem:[#allocation3] sm:$0xf0]  ;;  %v1586_v54 = vshll.u32 %v2552_v24, 16  ;;  %v1584_v61 = vshrl.u32 %v2552_v24, 16 }
 0x1d9   : > { %v1510_v43 = vshrl.u32 %v1482_v41, 16  ;;  %v1513_v45 = vshll.u32 %v1482_v41, 16  ;;  %v2557_v59 = vor.u32 %v2556_v56, %v2555_v52 }
 0x1da   : > { %v1588_v4 = vrot.slane %v1586_v54, 1 }
 0x1db   : > { %v1512_v44 = vrot.slane %v1510_v43, 7  ;;  %v1762_v62 = vrot.slane %v2557_v59, 1 }
 0x1dc   : > { %v1589_v32 = vor.u32 %v1588_v4, %v1584_v61 }
 0x1dd   : > { %v1515_v47 = vor.u32 %v1513_v45, %v1512_v44  ;;  %v1517_v49 = vrot.slane %v1512_v44, 4 }
 0x1df   : > { %v1516_v53 = vsel %vm2997_vm0, %v1508_v46, %v1515_v47  ;;  %v1530_v51 = vsel %vm2947_vm2, %v1517_v49, %v1529_v57 }
 0x1e0   : > { %1528 = vst [vmem:[#allocation3 + $0xc] sm:$0xf] %v1516_v53 }
 0x1e1   : > { %1531 = vst [vmem:[#allocation3 + $0x10] sm:$0x1] %v1530_v51 }
 0x1e7   : > { %v2525_v60 = vld [vmem:[#allocation3 + $0x8] sm:$0xff] }
 0x1e8   : > { %v1552_v48 = vld [vmem:[#allocation3 + $0x10] sm:$0x1]  ;;  %1735 = vmatmul.bf16.gmra.mxu1 %v2525_v60  ;;  %v1763_v55 = vrot.slane %v2525_v60, 1  ;;  %v1591_v1 = vshll.u32 %v2525_v60, 16  ;;  %v1595_v12 = vshrl.u32 %v2525_v60, 16 }
 0x1e9   : > { %v1579_v17 = vunpack.c.l.b16 %v1552_v48 }
 0x1ea   : > { %v1764_v2 = vsel %vm1142_vm7, %v1762_v62, %v1763_v55  ;;  %v1593_v0 = vrot.slane %v1591_v1, 1 }
 0x1eb   : > { %v1582_v5 = vpack.c.b16 %v1579_v17, %v1579_v17  ;;  %1825 = vmatmul.bf16.vlgmr.msra.gmra.mxu2 %v1764_v2 }
 0x1ec   : > { %v1594_v6 = vsel %vm786_vm6, %v1589_v32, %v1593_v0  ;;  %v1597_v10 = vor.u32 %v1595_v12, %v1593_v0 }
 0x1ed   : > { %v1765_v7 = vrot.slane %v1582_v5, 1  ;;  %1661 = vmatmul.bf16.vlgmr.msra.gmra.mxu0 %v1594_v6  ;;  %v1599_v9 = vshll.u32 %v1582_v5, 16 }
 0x1ef   : > { %v1766_v8 = vsel %vm1142_vm7, %v1763_v55, %v1765_v7  ;;  %v1601_v50 = vrot.slane %v1599_v9, 1 }
 0x1f0   : > { %1830 = vmatmul.bf16.vlgmr.msra.gmra.mxu3 %v1766_v8 }
 0x1f1   : > { %v1602_v3 = vsel %vm786_vm6, %v1597_v10, %v1601_v50 }
 0x1fd   : > { %1666 = vmatmul.bf16.gmra.mxu0 %v1602_v3 }
 0x255   : > { %v1731_v11 = vpop.f32.mrf.mxu1 }
 0x25d   : > { %v1733_v18 = vpop.f32.mrf.mxu1 }
 0x265   : > { %v1736_v31 = vpop.f32.mrf.mxu1 }
 0x26a   : > { %v1662_v13 = vpop.f32.mrf.mxu0 }
 0x26b   : > { %v1732_v42 = vadd.f32 %v1731_v11, %v1662_v13 }
 0x26d   : > { %v1738_v41 = vpop.f32.mrf.mxu1 }
 0x26e   : > { %v1826_v23 = vpop.f32.mrf.mxu2 }
 0x26f   : > { %v1836_v29 = vadd.f32 %v1826_v23, %v1732_v42 }
 0x271   : > { %v1844_v58 = vadd.f32 %v2634_v14, %v1836_v29 }
 0x272   : > { %v1664_v27 = vpop.f32.mrf.mxu0 }
 0x273   : > { %v1852_v28 = vmul.f32 %v2635_v25, %v1844_v58  ;;  %v1734_v30 = vadd.f32 %v1733_v18, %v1664_v27  ;;  %v1831_v20 = vpop.f32.mrf.mxu3 }
 0x275   : > { %v3193_v16 = vadd.f32 %v2636_v26, %v1852_v28 }
 0x276   : > { %v1828_v15 = vpop.f32.mrf.mxu2 }
 0x277   : > { %v3196_v38 = vmul.f32 0.70710677, %v3193_v16  ;;  %v1837_v63 = vadd.f32 %v1828_v15, %v1734_v30 }
 0x279   : > { %v1872_v33 = vand.u32 2147483647, %v3196_v38  ;;  %v1845_v34 = vadd.f32 %v2634_v14, %v1837_v63  ;;  %vm2004_vm1 = vcmp.ge.f32.partialorder %v3196_v38, 0.0  ;;  %v1864_v38 = vmul.f32 0.5, %v3193_v16 }
 0x27a   : > { %v1667_v36 = vpop.f32.mrf.mxu0 }
 0x27b   : > { %v1876_v35 = vmul.f32 0.3275911, %v1872_v33  ;;  %v1853_v19 = vmul.f32 %v2635_v25, %v1845_v34  ;;  %v1737_v22 = vadd.f32 %v1736_v31, %v1667_v36  ;;  %v1833_v47 = vpop.f32.mrf.mxu3  ;;  %v1980_v7 = vsub.f32 0.0, %v1872_v33 }
 0x27d   : > { %v1880_v37 = vadd.f32 1.0, %v1876_v35  ;;  %v3199_v39 = vadd.f32 %v2636_v26, %v1853_v19  ;;  %v1838_v40 = vadd.f32 %v1831_v20, %v1737_v22  ;;  %v1984_v13 = vmul.f32 %v1980_v7, %v1872_v33 }
 0x27f   : > { %2653 = vrcp.f32 %v1880_v37  ;;  %v3202_v24 = vmul.f32 0.70710677, %v3199_v39  ;;  %v1846_v21 = vadd.f32 %v2634_v14, %v1838_v40  ;;  %v1895_v60 = vand.u32 2147483648, %v1880_v37 }
 0x280   : > { %v1893_v62 = vand.u32 2147483647, %v1880_v37  ;;  %vm1889_vm0 = vweird.f32 %v1880_v37  ;;  %v1988_v28 = vmul.f32 1.442695, %v1984_v13 }
 0x281   : > { %v3205_v43 = vand.u32 2147483647, %v3202_v24  ;;  %v1854_v44 = vmul.f32 %v2635_v25, %v1846_v21  ;;  %v1896_v2 = vor.u32 1.1754944e-38, %v1895_v60 }
 0x282   : > { %v1669_v45 = vpop.f32.mrf.mxu0  ;;  %vm1894_vm7 = vcmp.eq.f32.partialorder %v1893_v62, 8.507059e+37 }
 0x283   : > { %v1739_v57 = vadd.f32 %v1738_v41, %v1669_v45  ;;  %v1877_v46 = vmul.f32 0.3275911, %v3205_v43  ;;  %v3208_v49 = vadd.f32 %v2636_v26, %v1854_v44  ;;  %v1981_v31 = vsub.f32 0.0, %v3205_v43 }
 0x285   : > { %v2654_v53 = vpop.eup %2653  ;;  %v1839_v51 = vadd.f32 %v1833_v47, %v1739_v57  ;;  %v1881_v54 = vadd.f32 1.0, %v1877_v46  ;;  %v3211_v56 = vmul.f32 0.70710677, %v3208_v49  ;;  %v1985_v21 = vmul.f32 %v1981_v31, %v3205_v43 }
 0x286   : > { %v1885_v52 = vmul.f32 %v2654_v53, %v1880_v37  ;;  %vm1890_vm2 = vweird.f32 %v2654_v53 }
 0x287   : > { %v1847_v59 = vadd.f32 %v2634_v14, %v1839_v51  ;;  %2655 = vrcp.f32 %v1881_v54  ;;  %v3214_v61 = vand.u32 2147483647, %v3211_v56  ;;  %vm1891_vm6 = vmor %vm1889_vm0, %vm1890_vm2  ;;  %v1910_v42 = vand.u32 2147483648, %v1881_v54 }
 0x288   : > { %v1886_v4 = vsub.f32 1.0, %v1885_v52  ;;  %v1908_v18 = vand.u32 2147483647, %v1881_v54  ;;  %vm1904_vm4 = vweird.f32 %v1881_v54  ;;  %vm2005_vm0 = vcmp.ge.f32.partialorder %v3202_v24, 0.0 }
 0x289   : > { %v1855_v55 = vmul.f32 %v2635_v25, %v1847_v59  ;;  %v1878_v1 = vmul.f32 0.3275911, %v3214_v61  ;;  %v1911_v30 = vor.u32 1.1754944e-38, %v1910_v42 }
 0x28a   : > { %v1887_v48 = vmul.f32 %v2654_v53, %v1886_v4  ;;  %vm1909_vm8 = vcmp.eq.f32.partialorder %v1908_v18, 8.507059e+37  ;;  %v1982_v4 = vsub.f32 0.0, %v3214_v61 }
 0x28b   : > { %v3217_v32 = vadd.f32 %v2636_v26, %v1855_v55  ;;  %v1882_v0 = vadd.f32 1.0, %v1878_v1 }
 0x28c   : > { %v1888_v17 = vadd.f32 %v2654_v53, %v1887_v48  ;;  %v1986_v7 = vmul.f32 %v1982_v4, %v3214_v61 }
 0x28d   : > { %v2656_v5 = vpop.eup %2655  ;;  %v3220_v8 = vmul.f32 0.70710677, %v3217_v32  ;;  %2657 = vrcp.f32 %v1882_v0  ;;  %v1925_v35 = vand.u32 2147483648, %v1882_v0  ;;  %v1923_v37 = vand.u32 2147483647, %v1882_v0 }
 0x28e   : > { %v1892_v6 = vsel %vm1891_vm6, %v2654_v53, %v1888_v17  ;;  %v1900_v12 = vmul.f32 %v2656_v5, %v1881_v54  ;;  %vm1905_vm3 = vweird.f32 %v2656_v5  ;;  %vm1919_vm10 = vweird.f32 %v1882_v0 }
 0x28f   : > { %v1897_v9 = vsel %vm1894_vm7, %v1896_v2, %v1892_v6  ;;  %v3223_v3 = vand.u32 2147483647, %v3220_v8  ;;  %vm1906_vm5 = vmor %vm1904_vm4, %vm1905_vm3  ;;  %v1926_v46 = vor.u32 1.1754944e-38, %v1925_v35  ;;  %vm1924_vm12 = vcmp.eq.f32.partialorder %v1923_v37, 8.507059e+37 }
 0x290   : > { %v1944_v10 = vmul.f32 1.0614054, %v1897_v9  ;;  %v1901_v50 = vsub.f32 1.0, %v1900_v12  ;;  %v1990_v54 = vmul.f32 1.442695, %v1985_v21  ;;  %vm2006_vm6 = vcmp.ge.f32.partialorder %v3211_v56, 0.0 }
 0x291   : > { %v1879_v23 = vmul.f32 0.3275911, %v3223_v3  ;;  %v1992_v61 = vmul.f32 1.442695, %v1986_v7  ;;  %vm2007_vm7 = vcmp.ge.f32.partialorder %v3220_v8, 0.0 }
 0x292   : > { %v1948_v11 = vadd.f32 -1.4531521, %v1944_v10  ;;  %v1902_v14 = vmul.f32 %v2656_v5, %v1901_v50 }
 0x293   : > { %v2658_v25 = vpop.eup %2657  ;;  %v3226_v26 = vadd.f32 1.0, %v1879_v23 }
 0x294   : > { %v1952_v29 = vmul.f32 %v1948_v11, %v1897_v9  ;;  %v1903_v58 = vadd.f32 %v2656_v5, %v1902_v14  ;;  %v1915_v15 = vmul.f32 %v2658_v25, %v1882_v0  ;;  %vm1920_vm9 = vweird.f32 %v2658_v25 }
 0x295   : > { %2659 = vrcp.f32 %v3226_v26  ;;  %vm1921_vm11 = vmor %vm1919_vm10, %vm1920_vm9  ;;  %v1938_v1 = vand.u32 2147483647, %v3226_v26  ;;  %v1940_v17 = vand.u32 2147483648, %v3226_v26  ;;  %vm1934_vm14 = vweird.f32 %v3226_v26 }
 0x296   : > { %v1956_v27 = vadd.f32 1.4214138, %v1952_v29  ;;  %v1907_v63 = vsel %vm1906_vm5, %v2656_v5, %v1903_v58  ;;  %v1916_v20 = vsub.f32 1.0, %v1915_v15  ;;  %2661 = vpow2.f32 %v1988_v28 }
 0x297   : > { %v3230_v34 = vsel %vm1909_vm8, %v1911_v30, %v1907_v63  ;;  %2663 = vpow2.f32 %v1990_v54  ;;  %v1941_v11 = vor.u32 1.1754944e-38, %v1940_v17  ;;  %vm1939_vm2 = vcmp.eq.f32.partialorder %v1938_v1, 8.507059e+37 }
 0x298   : > { %v1960_v33 = vmul.f32 %v1956_v27, %v1897_v9  ;;  %v1945_v36 = vmul.f32 1.0614054, %v3230_v34  ;;  %v1917_v22 = vmul.f32 %v2658_v25, %v1916_v20  ;;  %v1983_v29 = vsub.f32 0.0, %v3223_v3 }
 0x299   : > { %2665 = vpow2.f32 %v1992_v61 }
 0x29a   : > { %v1964_v19 = vadd.f32 -0.28449672, %v1960_v33  ;;  %v1949_v40 = vadd.f32 -1.4531521, %v1945_v36  ;;  %v1918_v44 = vadd.f32 %v2658_v25, %v1917_v22  ;;  %v1987_v20 = vmul.f32 %v1983_v29, %v3223_v3 }
 0x29b   : > { %v2660_v45 = vpop.eup %2659  ;;  %v1865_v3 = vmul.f32 0.5, %v3199_v39  ;;  %v1866_v39 = vmul.f32 0.5, %v3208_v49  ;;  %v1867_v49 = vmul.f32 0.5, %v3217_v32 }
 0x29c   : > { %v1968_v41 = vmul.f32 %v1964_v19, %v1897_v9  ;;  %v1953_v57 = vmul.f32 %v1949_v40, %v3230_v34  ;;  %v1922_v53 = vsel %vm1921_vm11, %v2658_v25, %v1918_v44  ;;  %v1930_v51 = vmul.f32 %v2660_v45, %v3226_v26  ;;  %v2662_v62 = vpop.eup %2661 }
 0x29d   : > { %v1927_v59 = vsel %vm1924_vm12, %v1926_v46, %v1922_v53  ;;  %vm1935_vm13 = vweird.f32 %v2660_v45  ;;  %v2664_v27 = vpop.eup %2663  ;;  %v1994_v40 = vmul.f32 1.442695, %v1987_v20 }
 0x29e   : > { %v1972_v47 = vadd.f32 0.2548296, %v1968_v41  ;;  %v1957_v52 = vadd.f32 1.4214138, %v1953_v57  ;;  %v1946_v60 = vmul.f32 1.0614054, %v1927_v59  ;;  %vm1936_vm15 = vmor %vm1934_vm14, %vm1935_vm13 }
 0x29f   : > { %v1931_v48 = vsub.f32 1.0, %v1930_v51  ;;  %v2666_v41 = vpop.eup %2665  ;;  %2667 = vpow2.f32 %v1994_v40 }
 0x2a0   : > { %v1976_v43 = vmul.f32 %v1972_v47, %v1897_v9  ;;  %v1961_v55 = vmul.f32 %v1957_v52, %v3230_v34  ;;  %v1950_v0 = vadd.f32 -1.4531521, %v1946_v60 }
 0x2a1   : > { %v1932_v5 = vmul.f32 %v2660_v45, %v1931_v48 }
 0x2a2   : > { %v1996_v2 = vmul.f32 %v2662_v62, %v1976_v43  ;;  %v1965_v6 = vadd.f32 -0.28449672, %v1961_v55  ;;  %v1954_v12 = vmul.f32 %v1950_v0, %v1927_v59 }
 0x2a3   : > { %v1933_v10 = vadd.f32 %v2660_v45, %v1932_v5 }
 0x2a4   : > { %v2000_v9 = vsub.f32 1.0, %v1996_v2  ;;  %v1969_v50 = vmul.f32 %v1965_v6, %v3230_v34  ;;  %v1958_v42 = vadd.f32 1.4214138, %v1954_v12 }
 0x2a5   : > { %v1937_v14 = vsel %vm1936_vm15, %v2660_v45, %v1933_v10  ;;  %v2668_v4 = vpop.eup %2667 }
 0x2a6   : > { %v2008_v13 = vsub.f32 0.0, %v2000_v9  ;;  %v1973_v18 = vadd.f32 0.2548296, %v1969_v50  ;;  %v1942_v23 = vsel %vm1939_vm2, %v1941_v11, %v1937_v14  ;;  %v1962_v58 = vmul.f32 %v1958_v42, %v1927_v59 }
 0x2a7   : > { %v1947_v26 = vmul.f32 1.0614054, %v1942_v23 }
 0x2a8   : > { %v2012_v25 = vsel %vm2004_vm1, %v2000_v9, %v2008_v13  ;;  %v1977_v30 = vmul.f32 %v1973_v18, %v3230_v34  ;;  %v1966_v15 = vadd.f32 -0.28449672, %v1962_v58 }
 0x2a9   : > { %v2016_v28 = vadd.f32 1.0, %v2012_v25  ;;  %v1951_v63 = vadd.f32 -1.4531521, %v1947_v26 }
 0x2aa   : > { %v1997_v33 = vmul.f32 %v2664_v27, %v1977_v30  ;;  %v1970_v36 = vmul.f32 %v1966_v15, %v1927_v59 }
 0x2ab   : > { %v2020_v31 = vmul.f32 %v2016_v28, %v1864_v38  ;;  %v1955_v35 = vmul.f32 %v1951_v63, %v1942_v23 }
 0x2ac   : > { %v2001_v19 = vsub.f32 1.0, %v1997_v33  ;;  %v1974_v22 = vadd.f32 0.2548296, %v1970_v36 }
 0x2ad   : > { %2024 = vst [vmem:[%s3251_s17] sm:$0xff] %v2020_v31  ;;  %v1959_v37 = vadd.f32 1.4214138, %v1955_v35 }
 0x2ae   : > { %v2009_v16 = vsub.f32 0.0, %v2001_v19  ;;  %v1978_v34 = vmul.f32 %v1974_v22, %v1927_v59 }
 0x2af   : > { %v1963_v21 = vmul.f32 %v1959_v37, %v1942_v23 }
 0x2b0   : > { %v2013_v44 = vsel %vm2005_vm0, %v2001_v19, %v2009_v16  ;;  %v1998_v57 = vmul.f32 %v2666_v41, %v1978_v34 }
 0x2b1   : > { %v2017_v45 = vadd.f32 1.0, %v2013_v44  ;;  %v1967_v46 = vadd.f32 -0.28449672, %v1963_v21 }
 0x2b2   : > { %v2002_v53 = vsub.f32 1.0, %v1998_v57 }
 0x2b3   : > { %v2021_v47 = vmul.f32 %v2017_v45, %v1865_v3  ;;  %v1971_v51 = vmul.f32 %v1967_v46, %v1942_v23 }
 0x2b4   : > { %v2010_v52 = vsub.f32 0.0, %v2002_v53 }
 0x2b5   : > { %2025 = vst [vmem:[%s3251_s17 + $0x8] sm:$0xff] %v2021_v47  ;;  %v1975_v54 = vadd.f32 0.2548296, %v1971_v51 }
 0x2b6   : > { %v2014_v24 = vsel %vm2006_vm6, %v2002_v53, %v2010_v52 }
 0x2b7   : > { %v1979_v59 = vmul.f32 %v1975_v54, %v1942_v23  ;;  %v2018_v43 = vadd.f32 1.0, %v2014_v24 }
 0x2b9   : > { %v1999_v60 = vmul.f32 %v2668_v4, %v1979_v59  ;;  %v2022_v48 = vmul.f32 %v2018_v43, %v1866_v39 }
 0x2bb   : > { %v2003_v62 = vsub.f32 1.0, %v1999_v60  ;;  %2026 = vst [vmem:[%s3251_s17 + $0x10] sm:$0xff] %v2022_v48 }
 0x2bd   : > { %v2011_v55 = vsub.f32 0.0, %v2003_v62 }
 0x2bf   : > { %v2015_v56 = vsel %vm2007_vm7, %v2003_v62, %v2011_v55 }
 0x2c0   : > { %v2019_v1 = vadd.f32 1.0, %v2015_v56 }
 0x2c2   : > { %v2023_v17 = vmul.f32 %v2019_v1, %v1867_v49 }
 0x2c4   : > { %2027 = vst [vmem:[%s3251_s17 + $0x18] sm:$0xff] %v2023_v17 }
 0x2c5   : > { %2756 = shalt.err (!%p2753_p8)
}
 0x2c6   : > { %s2805_s30 = smov 128   ;;  %s2806_s17 = smov 8  }
 0x2c7   : > { %2574 = dma.vmem_to_hbm [thread:$0]  (%p2910_p5), %s2042_s28, 512, %s2044_s29, %s2029_s25, %s2805_s30, %s2805_s30, %s2806_s17  }
 0x2c8 PF: > { %p2591_p9 = scmp.ge.s32.totalorder %s2799_s24, 2  ;;  %s2058_s26 = sand.u32 1, %s2787_s21  }
 0x2c9   : > { %s2059_s27 = scalar_lea.sflag [#allocation6], %s2058_s26 }
 0x2ca   : > { %p2584_p10 = pnand %p2591_p9, %p2914_p6 }
 0x2cc   : > { %p2585_p11 = pneg %p2584_p10 }
 0x2ce   : > { %2782 = dma.done.wait (%p2585_p11), %s2059_s27, 512  }
 0x2cf   : > { %2784 = vsyncadd (%p2585_p11), %s2059_s27, 4294966784  ;;  %s3329_s24 = sld [smem:[#allocation14_spill]]  ;;  %s3332_s21 = smov %s2791_s22 }
 0x2d0   : > { %s3330_s16 = sld [smem:[#allocation13_spill]] }
 0x2d1   : > { %s3331_s23 = sld [smem:[#allocation15_spill]] }
 0x2d5   : > { %p24_p12 = scmp.ge.s32.totalorder %s3329_s24, 4  }
 0x2d6   : > { %s3333_s22 = smov %s3330_s16 }
 0x2d7   :  { %26 = sbr.rel (!%p24_p12) target bundleno = 5 (0x5), region = 120 }
 0x2dc   :  { %2065 = vsyncpa [#allocation5], 1 }
 0x2dd   :  { %2067 = vsyncpa [#allocation5 + $0x1], 1 }
 0x2de   :  { %2068 = vsyncpa [#allocation8], 1 }
 0x2df   :  { %2069 = vsyncpa [#allocation6], 1 }
 0x2e0   :  { %2071 = vsyncpa [#allocation6 + $0x1], 1 }

// kernel: tpu_custom_call.1
= control target key start
LH: loop header
LB: loop body
LE: loop exit
PB: predicated region body
PF: predicated region fallthrough
CT: control target
= control target key end

     0   :  { %17 = vsyncpa [#allocation5], 0  ;;  %s3297_s0 = inlined_call_operand.vmem [shape: bf16[2,32,8], index: 0, kind: input, shape index: {}]   ;;  %s3298_s1 = inlined_call_operand.vmem [shape: bf16[2,32,128], index: 1, kind: input, shape index: {}]   ;;  %s3299_s2 = inlined_call_operand.vmem [shape: bf16[2,8,128], index: 2, kind: input, shape index: {}]   ;;  %s3300_s3 = inlined_call_operand.vmem [shape: f32[1,128], index: 3, kind: input, shape index: {}]   ;;  %s3301_s4 = inlined_call_operand.hbm [shape: bf16[3,256,128], index: 4, kind: input, shape index: {}]   ;;  %s3302_s5 = inlined_call_operand.vmem [shape: f32[1,128], index: 5, kind: input, shape index: {}]   ;;  %s3303_s6 = inlined_call_operand.vmem [shape: f32[1,128], index: 6, kind: input, shape index: {}]   ;;  %s3304_s7 = inlined_call_operand.vmem [shape: f32[1,128], index: 7, kind: input, shape index: {}]   ;;  %s3305_s8 = inlined_call_operand.hbm [shape: bf16[3,128,128], index: 8, kind: input, shape index: {}]   ;;  %s3306_s9 = inlined_call_operand.vmem [shape: f32[1,128], index: 9, kind: input, shape index: {}]   ;;  %s3307_s10 = inlined_call_operand.vmem [shape: f32[1,128], index: 10, kind: input, shape index: {}]   ;;  %s3308_s11 = inlined_call_operand.vmem [shape: f32[1,128], index: 11, kind: input, shape index: {}]   ;;  %s3309_s12 = inlined_call_operand.hbm [shape: f32[2,32,128], index: 12, kind: output, shape index: {}]  }
   0x1   :  { %18 = vsyncpa [#allocation8], 0 }
   0x2   :  { %19 = vsyncpa [#allocation6], 0 }
   0x3   :  { %21 = vsyncpa [#allocation6 + $0x1], 0  ;;  %s2872_s21 = smov 0   ;;  %s2874_s22 = smov 0  }
   0x4   :  { %s2876_s23 = smov 0   ;;  %s2878_s24 = smov 0  }
   0x5 LB: > { %3313 = sst [smem:[#allocation13_spill]] %s2795_s23  ;;  %s2893_s25 = sadd.s32 4294967295, %s2799_s24   ;;  %s2799_s24 = sphi %s2878_s24, %s3329_s24   ;;  %s2795_s23 = sphi %s2876_s23, %s3331_s23   ;;  %s2791_s22 = sphi %s2874_s22, %s3333_s22   ;;  %s2787_s21 = sphi %s2872_s21, %s3332_s21  }
   0x6   : > { %s2140_s26 = sadd.s32 4294967294, %s2799_s24   ;;  %s2897_s27 = sadd.s32 1, %s2799_s24  }
   0x7   : > { %3314 = sst [smem:[#allocation14_spill]] %s2897_s27  ;;  %s296_s28 = sadd.s32 1, %s2795_s23 }
   0x8   : > { %s293_s29 = ssub.s32 %s2799_s24, %s2897_s27  ;;  %p306_p0 = scmp.ne.s32.totalorder %s2795_s23, %s2791_s22 }
   0x9   : > { %p294_p1 = scmp.eq.s32.totalorder %s293_s29, 0  ;;  %p307_p2 = scmp.eq.s32.totalorder %s2893_s25, 1 }
   0xa   : > { %p312_p3 = scmp.ne.s32.totalorder %s2791_s22, %s2787_s21  ;;  %p313_p4 = scmp.eq.s32.totalorder %s2140_s26, 1 }
   0xb   : > { %s2908_s30 = scalar_select %p294_p1, %s2795_s23, %s296_s28  }
   0xc   : > { %p2910_p5 = por %p307_p2, %p306_p0  ;;  %p2914_p6 = por %p313_p4, %p312_p3 }
   0xd   : > { %3315 = sst [smem:[#allocation15_spill]] %s2908_s30  ;;  %p2141_p7 = scmp.ge.s32.totalorder %s2799_s24, 1 }
   0xe   : > { %p320_p8 = scmp.lt.s32.totalorder %s2799_s24, 3  ;;  %p2587_p9 = scmp.eq.s32.totalorder %s2893_s25, 0 }
   0xf   : > { %s337_s18 = sshll.u32 %s3301_s4, 4  ;;  %s2801_s19 = smov [#allocation4]   ;;  %s338_s18 = int_to_ptr.hbm [resolvable:$true] %s337_s18 }
  0x10   : > { %p2921_p10 = pnand %p2141_p7, %p320_p8  ;;  %s339_s20 = sshll.u32 %s2801_s19, 4  ;;  %s340_s20 = int_to_ptr.vmem [resolvable:$true] %s339_s20 }
  0x11   : > { %s360_s29 = sshll.u32 %s3305_s8, 4  ;;  %s2802_s30 = smov 64   ;;  %s361_s29 = int_to_ptr.hbm [resolvable:$true] %s360_s29 }
  0x12   : > { %p2576_p11 = pneg %p2921_p10  ;;  %s2803_s23 = smov 4  }
  0x13   : > { %s2804_s27 = smov [#allocation7]   ;;  %403 = sbr.rel (%p2921_p10) target bundleno = 712 (0x2c8), region = 68 }
  0x14   : > { %p2577_p12 = pnand %p2587_p9, %p2576_p11  ;;  %s362_s16 = sshll.u32 %s2804_s27, 4  ;;  %s363_s16 = int_to_ptr.vmem [resolvable:$true] %s362_s16 }
  0x16   : > { %2579 = dma.hbm_to_vmem [thread:$0]  (!%p2577_p12), %s338_s18, 6144, %s340_s20, [#allocation5], %s2802_s30, %s2802_s30, %s2803_s23  }
  0x17   : > { %2582 = dma.hbm_to_vmem [thread:$0]  (!%p2577_p12), %s361_s29, 3072, %s363_s16, [#allocation8], %s2802_s30, %s2802_s30, %s2803_s23  }
  0x18   : > { %2774 = dma.done.wait (%p2587_p9), [#allocation5], 6144  }
  0x19   : > { %2776 = vsyncadd (%p2587_p9), [#allocation5], 4294961152 }
  0x1a   : > { %2778 = dma.done.wait (%p2587_p9), [#allocation8], 3072  }
  0x1b   : > { %2780 = vsyncadd (%p2587_p9), [#allocation8], 4294964224  ;;  %p456_p13 = scmp.lt.s32.totalorder %s2893_s25, 1  ;;  %vm467_vm0 = vcmask 1040384   ;;  %vm468_vm1 = vsmask.f32 256  ;;  %v560_v63 = vlaneseq }
  0x1c   : > { %vm2947_vm2 = vmand %vm467_vm0, %vm468_vm1  ;;  %vm470_vm3 = vcmask 1044484   ;;  %vm471_vm4 = vsmask.f32 4352  ;;  %vm482_vm6 = vsmask.f32 7954  ;;  %vm513_vm12 = vcmask 1043456  }
  0x1d   : > { %s457_s23 = scalar_select %p456_p13, %s2893_s25, 1  ;;  %vm2952_vm5 = vmand %vm470_vm3, %vm471_vm4  ;;  %vm480_vm8 = vsmask.f32 7938  ;;  %vm589_vm13 = vsmask.f32 4368  ;;  %vm506_vm14 = vcmask 64512  }
  0x1e   : > { %vm473_vm7 = vmor %vm2952_vm5, %vm2947_vm2  ;;  %v474_v3 = vld [vmem:[#allocation2] sm:$0x11]  ;;  %v477_v4 = vld [vmem:[#allocation3] sm:$0x1]  ;;  %s453_s30 = sand.u32 1, %s2791_s22   ;;  %s2550_s18 = sshll.u32 %s2893_s25, 5 }
  0x1f   : > { %s2471_s27 = sshll.u32 %s457_s23, 4  ;;  %vm2961_vm9 = vmand %vm467_vm0, %vm480_vm8  ;;  %v485_v5 = vld [vmem:[#allocation2 + $0x20] sm:$0x11]  ;;  %v475_v6 = vsel %vm473_vm7, 0, %v474_v3  ;;  %v478_v7 = vsel %vm2947_vm2, 0, %v477_v4  ;;  %v2484_v50 = vld [vmem:[#allocation4 + $0x38] sm:$0xff]  ;;  %s2040_s26 = scalar_lea.hbm %s3309_s12, %s2550_s18 }
  0x20   : > { %vm483_vm10 = vmand %vm470_vm3, %vm482_vm6  ;;  %s465_s17 = scalar_lea.vmem %s3298_s1, %s2471_s27  ;;  %s2973_s20 = scalar_lea.vmem %s3297_s0, %s2471_s27  ;;  %v488_v9 = vld [vmem:[#allocation3 + $0x10] sm:$0x1]  ;;  %476 = vst [vmem:[#allocation2] sm:$0x11] %v475_v6  ;;  %v495_v11 = vld [vmem:[%s3299_s2] sm:$0xf] }
  0x21   : > { %vm484_vm11 = vmor %vm483_vm10, %vm2961_vm9  ;;  %v489_v10 = vsel %vm2961_vm9, 0, %v488_v9  ;;  %479 = vst [vmem:[#allocation3] sm:$0x1] %v478_v7  ;;  %v515_v12 = vsel %vm513_vm12, %v495_v11, 0  ;;  %v642_v13 = vld [vmem:[%s465_s17] sm:$0xf] }
  0x22   : > { %v486_v8 = vsel %vm484_vm11, 0, %v485_v5  ;;  %v2473_v14 = vld [vmem:[%s2973_s20] sm:$0xff]  ;;  %524 = vmatpush.bf16.msra.mxu0 %v515_v12  ;;  %v644_v16 = vld [vmem:[%s465_s17 + $0x8] sm:$0xf]  ;;  %490 = vst [vmem:[#allocation3 + $0x10] sm:$0x1] %v489_v10  ;;  %vm2991_vm15 = vmand %vm513_vm12, %vm480_vm8 }
  0x23   : > { %487 = vst [vmem:[#allocation2 + $0x20] sm:$0x11] %v486_v8  ;;  %v643_v15 = vld [vmem:[%s465_s17 + $0x4] sm:$0xf]  ;;  %v645_v17 = vld [vmem:[%s465_s17 + $0xc] sm:$0xf]  ;;  %vm2997_vm0 = vmor %vm468_vm1, %vm589_vm13 }
  0x24   : > { %v647_v18 = vshrl.u32 %v642_v13, 16  ;;  %v650_v19 = vshll.u32 %v642_v13, 16  ;;  %v655_v20 = vshrl.u32 %v643_v15, 16  ;;  %v658_v21 = vshll.u32 %v643_v15, 16  ;;  %v2163_v24 = vld [vmem:[%s3299_s2 + $0x4] sm:$0xf] }
  0x25   : > { %v664_v22 = vshrl.u32 %v644_v16, 16  ;;  %v667_v23 = vshll.u32 %v644_v16, 16  ;;  %v673_v26 = vshrl.u32 %v645_v17, 16  ;;  %v676_v27 = vshll.u32 %v645_v17, 16  ;;  %2161 = vmatmul.msk.bf16.vlgmr.msra.gmra.mxu0 %vm506_vm14, %v2473_v14  ;;  %v2474_v49 = vld [vmem:[%s2973_s20 + $0x8] sm:$0xff]  ;;  %v2492_v51 = vld [vmem:[#allocation4 + $0x78] sm:$0xff] }
  0x26   : > { %v649_v25 = vrot.slane %v647_v18, 7  ;;  %v539_v28 = vsel %vm513_vm12, %v2163_v24, 0  ;;  %v657_v30 = vrot.slane %v655_v20, 7  ;;  %1065 = vmatpush.bf16.msrb.mxu0 %v2484_v50  ;;  %v2483_v52 = vld [vmem:[#allocation4 + $0x30] sm:$0xff]  ;;  %v2508_v54 = vld [vmem:[#allocation4 + $0xf8] sm:$0xff]  ;;  %v2482_v55 = vld [vmem:[#allocation4 + $0x28] sm:$0xff] }
  0x27   : > { %v666_v31 = vrot.slane %v664_v22, 7  ;;  %548 = vmatpush.bf16.msra.mxu1 %v539_v28  ;;  %v675_v35 = vrot.slane %v673_v26, 7  ;;  %v686_v36 = vld [vmem:[#allocation2 + $0x4] sm:$0xf]  ;;  %v2491_v53 = vld [vmem:[#allocation4 + $0x70] sm:$0xff]  ;;  %946 = vmatpush.bf16.msra.mxu3 %v2508_v54  ;;  %v2481_v58 = vld [vmem:[#allocation4 + $0x20] sm:$0xff] }
  0x28   : > { %v652_v33 = vor.u32 %v650_v19, %v649_v25  ;;  %v653_v34 = vrot.slane %v649_v25, 4  ;;  %v660_v37 = vor.u32 %v658_v21, %v657_v30  ;;  %v662_v38 = vrot.slane %v657_v30, 4  ;;  %v2490_v56 = vld [vmem:[#allocation4 + $0x68] sm:$0xff]  ;;  %v2507_v57 = vld [vmem:[#allocation4 + $0xf0] sm:$0xff]  ;;  %v2489_v59 = vld [vmem:[#allocation4 + $0x60] sm:$0xff]  ;;  %s2148_s15 = sshll.u32 %s453_s30, 5 }
  0x29   : > { %v669_v39 = vor.u32 %v667_v23, %v666_v31  ;;  %v671_v40 = vrot.slane %v666_v31, 4  ;;  %v678_v41 = vor.u32 %v676_v27, %v675_v35  ;;  %v680_v42 = vrot.slane %v675_v35, 4  ;;  %v2506_v60 = vld [vmem:[#allocation4 + $0xe8] sm:$0xff]  ;;  %v2480_v61 = vld [vmem:[#allocation4 + $0x18] sm:$0xff]  ;;  %v2505_v2 = vld [vmem:[#allocation4 + $0xe0] sm:$0xff]  ;;  %s3251_s17 = scalar_lea.vmem [#allocation9], %s2148_s15 }
  0x2a   : > { %v687_v43 = vsel %vm2991_vm15, %v652_v33, %v686_v36  ;;  %v692_v44 = vld [vmem:[#allocation2 + $0x24] sm:$0x1]  ;;  %2164 = vmatmul.msk.bf16.vlgmr.msra.gmra.mxu1 %vm506_vm14, %v2473_v14  ;;  %v661_v45 = vsel %vm2997_vm0, %v653_v34, %v660_v37  ;;  %1066 = vmatpush.bf16.msrb.mxu0 %v2483_v52  ;;  %v2488_v62 = vld [vmem:[#allocation4 + $0x58] sm:$0xff]  ;;  %v2479_v3 = vld [vmem:[#allocation4 + $0x10] sm:$0xff]  ;;  %v561_v5 = vshrl.u32 %v560_v63, 7  ;;  %vm1142_vm7 = vcmask 1046528  }
  0x2b   : > { %v670_v46 = vsel %vm2997_vm0, %v662_v38, %v669_v39  ;;  %688 = vst [vmem:[#allocation2 + $0x4] sm:$0xf] %v687_v43  ;;  %v679_v47 = vsel %vm2997_vm0, %v671_v40, %v678_v41  ;;  %v693_v48 = vsel %vm2947_vm2, %v680_v42, %v692_v44  ;;  %1084 = vmatpush.bf16.msrb.mxu1 %v2492_v51  ;;  %v2500_v1 = vld [vmem:[#allocation4 + $0xb8] sm:$0xff]  ;;  %v2487_v4 = vld [vmem:[#allocation4 + $0x50] sm:$0xff]  ;;  %v2478_v8 = vld [vmem:[#allocation4 + $0x8] sm:$0xff]  ;;  %s2041_s28 = sshll.u32 %s3251_s17, 4  ;;  %s2042_s28 = int_to_ptr.vmem [resolvable:$true] %s2041_s28 }
  0x2c   : > { %689 = vst [vmem:[#allocation2 + $0xc] sm:$0xf] %v661_v45  ;;  %947 = vmatpush.bf16.msra.mxu3 %v2507_v57  ;;  %927 = vmatpush.bf16.msra.mxu2 %v2500_v1  ;;  %v2499_v6 = vld [vmem:[#allocation4 + $0xb0] sm:$0xff]  ;;  %v2504_v7 = vld [vmem:[#allocation4 + $0xd8] sm:$0xff]  ;;  %v2486_v9 = vld [vmem:[#allocation4 + $0x48] sm:$0xff]  ;;  %v565_v10 = vand.u32 1, %v561_v5 }
  0x2d   : > { %690 = vst [vmem:[#allocation2 + $0x14] sm:$0xf] %v670_v46  ;;  %v2498_v12 = vld [vmem:[#allocation4 + $0xa8] sm:$0xff]  ;;  %v2503_v13 = vld [vmem:[#allocation4 + $0xd0] sm:$0xff]  ;;  %v2477_v14 = vld [vmem:[#allocation4] sm:$0xff]  ;;  %v562_v17 = vadd.s32 8, %v561_v5 }
  0x2e   : > { %691 = vst [vmem:[#allocation2 + $0x1c] sm:$0xf] %v679_v47  ;;  %1067 = vmatpush.bf16.msrb.mxu0 %v2482_v55  ;;  %v2485_v15 = vld [vmem:[#allocation4 + $0x40] sm:$0xff]  ;;  %vm569_vm1 = vcmp.eq.s32.totalorder %v565_v10, 0  ;;  %v2502_v20 = vld [vmem:[#allocation4 + $0xc8] sm:$0xff]  ;;  %v2496_v26 = vld [vmem:[#allocation4 + $0x98] sm:$0xff] }
  0x2f   : > { %694 = vst [vmem:[#allocation2 + $0x24] sm:$0x1] %v693_v48  ;;  %1085 = vmatpush.bf16.msrb.mxu1 %v2491_v53  ;;  %v3018_v16 = vld [vmem:[%s3300_s3] ss:$0 sm:$0xff]  ;;  %v566_v23 = vand.u32 1, %v562_v17  ;;  %v563_v30 = vadd.s32 16, %v561_v5 }
  0x30   : > { %948 = vmatpush.bf16.msra.mxu3 %v2506_v60  ;;  %928 = vmatpush.bf16.msra.mxu2 %v2499_v6  ;;  %v2497_v19 = vld [vmem:[#allocation4 + $0xa0] sm:$0xff]  ;;  %v2495_v35 = vld [vmem:[#allocation4 + $0x90] sm:$0xff]  ;;  %v2524_v36 = vld [vmem:[#allocation4 + $0x178] sm:$0xff]  ;;  %v564_v48 = vadd.s32 24, %v561_v5  ;;  %vm786_vm6 = vsmask.f32 7424 }
  0x31   : > { %v2501_v27 = vld [vmem:[#allocation4 + $0xc0] sm:$0xff]  ;;  %vm570_vm3 = vcmp.eq.s32.totalorder %v566_v23, 0  ;;  %v567_v41 = vand.u32 1, %v563_v30  ;;  %v2494_v42 = vld [vmem:[#allocation4 + $0x88] sm:$0xff]  ;;  %v2523_v43 = vld [vmem:[#allocation4 + $0x170] sm:$0xff]  ;;  %s2043_s29 = sshll.u32 %s2040_s26, 4  ;;  %s2044_s29 = int_to_ptr.hbm [resolvable:$true] %s2043_s29 }
  0x32   : > { %1068 = vmatpush.bf16.msrb.mxu0 %v2481_v58  ;;  %v633_v37 = vld [vmem:[#allocation2] sm:$0xf]  ;;  %v2522_v53 = vld [vmem:[#allocation4 + $0x168] sm:$0xff]  ;;  %v568_v58 = vand.u32 1, %v564_v48  ;;  %v2515_v5 = vld [vmem:[#allocation4 + $0x130] sm:$0xff]  ;;  %s2029_s25 = scalar_lea.sflag [#allocation6], %s453_s30 }
  0x33   : > { %1086 = vmatpush.bf16.msrb.mxu1 %v2490_v56  ;;  %vm571_vm4 = vcmp.eq.s32.totalorder %v567_v41, 0  ;;  %v2520_v6 = vld [vmem:[#allocation4 + $0x158] sm:$0xff]  ;;  %s2743_s16 = sshra.s32 %s2044_s29, 4  ;;  %s2749_s18 = scalar_lea.hbm %s3309_s12, 64  ;;  %s2744_s16 = int_to_ptr.hbm [resolvable:$true] %s2743_s16 }
  0x34   : > { %949 = vmatpush.bf16.msra.mxu3 %v2505_v2  ;;  %929 = vmatpush.bf16.msra.mxu2 %v2498_v12  ;;  %vm572_vm5 = vcmp.eq.s32.totalorder %v568_v58, 0  ;;  %s2745_s23 = scalar_lea.hbm %s2744_s16, 32  ;;  %p2750_p3 = scmp.lt.s32.totalorder %s2744_s16, %s3309_s12 }
  0x35   : > { %2162 = vmatmul.msk.bf16.gmra.mxu0 %vm506_vm14, %v2474_v49  ;;  %p2746_p0 = scmp.ne.s32.totalorder %s2744_s16, %s2745_s23  ;;  %p2751_p4 = scmp.lt.s32.totalorder %s2749_s18, %s2745_s23 }
  0x36   : > { %1069 = vmatpush.bf16.msrb.mxu0 %v2480_v61  ;;  %v2516_v61 = vld [vmem:[#allocation4 + $0x138] sm:$0xff] }
  0x37   : > { %1087 = vmatpush.bf16.msrb.mxu1 %v2489_v59  ;;  %p2747_p1 = pnand %p2746_p0, %p2910_p5  ;;  %p2752_p7 = por %p2751_p4, %p2750_p3 }
  0x38   : > { %950 = vmatpush.bf16.msra.mxu3 %v2504_v7  ;;  %930 = vmatpush.bf16.msra.mxu2 %v2497_v19 }
  0x39   : > { %p2748_p2 = pneg %p2747_p1 }
  0x3a   : > { %2165 = vmatmul.msk.bf16.gmra.mxu1 %vm506_vm14, %v2474_v49  ;;  %1070 = vmatpush.bf16.msrb.mxu0 %v2479_v3  ;;  %v2493_v49 = vld [vmem:[#allocation4 + $0x80] sm:$0xff] }
  0x3b   : > { %1088 = vmatpush.bf16.msrb.mxu1 %v2488_v62  ;;  %v2521_v62 = vld [vmem:[#allocation4 + $0x160] sm:$0xff]  ;;  %p2753_p8 = pnand %p2752_p7, %p2748_p2 }
  0x3c   : > { %951 = vmatpush.bf16.msra.mxu3 %v2503_v13  ;;  %931 = vmatpush.bf16.msra.mxu2 %v2496_v26  ;;  %v2518_v26 = vld [vmem:[#allocation4 + $0x148] sm:$0xff] }
  0x3e   : > { %1071 = vmatpush.bf16.msrb.mxu0 %v2478_v8  ;;  %v2475_v8 = vld [vmem:[#allocation2 + $0x14] sm:$0xf] }
  0x3f   : > { %1089 = vmatpush.bf16.msrb.mxu1 %v2487_v4 }
  0x40   : > { %952 = vmatpush.bf16.msra.mxu3 %v2502_v20  ;;  %932 = vmatpush.bf16.msra.mxu2 %v2495_v35 }
  0x42   : > { %1072 = vmatpush.bf16.msrb.mxu0 %v2477_v14  ;;  %v2514_v14 = vld [vmem:[#allocation4 + $0x128] sm:$0xff] }
  0x43   : > { %1090 = vmatpush.bf16.msrb.mxu1 %v2486_v9  ;;  %v2170_v9 = vld [vmem:[#allocation2 + $0x18] sm:$0xf0] }
  0x44   : > { %953 = vmatpush.bf16.msra.mxu3 %v2501_v27  ;;  %933 = vmatpush.bf16.msra.mxu2 %v2494_v42  ;;  %v3032_v20 = vor.u32 %v2475_v8, %v2170_v9 }
  0x46   : > { %v807_v30 = vshll.u32 %v3032_v20, 16 }
  0x47   : > { %1091 = vmatpush.bf16.msrb.mxu1 %v2485_v15  ;;  %v2519_v15 = vld [vmem:[#allocation4 + $0x150] sm:$0xff] }
  0x48   : > { %1272 = vmatpush.bf16.msrb.mxu3 %v2524_v36  ;;  %934 = vmatpush.bf16.msra.mxu2 %v2493_v49  ;;  %v809_v41 = vrot.slane %v807_v30, 1 }
  0x4c   : > { %1273 = vmatpush.bf16.msrb.mxu3 %v2523_v43  ;;  %1253 = vmatpush.bf16.msrb.mxu2 %v2516_v61 }
  0x50   : > { %1274 = vmatpush.bf16.msrb.mxu3 %v2522_v53  ;;  %1254 = vmatpush.bf16.msrb.mxu2 %v2515_v5 }
  0x54   : > { %1275 = vmatpush.bf16.msrb.mxu3 %v2521_v62  ;;  %1255 = vmatpush.bf16.msrb.mxu2 %v2514_v14 }
  0x58   : > { %1276 = vmatpush.bf16.msrb.mxu3 %v2520_v6 }
  0x5c   : > { %1277 = vmatpush.bf16.msrb.mxu3 %v2519_v15 }
  0x60   : > { %1278 = vmatpush.bf16.msrb.mxu3 %v2518_v26 }
  0xa2   : > { %v526_v11 = vpop.f32.mrf.mxu0 }
  0xa7   : > { %v550_v18 = vpop.f32.mrf.mxu1 }
  0xa8   : > { %v573_v21 = vsel %vm569_vm1, %v526_v11, %v550_v18 }
  0xa9   : > { %v581_v22 = vadd.f32 %v3018_v16, %v573_v21 }
  0xaa   : > { %v528_v25 = vpop.f32.mrf.mxu0 }
  0xab   : > { %v585_v24 = vpack.c.bf16 %v581_v22, %v581_v22 }
  0xad   : > { %v592_v28 = vshrl.u32 %v585_v24, 16  ;;  %v595_v33 = vshll.u32 %v585_v24, 16 }
  0xaf   : > { %v594_v31 = vrot.slane %v592_v28, 7  ;;  %v552_v34 = vpop.f32.mrf.mxu1 }
  0xb0   : > { %v574_v38 = vsel %vm570_vm3, %v528_v25, %v552_v34  ;;  %v2513_v25 = vld [vmem:[#allocation4 + $0x120] sm:$0xff] }
  0xb1   : > { %v597_v39 = vor.u32 %v595_v33, %v594_v31  ;;  %v582_v40 = vadd.f32 %v3018_v16, %v574_v38  ;;  %v598_v55 = vrot.slane %v594_v31, 4  ;;  %v639_v34 = vld [vmem:[#allocation2 + $0x20] sm:$0x1]  ;;  %1256 = vmatpush.bf16.msrb.mxu2 %v2513_v25 }
  0xb2   : > { %v531_v46 = vpop.f32.mrf.mxu0 }
  0xb3   : > { %v634_v44 = vsel %vm2991_vm15, %v597_v39, %v633_v37  ;;  %v586_v45 = vpack.c.bf16 %v582_v40, %v582_v40 }
  0xb4   : > { %635 = vst [vmem:[#allocation2] sm:$0xf] %v634_v44  ;;  %v2512_v44 = vld [vmem:[#allocation4 + $0x118] sm:$0xff] }
  0xb5   : > { %v600_v47 = vshrl.u32 %v586_v45, 16  ;;  %v603_v51 = vshll.u32 %v586_v45, 16  ;;  %v2517_v45 = vld [vmem:[#allocation4 + $0x140] sm:$0xff]  ;;  %1257 = vmatpush.bf16.msrb.mxu2 %v2512_v44 }
  0xb6   : > { %1279 = vmatpush.bf16.msrb.mxu3 %v2517_v45 }
  0xb7   : > { %v602_v50 = vrot.slane %v600_v47, 7  ;;  %v555_v52 = vpop.f32.mrf.mxu1  ;;  %v2511_v47 = vld [vmem:[#allocation4 + $0x110] sm:$0xff] }
  0xb8   : > { %v575_v54 = vsel %vm571_vm4, %v531_v46, %v555_v52 }
  0xb9   : > { %v605_v56 = vor.u32 %v603_v51, %v602_v50  ;;  %v583_v57 = vadd.f32 %v3018_v16, %v575_v54  ;;  %v607_v10 = vrot.slane %v602_v50, 4  ;;  %1258 = vmatpush.bf16.msrb.mxu2 %v2511_v47  ;;  %v2510_v50 = vld [vmem:[#allocation4 + $0x108] sm:$0xff] }
  0xba   : > { %v533_v1 = vpop.f32.mrf.mxu0 }
  0xbb   : > { %v606_v59 = vsel %vm2997_vm0, %v598_v55, %v605_v56  ;;  %v587_v60 = vpack.c.bf16 %v583_v57, %v583_v57  ;;  %v695_v13 = vld [vmem:[#allocation2] sm:$0xff] }
  0xbc   : > { %636 = vst [vmem:[#allocation2 + $0x8] sm:$0xf] %v606_v59  ;;  %v770_v21 = vunpack.c.l.b16 %v695_v13  ;;  %v771_v23 = vunpack.c.h.b16 %v695_v13  ;;  %v2509_v57 = vld [vmem:[#allocation4 + $0x100] sm:$0xff] }
  0xbd   : > { %v609_v63 = vshrl.u32 %v587_v60, 16  ;;  %v612_v3 = vshll.u32 %v587_v60, 16  ;;  %1259 = vmatpush.bf16.msrb.mxu2 %v2510_v50  ;;  %v819_v60 = vshrl.u32 %v3032_v20, 16  ;;  %v1103_v8 = vld [vmem:[#allocation2] sm:$0xee] }
  0xbe   : > { %v2632_v50 = vld [vmem:[%s3303_s6] ss:$0 sm:$0xff] }
  0xbf   : > { %v611_v2 = vrot.slane %v609_v63, 7  ;;  %v557_v4 = vpop.f32.mrf.mxu1 }
  0xc0   : > { %v576_v7 = vsel %vm572_vm5, %v533_v1, %v557_v4 }
  0xc1   : > { %v614_v11 = vor.u32 %v612_v3, %v611_v2  ;;  %v584_v12 = vadd.f32 %v3018_v16, %v576_v7  ;;  %v616_v36 = vrot.slane %v611_v2, 4  ;;  %1260 = vmatpush.bf16.msrb.mxu2 %v2509_v57  ;;  %v821_v3 = vor.u32 %v819_v60, %v809_v41 }
  0xc3   : > { %v615_v17 = vsel %vm2997_vm0, %v607_v10, %v614_v11  ;;  %v588_v18 = vpack.c.bf16 %v584_v12, %v584_v12  ;;  %v3030_v19 = vld [vmem:[#allocation2 + $0x8] sm:$0xff]  ;;  %v1139_v11 = vunpack.c.h.b16 %v1103_v8 }
  0xc4   : > { %637 = vst [vmem:[#allocation2 + $0x10] sm:$0xf] %v615_v17  ;;  %v772_v22 = vunpack.c.l.b16 %v3030_v19  ;;  %v773_v16 = vunpack.c.h.b16 %v3030_v19 }
  0xc5   : > { %v618_v24 = vshrl.u32 %v588_v18, 16  ;;  %v621_v33 = vshll.u32 %v588_v18, 16  ;;  %v1147_v18 = vrot.slane %v3032_v20, 1 }
  0xc6   : > { %v780_v27 = vpack.c.b16 %v772_v22, %v770_v21  ;;  %v781_v28 = vpack.c.b16 %v773_v16, %v771_v23  ;;  %v1141_v14 = vpack.c.b16 %v773_v16, %v1139_v11  ;;  %v1138_v23 = vunpack.c.l.b16 %v1103_v8 }
  0xc7   : > { %v620_v31 = vrot.slane %v618_v24, 7 }
  0xc8   : > { %1073 = vmatmul.bf16.vlgmr.msrb.gmra.mxu0 %v780_v27  ;;  %1092 = vmatmul.bf16.vlgmr.msrb.gmra.mxu1 %v781_v28  ;;  %v802_v35 = vshll.u32 %v781_v28, 16  ;;  %v800_v39 = vshrl.u32 %v781_v28, 16  ;;  %v790_v49 = vshll.u32 %v780_v27, 16  ;;  %v788_v58 = vshrl.u32 %v780_v27, 16 }
  0xc9   : > { %v623_v37 = vor.u32 %v621_v33, %v620_v31  ;;  %v625_v38 = vrot.slane %v620_v31, 4  ;;  %v1146_v17 = vrot.slane %v1141_v14, 1  ;;  %v1140_v24 = vpack.c.b16 %v772_v22, %v1138_v23 }
  0xca   : > { %v804_v40 = vrot.slane %v802_v35, 1  ;;  %v792_v54 = vrot.slane %v790_v49, 1 }
  0xcb   : > { %v624_v42 = vsel %vm2997_vm0, %v616_v36, %v623_v37  ;;  %v640_v43 = vsel %vm2947_vm2, %v625_v38, %v639_v34  ;;  %v2168_v51 = vld [vmem:[#allocation2 + $0x10] sm:$0xf]  ;;  %v1148_v21 = vsel %vm1142_vm7, %v1146_v17, %v1147_v18  ;;  %v1143_v26 = vrot.slane %v1140_v24, 1 }
  0xcc   : > { %638 = vst [vmem:[#allocation2 + $0x18] sm:$0xf] %v624_v42  ;;  %v805_v46 = vor.u32 %v804_v40, %v800_v39  ;;  %v793_v62 = vor.u32 %v792_v54, %v788_v58 }
  0xcd   : > { %641 = vst [vmem:[#allocation2 + $0x20] sm:$0x1] %v640_v43 }
  0xce   : > { %v810_v48 = vsel %vm786_vm6, %v805_v46, %v809_v41 }
  0xcf   : > { %954 = vmatmul.bf16.vlgmr.msra.gmra.mxu3 %v810_v48  ;;  %v2631_v48 = vld [vmem:[%s3302_s5] ss:$0 sm:$0xff] }
  0xd3   : > { %v2476_v52 = vld [vmem:[#allocation2 + $0x14] sm:$0xf0] }
  0xd4   : > { %v2169_v53 = vor.u32 %v2476_v52, %v2168_v51  ;;  %v731_v55 = vld [vmem:[#allocation2 + $0x20] sm:$0x11] }
  0xd5   : > { %v779_v56 = vunpack.c.h.b16 %v731_v55  ;;  %v778_v4 = vunpack.c.l.b16 %v731_v55  ;;  %v3069_v55 = vld [vmem:[%s3304_s7] ss:$0 sm:$0xff] }
  0xd6   : > { %v795_v59 = vshll.u32 %v2169_v53, 16  ;;  %v811_v10 = vshrl.u32 %v2169_v53, 16  ;;  %v1144_v25 = vrot.slane %v2169_v53, 1 }
  0xd7   : > { %v785_v61 = vpack.c.b16 %v779_v56, %v779_v56  ;;  %v784_v7 = vpack.c.b16 %v778_v4, %v778_v4 }
  0xd8   : > { %1078 = vmatmul.bf16.gmra.mxu0 %v2169_v53  ;;  %v797_v63 = vrot.slane %v795_v59, 1  ;;  %1097 = vmatmul.bf16.gmra.mxu1 %v3032_v20  ;;  %v1145_v27 = vsel %vm1142_vm7, %v1143_v26, %v1144_v25 }
  0xd9   : > { %v823_v1 = vshll.u32 %v785_v61, 16  ;;  %v815_v9 = vshll.u32 %v784_v7, 16  ;;  %v1151_v28 = vrot.slane %v785_v61, 1  ;;  %v1149_v30 = vrot.slane %v784_v7, 1 }
  0xda   : > { %v798_v2 = vsel %vm786_vm6, %v793_v62, %v797_v63  ;;  %v813_v12 = vor.u32 %v811_v10, %v797_v63 }
  0xdb   : > { %935 = vmatmul.bf16.vlgmr.msra.gmra.mxu2 %v798_v2  ;;  %v825_v5 = vrot.slane %v823_v1, 1  ;;  %v817_v13 = vrot.slane %v815_v9, 1  ;;  %v1152_v16 = vsel %vm1142_vm7, %v1147_v18, %v1151_v28  ;;  %v1150_v20 = vsel %vm1142_vm7, %v1144_v25, %v1149_v30 }
  0xdd   : > { %v826_v6 = vsel %vm786_vm6, %v821_v3, %v825_v5  ;;  %v818_v15 = vsel %vm786_vm6, %v813_v12, %v817_v13 }
  0xdf   : > { %959 = vmatmul.bf16.gmra.mxu3 %v826_v6 }
  0xeb   : > { %940 = vmatmul.bf16.gmra.mxu2 %v818_v15 }
  0xef   : > { %1280 = vmatmul.bf16.vlgmr.msrb.gmra.mxu3 %v1148_v21 }
  0xfb   : > { %1261 = vmatmul.bf16.vlgmr.msrb.gmra.mxu2 %v1145_v27 }
  0xff   : > { %1285 = vmatmul.bf16.gmra.mxu3 %v1152_v16 }
 0x10b   : > { %1266 = vmatmul.bf16.gmra.mxu2 %v1150_v20 }
 0x145   : > { %v1074_v37 = vpop.f32.mrf.mxu0  ;;  %v1093_v40 = vpop.f32.mrf.mxu1 }
 0x14d   : > { %v1076_v43 = vpop.f32.mrf.mxu0  ;;  %v1095_v51 = vpop.f32.mrf.mxu1 }
 0x152   : > { %v955_v31 = vpop.f32.mrf.mxu3 }
 0x155   : > { %v1079_v61 = vpop.f32.mrf.mxu0  ;;  %v1098_v2 = vpop.f32.mrf.mxu1 }
 0x15a   : > { %v957_v33 = vpop.f32.mrf.mxu3 }
 0x15d   : > { %v1081_v15 = vpop.f32.mrf.mxu0  ;;  %v1100_v23 = vpop.f32.mrf.mxu1 }
 0x15e   : > { %v936_v34 = vpop.f32.mrf.mxu2 }
 0x15f   : > { %v956_v39 = vadd.f32 %v955_v31, %v936_v34 }
 0x161   : > { %v1075_v42 = vadd.f32 %v1074_v37, %v956_v39 }
 0x162   : > { %v960_v35 = vpop.f32.mrf.mxu3 }
 0x163   : > { %v1094_v46 = vadd.f32 %v1093_v40, %v1075_v42 }
 0x166   : > { %v938_v36 = vpop.f32.mrf.mxu2 }
 0x167   : > { %v958_v45 = vadd.f32 %v957_v33, %v938_v36 }
 0x169   : > { %v1077_v53 = vadd.f32 %v1076_v43, %v958_v45  ;;  %v2532_v45 = vld [vmem:[#allocation7 + $0x30] sm:$0xff] }
 0x16a   : > { %v962_v19 = vpop.f32.mrf.mxu3 }
 0x16b   : > { %v1096_v59 = vadd.f32 %v1095_v51, %v1077_v53 }
 0x16e   : > { %v941_v22 = vpop.f32.mrf.mxu2 }
 0x16f   : > { %v961_v62 = vadd.f32 %v960_v35, %v941_v22  ;;  %v2533_v22 = vld [vmem:[#allocation7 + $0x38] sm:$0xff] }
 0x170   : > { %1722 = vmatpush.bf16.msra.mxu1 %v2533_v22 }
 0x171   : > { %v1080_v5 = vadd.f32 %v1079_v61, %v961_v62 }
 0x172   : > { %v1281_v41 = vpop.f32.mrf.mxu3 }
 0x173   : > { %v1099_v14 = vadd.f32 %v1098_v2, %v1080_v5 }
 0x174   : > { %1723 = vmatpush.bf16.msra.mxu1 %v2532_v45 }
 0x176   : > { %v943_v38 = vpop.f32.mrf.mxu2 }
 0x177   : > { %v963_v10 = vadd.f32 %v962_v19, %v943_v38 }
 0x179   : > { %v1082_v21 = vadd.f32 %v1081_v15, %v963_v10 }
 0x17a   : > { %v1283_v52 = vpop.f32.mrf.mxu3 }
 0x17b   : > { %v1101_v20 = vadd.f32 %v1100_v23, %v1082_v21 }
 0x17e   : > { %v1262_v44 = vpop.f32.mrf.mxu2 }
 0x17f   : > { %v1282_v47 = vadd.f32 %v1281_v41, %v1262_v44 }
 0x181   : > { %v1291_v49 = vadd.f32 %v1282_v47, %v1094_v46 }
 0x182   : > { %v1286_v6 = vpop.f32.mrf.mxu3 }
 0x183   : > { %v1299_v54 = vadd.f32 %v2631_v48, %v1291_v49 }
 0x185   : > { %v1307_v56 = vmul.f32 %v2632_v50, %v1299_v54 }
 0x186   : > { %v1264_v57 = vpop.f32.mrf.mxu2 }
 0x187   : > { %v3072_v58 = vadd.f32 %v3069_v55, %v1307_v56  ;;  %v1284_v60 = vadd.f32 %v1283_v52, %v1264_v57 }
 0x189   : > { %v3075_v63 = vmul.f32 0.70710677, %v3072_v58  ;;  %v1292_v1 = vadd.f32 %v1284_v60, %v1096_v59  ;;  %v2531_v59 = vld [vmem:[#allocation7 + $0x28] sm:$0xff] }
 0x18a   : > { %v1288_v27 = vpop.f32.mrf.mxu3  ;;  %1724 = vmatpush.bf16.msra.mxu1 %v2531_v59 }
 0x18b   : > { %v3078_v3 = vand.u32 2147483647, %v3075_v63  ;;  %v1300_v4 = vadd.f32 %v2631_v48, %v1292_v1 }
 0x18d   : > { %v1331_v7 = vmul.f32 0.3275911, %v3078_v3  ;;  %v1308_v8 = vmul.f32 %v2632_v50, %v1300_v4  ;;  %v1435_v52 = vsub.f32 0.0, %v3078_v3 }
 0x18e   : > { %v1267_v9 = vpop.f32.mrf.mxu2 }
 0x18f   : > { %v1335_v11 = vadd.f32 1.0, %v1331_v7  ;;  %v3082_v12 = vadd.f32 %v3069_v55, %v1308_v8  ;;  %v1287_v13 = vadd.f32 %v1286_v6, %v1267_v9  ;;  %v1439_v62 = vmul.f32 %v1435_v52, %v3078_v3  ;;  %v2530_v6 = vld [vmem:[#allocation7 + $0x20] sm:$0xff]  ;;  %v2548_v52 = vld [vmem:[#allocation7 + $0xb0] sm:$0xff] }
 0x190   : > { %1725 = vmatpush.bf16.msra.mxu1 %v2530_v6 }
 0x191   : > { %2637 = vrcp.f32 %v1335_v11  ;;  %v3085_v17 = vmul.f32 0.70710677, %v3082_v12  ;;  %v1293_v18 = vadd.f32 %v1287_v13, %v1099_v14  ;;  %v1350_v37 = vand.u32 2147483648, %v1335_v11 }
 0x192   : > { %v1348_v40 = vand.u32 2147483647, %v1335_v11  ;;  %vm1344_vm9 = vweird.f32 %v1335_v11  ;;  %v1443_v13 = vmul.f32 1.442695, %v1439_v62 }
 0x193   : > { %v3088_v24 = vand.u32 2147483647, %v3085_v17  ;;  %v1301_v25 = vadd.f32 %v2631_v48, %v1293_v18  ;;  %v1351_v46 = vor.u32 1.1754944e-38, %v1350_v37 }
 0x194   : > { %vm1349_vm11 = vcmp.eq.f32.partialorder %v1348_v40, 8.507059e+37 }
 0x195   : > { %v1332_v26 = vmul.f32 0.3275911, %v3088_v24  ;;  %v1309_v28 = vmul.f32 %v2632_v50, %v1301_v25  ;;  %v1436_v3 = vsub.f32 0.0, %v3088_v24  ;;  %v2529_v25 = vld [vmem:[#allocation7 + $0x18] sm:$0xff] }
 0x196   : > { %v1269_v16 = vpop.f32.mrf.mxu2  ;;  %1726 = vmatpush.bf16.msra.mxu1 %v2529_v25 }
 0x197   : > { %v2638_v30 = vpop.eup %2637  ;;  %v1289_v31 = vadd.f32 %v1288_v27, %v1269_v16  ;;  %v1336_v34 = vadd.f32 1.0, %v1332_v26  ;;  %v3092_v35 = vadd.f32 %v3069_v55, %v1309_v28  ;;  %v1440_v28 = vmul.f32 %v1436_v3, %v3088_v24  ;;  %v2541_v24 = vld [vmem:[#allocation7 + $0x78] sm:$0xff] }
 0x198   : > { %v1340_v33 = vmul.f32 %v2638_v30, %v1335_v11  ;;  %vm1345_vm8 = vweird.f32 %v2638_v30  ;;  %1653 = vmatpush.bf16.msra.mxu0 %v2541_v24 }
 0x199   : > { %v1294_v36 = vadd.f32 %v1289_v31, %v1101_v20  ;;  %2639 = vrcp.f32 %v1336_v34  ;;  %v3095_v38 = vmul.f32 0.70710677, %v3092_v35  ;;  %vm1346_vm10 = vmor %vm1344_vm9, %vm1345_vm8  ;;  %v1363_v2 = vand.u32 2147483647, %v1336_v34 }
 0x19a   : > { %v1341_v19 = vsub.f32 1.0, %v1340_v33  ;;  %vm1359_vm13 = vweird.f32 %v1336_v34 }
 0x19b   : > { %v1302_v41 = vadd.f32 %v2631_v48, %v1294_v36  ;;  %v3098_v42 = vand.u32 2147483647, %v3095_v38  ;;  %vm1364_vm1 = vcmp.eq.f32.partialorder %v1363_v2, 8.507059e+37  ;;  %v2528_v36 = vld [vmem:[#allocation7 + $0x10] sm:$0xff] }
 0x19c   : > { %v1342_v39 = vmul.f32 %v2638_v30, %v1341_v19  ;;  %v2549_v19 = vld [vmem:[#allocation7 + $0xb8] sm:$0xff]  ;;  %1727 = vmatpush.bf16.msra.mxu1 %v2528_v36 }
 0x19d   : > { %v1310_v44 = vmul.f32 %v2632_v50, %v1302_v41  ;;  %v1333_v47 = vmul.f32 0.3275911, %v3098_v42  ;;  %1817 = vmatpush.bf16.msra.mxu2 %v2549_v19  ;;  %v1437_v45 = vsub.f32 0.0, %v3098_v42  ;;  %2558 = vmatpush.bf16.msra.mxu3 %v2549_v19 }
 0x19e   : > { %v1343_v43 = vadd.f32 %v2638_v30, %v1342_v39  ;;  %v1445_v39 = vmul.f32 1.442695, %v1440_v28 }
 0x19f   : > { %v2640_v49 = vpop.eup %2639  ;;  %v3103_v53 = vadd.f32 %v3069_v55, %v1310_v44  ;;  %v3107_v56 = vadd.f32 1.0, %v1333_v47  ;;  %v1365_v55 = vand.u32 2147483648, %v1336_v34 }
 0x1a0   : > { %v1347_v51 = vsel %vm1346_vm10, %v2638_v30, %v1343_v43  ;;  %v1355_v54 = vmul.f32 %v2640_v49, %v1336_v34  ;;  %vm1360_vm12 = vweird.f32 %v2640_v49 }
 0x1a1   : > { %v3105_v48 = vsel %vm1349_vm11, %v1351_v46, %v1347_v51  ;;  %v3111_v57 = vmul.f32 0.70710677, %v3103_v53  ;;  %2641 = vrcp.f32 %v3107_v56  ;;  %vm1361_vm14 = vmor %vm1359_vm13, %vm1360_vm12  ;;  %v1366_v10 = vor.u32 1.1754944e-38, %v1365_v55  ;;  %v2527_v51 = vld [vmem:[#allocation7 + $0x8] sm:$0xff]  ;;  %1818 = vmatpush.bf16.msra.mxu2 %v2548_v52  ;;  %2559 = vmatpush.bf16.msra.mxu3 %v2548_v52 }
 0x1a2   : > { %v1399_v50 = vmul.f32 1.0614054, %v3105_v48  ;;  %v1356_v60 = vsub.f32 1.0, %v1355_v54  ;;  %v1380_v20 = vand.u32 2147483648, %v3107_v56  ;;  %v1378_v34 = vand.u32 2147483647, %v3107_v56  ;;  %1728 = vmatpush.bf16.msra.mxu1 %v2527_v51 }
 0x1a3   : > { %v3116_v4 = vand.u32 2147483647, %v3111_v57  ;;  %vm1374_vm4 = vweird.f32 %v3107_v56  ;;  %v1441_v55 = vmul.f32 %v1437_v45, %v3098_v42  ;;  %vm1459_vm11 = vcmp.ge.f32.partialorder %v3075_v63, 0.0  ;;  %v2544_v51 = vld [vmem:[#allocation7 + $0x90] sm:$0xff] }
 0x1a4   : > { %v1403_v61 = vadd.f32 -1.4531521, %v1399_v50  ;;  %v1357_v1 = vmul.f32 %v2640_v49, %v1356_v60  ;;  %v1381_v44 = vor.u32 1.1754944e-38, %v1380_v20  ;;  %vm1379_vm8 = vcmp.eq.f32.partialorder %v1378_v34, 8.507059e+37  ;;  %v2538_v34 = vld [vmem:[#allocation7 + $0x60] sm:$0xff] }
 0x1a5   : > { %v1334_v8 = vmul.f32 0.3275911, %v3116_v4  ;;  %v1438_v63 = vsub.f32 0.0, %v3116_v4 }
 0x1a6   : > { %v1407_v5 = vmul.f32 %v1403_v61, %v3105_v48  ;;  %v1358_v7 = vadd.f32 %v2640_v49, %v1357_v1 }
 0x1a7   : > { %v2642_v11 = vpop.eup %2641  ;;  %v3121_v15 = vadd.f32 1.0, %v1334_v8  ;;  %v2526_v8 = vld [vmem:[#allocation7] sm:$0xff] }
 0x1a8   : > { %v1411_v9 = vadd.f32 1.4214138, %v1407_v5  ;;  %v1362_v14 = vsel %vm1361_vm14, %v2640_v49, %v1358_v7  ;;  %v1370_v23 = vmul.f32 %v2642_v11, %v3107_v56  ;;  %vm1375_vm3 = vweird.f32 %v2642_v11  ;;  %1729 = vmatpush.bf16.msra.mxu1 %v2526_v8  ;;  %v2535_v8 = vld [vmem:[#allocation7 + $0x48] sm:$0xff] }
 0x1a9   : > { %v3124_v21 = vsel %vm1364_vm1, %v1366_v10, %v1362_v14  ;;  %2643 = vrcp.f32 %v3121_v15  ;;  %vm1376_vm5 = vmor %vm1374_vm4, %vm1375_vm3  ;;  %v1393_v1 = vand.u32 2147483647, %v3121_v15  ;;  %v1395_v2 = vand.u32 2147483648, %v3121_v15  ;;  %v2539_v14 = vld [vmem:[#allocation7 + $0x68] sm:$0xff] }
 0x1aa   : > { %v1415_v18 = vmul.f32 %v1411_v9, %v3105_v48  ;;  %v1400_v26 = vmul.f32 1.0614054, %v3124_v21  ;;  %v1371_v16 = vsub.f32 1.0, %v1370_v23  ;;  %2645 = vpow2.f32 %v1443_v13  ;;  %v2547_v9 = vld [vmem:[#allocation7 + $0xa8] sm:$0xff] }
 0x1ab   : > { %2647 = vpow2.f32 %v1445_v39  ;;  %v1319_v10 = vmul.f32 0.5, %v3072_v58  ;;  %vm1389_vm10 = vweird.f32 %v3121_v15  ;;  %1819 = vmatpush.bf16.msra.mxu2 %v2547_v9  ;;  %v1447_v23 = vmul.f32 1.442695, %v1441_v55  ;;  %2560 = vmatpush.bf16.msra.mxu3 %v2547_v9  ;;  %v2545_v39 = vld [vmem:[#allocation7 + $0x98] sm:$0xff] }
 0x1ac   : > { %v1419_v27 = vadd.f32 -0.28449672, %v1415_v18  ;;  %v1404_v30 = vadd.f32 -1.4531521, %v1400_v26  ;;  %v1372_v33 = vmul.f32 %v2642_v11, %v1371_v16  ;;  %v1396_v25 = vor.u32 1.1754944e-38, %v1395_v2  ;;  %v2546_v16 = vld [vmem:[#allocation7 + $0xa0] sm:$0xff] }
 0x1ad   : > { %vm1394_vm13 = vcmp.eq.f32.partialorder %v1393_v1, 8.507059e+37  ;;  %2649 = vpow2.f32 %v1447_v23  ;;  %vm1460_vm14 = vcmp.ge.f32.partialorder %v3085_v17, 0.0  ;;  %v2543_v1 = vld [vmem:[#allocation7 + $0x88] sm:$0xff]  ;;  %vm1461_vm1 = vcmp.ge.f32.partialorder %v3095_v38, 0.0 }
 0x1ae   : > { %v1423_v31 = vmul.f32 %v1419_v27, %v3105_v48  ;;  %v1408_v22 = vmul.f32 %v1404_v30, %v3124_v21  ;;  %v1373_v40 = vadd.f32 %v2642_v11, %v1372_v33 }
 0x1af   : > { %v2644_v41 = vpop.eup %2643  ;;  %1820 = vmatpush.bf16.msra.mxu2 %v2546_v16  ;;  %2561 = vmatpush.bf16.msra.mxu3 %v2546_v16 }
 0x1b0   : > { %v1427_v37 = vadd.f32 0.2548296, %v1423_v31  ;;  %v1412_v43 = vadd.f32 1.4214138, %v1408_v22  ;;  %v1377_v47 = vsel %vm1376_vm5, %v2642_v11, %v1373_v40  ;;  %v1385_v49 = vmul.f32 %v2644_v41, %v3121_v15  ;;  %v2646_v54 = vpop.eup %2645 }
 0x1b1   : > { %v3139_v50 = vsel %vm1379_vm8, %v1381_v44, %v1377_v47  ;;  %vm1390_vm9 = vweird.f32 %v2644_v41  ;;  %v2648_v58 = vpop.eup %2647  ;;  %v2537_v44 = vld [vmem:[#allocation7 + $0x58] sm:$0xff] }
 0x1b2   : > { %v1431_v46 = vmul.f32 %v1427_v37, %v3105_v48  ;;  %v1416_v56 = vmul.f32 %v1412_v43, %v3124_v21  ;;  %v1401_v60 = vmul.f32 1.0614054, %v3139_v50  ;;  %v1386_v61 = vsub.f32 1.0, %v1385_v49  ;;  %v2540_v48 = vld [vmem:[#allocation7 + $0x70] sm:$0xff]  ;;  %vm1391_vm12 = vmor %vm1389_vm10, %vm1390_vm9 }
 0x1b3   : > { %1654 = vmatpush.bf16.msra.mxu0 %v2540_v48  ;;  %1821 = vmatpush.bf16.msra.mxu2 %v2545_v39  ;;  %v2650_v17 = vpop.eup %2649 }
 0x1b4   : > { %v1451_v59 = vmul.f32 %v2646_v54, %v1431_v46  ;;  %v1420_v62 = vadd.f32 -0.28449672, %v1416_v56  ;;  %v1405_v6 = vadd.f32 -1.4531521, %v1401_v60  ;;  %v1387_v7 = vmul.f32 %v2644_v41, %v1386_v61  ;;  %2562 = vmatpush.bf16.msra.mxu3 %v2545_v39  ;;  %v1523_v60 = vld [vmem:[#allocation3] sm:$0xf] }
 0x1b5   : > { %v1320_v61 = vmul.f32 0.5, %v3082_v12 }
 0x1b6   : > { %v1455_v5 = vsub.f32 1.0, %v1451_v59  ;;  %v1424_v3 = vmul.f32 %v1420_v62, %v3124_v21  ;;  %v1409_v13 = vmul.f32 %v1405_v6, %v3139_v50  ;;  %v1388_v42 = vadd.f32 %v2644_v41, %v1387_v7 }
 0x1b7   : > { %1655 = vmatpush.bf16.msra.mxu0 %v2539_v14  ;;  %1822 = vmatpush.bf16.msra.mxu2 %v2544_v51  ;;  %v2534_v14 = vld [vmem:[#allocation7 + $0x40] sm:$0xff] }
 0x1b8   : > { %v1463_v11 = vsub.f32 0.0, %v1455_v5  ;;  %v1428_v18 = vadd.f32 0.2548296, %v1424_v3  ;;  %v1413_v27 = vadd.f32 1.4214138, %v1409_v13  ;;  %v1392_v28 = vsel %vm1391_vm12, %v2644_v41, %v1388_v42  ;;  %2563 = vmatpush.bf16.msra.mxu3 %v2544_v51  ;;  %v2542_v42 = vld [vmem:[#allocation7 + $0x80] sm:$0xff] }
 0x1b9   : > { %v3152_v20 = vsel %vm1394_vm13, %v1396_v25, %v1392_v28 }
 0x1ba   : > { %v1467_v26 = vsel %vm1459_vm11, %v1455_v5, %v1463_v11  ;;  %v1432_v15 = vmul.f32 %v1428_v18, %v3124_v21  ;;  %v1417_v31 = vmul.f32 %v1413_v27, %v3139_v50  ;;  %v1402_v33 = vmul.f32 1.0614054, %v3152_v20 }
 0x1bb   : > { %v1471_v30 = vadd.f32 1.0, %v1467_v26  ;;  %1656 = vmatpush.bf16.msra.mxu0 %v2538_v34  ;;  %v1442_v21 = vmul.f32 %v1438_v63, %v3116_v4  ;;  %v2536_v4 = vld [vmem:[#allocation7 + $0x50] sm:$0xff]  ;;  %1823 = vmatpush.bf16.msra.mxu2 %v2543_v1  ;;  %v1321_v26 = vmul.f32 0.5, %v3092_v35 }
 0x1bc   : > { %v1452_v19 = vmul.f32 %v2648_v58, %v1432_v15  ;;  %v1421_v22 = vadd.f32 -0.28449672, %v1417_v31  ;;  %v1406_v37 = vadd.f32 -1.4531521, %v1402_v33  ;;  %2564 = vmatpush.bf16.msra.mxu3 %v2543_v1 }
 0x1bd   : > { %v1475_v36 = vmul.f32 %v1471_v30, %v1319_v10  ;;  %v1449_v59 = vmul.f32 1.442695, %v1442_v21 }
 0x1be   : > { %v1456_v24 = vsub.f32 1.0, %v1452_v19  ;;  %v1425_v41 = vmul.f32 %v1421_v22, %v3139_v50  ;;  %v1410_v43 = vmul.f32 %v1406_v37, %v3152_v20  ;;  %v1322_v19 = vmul.f32 0.5, %v3103_v53 }
 0x1bf   : > { %v1479_v40 = vpack.c.bf16 %v1475_v36, %v1475_v36  ;;  %1657 = vmatpush.bf16.msra.mxu0 %v2537_v44  ;;  %2651 = vpow2.f32 %v1449_v59  ;;  %1824 = vmatpush.bf16.msra.mxu2 %v2542_v42 }
 0x1c0   : > { %v1464_v46 = vsub.f32 0.0, %v1456_v24  ;;  %v1429_v47 = vadd.f32 0.2548296, %v1425_v41  ;;  %v1414_v49 = vadd.f32 1.4214138, %v1410_v43  ;;  %2565 = vmatpush.bf16.msra.mxu3 %v2542_v42 }
 0x1c1   : > { %v1484_v45 = vshrl.u32 %v1479_v40, 16  ;;  %v1487_v54 = vshll.u32 %v1479_v40, 16 }
 0x1c2   : > { %v1468_v56 = vsel %vm1460_vm14, %v1456_v24, %v1464_v46  ;;  %v1433_v62 = vmul.f32 %v1429_v47, %v3139_v50  ;;  %v1418_v55 = vmul.f32 %v1414_v49, %v3152_v20 }
 0x1c3   : > { %v1486_v52 = vrot.slane %v1484_v45, 7  ;;  %v1472_v48 = vadd.f32 1.0, %v1468_v56  ;;  %1658 = vmatpush.bf16.msra.mxu0 %v2536_v4 }
 0x1c4   : > { %v1453_v6 = vmul.f32 %v2650_v17, %v1433_v62  ;;  %v1422_v7 = vadd.f32 -0.28449672, %v1418_v55 }
 0x1c5   : > { %v1489_v2 = vor.u32 %v1487_v54, %v1486_v52  ;;  %v1476_v5 = vmul.f32 %v1472_v48, %v1320_v61  ;;  %v2652_v58 = vpop.eup %2651  ;;  %v1490_v28 = vrot.slane %v1486_v52, 4 }
 0x1c6   : > { %v1457_v10 = vsub.f32 1.0, %v1453_v6  ;;  %v1426_v50 = vmul.f32 %v1422_v7, %v3152_v20 }
 0x1c7   : > { %v1524_v9 = vsel %vm2991_vm15, %v1489_v2, %v1523_v60  ;;  %v1480_v12 = vpack.c.bf16 %v1476_v5, %v1476_v5  ;;  %1659 = vmatpush.bf16.msra.mxu0 %v2535_v8  ;;  %vm1462_vm15 = vcmp.ge.f32.partialorder %v3111_v57, 0.0  ;;  %v1529_v57 = vld [vmem:[#allocation3 + $0x10] sm:$0x1] }
 0x1c8   : > { %1525 = vst [vmem:[#allocation3] sm:$0xf] %v1524_v9  ;;  %v1465_v11 = vsub.f32 0.0, %v1457_v10  ;;  %v1430_v13 = vadd.f32 0.2548296, %v1426_v50 }
 0x1c9   : > { %v1492_v3 = vshrl.u32 %v1480_v12, 16  ;;  %v1495_v23 = vshll.u32 %v1480_v12, 16 }
 0x1ca   : > { %v1469_v29 = vsel %vm1461_vm1, %v1457_v10, %v1465_v11  ;;  %v1434_v25 = vmul.f32 %v1430_v13, %v3152_v20 }
 0x1cb   : > { %v1494_v18 = vrot.slane %v1492_v3, 7  ;;  %v1473_v27 = vadd.f32 1.0, %v1469_v29  ;;  %1660 = vmatpush.bf16.msra.mxu0 %v2534_v14  ;;  %v2634_v14 = vld [vmem:[%s3306_s9] ss:$0 sm:$0xff] }
 0x1cc   : > { %v1454_v30 = vmul.f32 %v2652_v58, %v1434_v25  ;;  %v2635_v25 = vld [vmem:[%s3307_s10] ss:$0 sm:$0xff] }
 0x1cd   : > { %v1497_v16 = vor.u32 %v1495_v23, %v1494_v18  ;;  %v1477_v15 = vmul.f32 %v1473_v27, %v1321_v26  ;;  %v1499_v37 = vrot.slane %v1494_v18, 4  ;;  %v2636_v26 = vld [vmem:[%s3308_s11] ss:$0 sm:$0xff] }
 0x1ce   : > { %v1458_v63 = vsub.f32 1.0, %v1454_v30 }
 0x1cf   : > { %v1498_v38 = vsel %vm2997_vm0, %v1490_v28, %v1497_v16  ;;  %v1481_v31 = vpack.c.bf16 %v1477_v15, %v1477_v15  ;;  %v2556_v56 = vld [vmem:[#allocation3] sm:$0xe] }
 0x1d0   : > { %1526 = vst [vmem:[#allocation3 + $0x4] sm:$0xf] %v1498_v38  ;;  %v1466_v33 = vsub.f32 0.0, %v1458_v63 }
 0x1d1   : > { %v1501_v34 = vshrl.u32 %v1481_v31, 16  ;;  %v1504_v35 = vshll.u32 %v1481_v31, 16 }
 0x1d2   : > { %v1470_v20 = vsel %vm1462_vm15, %v1458_v63, %v1466_v33 }
 0x1d3   : > { %v1503_v36 = vrot.slane %v1501_v34, 7  ;;  %v1474_v22 = vadd.f32 1.0, %v1470_v20 }
 0x1d5   : > { %v1506_v39 = vor.u32 %v1504_v35, %v1503_v36  ;;  %v1478_v40 = vmul.f32 %v1474_v22, %v1322_v19  ;;  %v1508_v46 = vrot.slane %v1503_v36, 4 }
 0x1d7   : > { %v2552_v24 = vld [vmem:[#allocation3] sm:$0xff]   ;;  %v1507_v21 = vsel %vm2997_vm0, %v1499_v37, %v1506_v39  ;;  %v1482_v41 = vpack.c.bf16 %v1478_v40, %v1478_v40 }
 0x1d8   : > { %1730 = vmatmul.bf16.vlgmr.msra.gmra.mxu1 %v2552_v24  ;;  %1527 = vst [vmem:[#allocation3 + $0x8] sm:$0xf] %v1507_v21  ;;  %v2555_v52 = vld [vmem:[#allocation3] sm:$0xf0]  ;;  %v1586_v54 = vshll.u32 %v2552_v24, 16  ;;  %v1584_v61 = vshrl.u32 %v2552_v24, 16 }
 0x1d9   : > { %v1510_v43 = vshrl.u32 %v1482_v41, 16  ;;  %v1513_v45 = vshll.u32 %v1482_v41, 16  ;;  %v2557_v59 = vor.u32 %v2556_v56, %v2555_v52 }
 0x1da   : > { %v1588_v4 = vrot.slane %v1586_v54, 1 }
 0x1db   : > { %v1512_v44 = vrot.slane %v1510_v43, 7  ;;  %v1762_v62 = vrot.slane %v2557_v59, 1 }
 0x1dc   : > { %v1589_v32 = vor.u32 %v1588_v4, %v1584_v61 }
 0x1dd   : > { %v1515_v47 = vor.u32 %v1513_v45, %v1512_v44  ;;  %v1517_v49 = vrot.slane %v1512_v44, 4 }
 0x1df   : > { %v1516_v53 = vsel %vm2997_vm0, %v1508_v46, %v1515_v47  ;;  %v1530_v51 = vsel %vm2947_vm2, %v1517_v49, %v1529_v57 }
 0x1e0   : > { %1528 = vst [vmem:[#allocation3 + $0xc] sm:$0xf] %v1516_v53 }
 0x1e1   : > { %1531 = vst [vmem:[#allocation3 + $0x10] sm:$0x1] %v1530_v51 }
 0x1e7   : > { %v2525_v60 = vld [vmem:[#allocation3 + $0x8] sm:$0xff] }
 0x1e8   : > { %v1552_v48 = vld [vmem:[#allocation3 + $0x10] sm:$0x1]  ;;  %1735 = vmatmul.bf16.gmra.mxu1 %v2525_v60  ;;  %v1763_v55 = vrot.slane %v2525_v60, 1  ;;  %v1591_v1 = vshll.u32 %v2525_v60, 16  ;;  %v1595_v12 = vshrl.u32 %v2525_v60, 16 }
 0x1e9   : > { %v1579_v17 = vunpack.c.l.b16 %v1552_v48 }
 0x1ea   : > { %v1764_v2 = vsel %vm1142_vm7, %v1762_v62, %v1763_v55  ;;  %v1593_v0 = vrot.slane %v1591_v1, 1 }
 0x1eb   : > { %v1582_v5 = vpack.c.b16 %v1579_v17, %v1579_v17  ;;  %1825 = vmatmul.bf16.vlgmr.msra.gmra.mxu2 %v1764_v2 }
 0x1ec   : > { %v1594_v6 = vsel %vm786_vm6, %v1589_v32, %v1593_v0  ;;  %v1597_v10 = vor.u32 %v1595_v12, %v1593_v0 }
 0x1ed   : > { %v1765_v7 = vrot.slane %v1582_v5, 1  ;;  %1661 = vmatmul.bf16.vlgmr.msra.gmra.mxu0 %v1594_v6  ;;  %v1599_v9 = vshll.u32 %v1582_v5, 16 }
 0x1ef   : > { %v1766_v8 = vsel %vm1142_vm7, %v1763_v55, %v1765_v7  ;;  %v1601_v50 = vrot.slane %v1599_v9, 1 }
 0x1f0   : > { %1830 = vmatmul.bf16.vlgmr.msra.gmra.mxu3 %v1766_v8 }
 0x1f1   : > { %v1602_v3 = vsel %vm786_vm6, %v1597_v10, %v1601_v50 }
 0x1fd   : > { %1666 = vmatmul.bf16.gmra.mxu0 %v1602_v3 }
 0x255   : > { %v1731_v11 = vpop.f32.mrf.mxu1 }
 0x25d   : > { %v1733_v18 = vpop.f32.mrf.mxu1 }
 0x265   : > { %v1736_v31 = vpop.f32.mrf.mxu1 }
 0x26a   : > { %v1662_v13 = vpop.f32.mrf.mxu0 }
 0x26b   : > { %v1732_v42 = vadd.f32 %v1731_v11, %v1662_v13 }
 0x26d   : > { %v1738_v41 = vpop.f32.mrf.mxu1 }
 0x26e   : > { %v1826_v23 = vpop.f32.mrf.mxu2 }
 0x26f   : > { %v1836_v29 = vadd.f32 %v1826_v23, %v1732_v42 }
 0x271   : > { %v1844_v58 = vadd.f32 %v2634_v14, %v1836_v29 }
 0x272   : > { %v1664_v27 = vpop.f32.mrf.mxu0 }
 0x273   : > { %v1852_v28 = vmul.f32 %v2635_v25, %v1844_v58  ;;  %v1734_v30 = vadd.f32 %v1733_v18, %v1664_v27  ;;  %v1831_v20 = vpop.f32.mrf.mxu3 }
 0x275   : > { %v3193_v16 = vadd.f32 %v2636_v26, %v1852_v28 }
 0x276   : > { %v1828_v15 = vpop.f32.mrf.mxu2 }
 0x277   : > { %v3196_v38 = vmul.f32 0.70710677, %v3193_v16  ;;  %v1837_v63 = vadd.f32 %v1828_v15, %v1734_v30 }
 0x279   : > { %v1872_v33 = vand.u32 2147483647, %v3196_v38  ;;  %v1845_v34 = vadd.f32 %v2634_v14, %v1837_v63  ;;  %vm2004_vm1 = vcmp.ge.f32.partialorder %v3196_v38, 0.0  ;;  %v1864_v38 = vmul.f32 0.5, %v3193_v16 }
 0x27a   : > { %v1667_v36 = vpop.f32.mrf.mxu0 }
 0x27b   : > { %v1876_v35 = vmul.f32 0.3275911, %v1872_v33  ;;  %v1853_v19 = vmul.f32 %v2635_v25, %v1845_v34  ;;  %v1737_v22 = vadd.f32 %v1736_v31, %v1667_v36  ;;  %v1833_v47 = vpop.f32.mrf.mxu3  ;;  %v1980_v7 = vsub.f32 0.0, %v1872_v33 }
 0x27d   : > { %v1880_v37 = vadd.f32 1.0, %v1876_v35  ;;  %v3199_v39 = vadd.f32 %v2636_v26, %v1853_v19  ;;  %v1838_v40 = vadd.f32 %v1831_v20, %v1737_v22  ;;  %v1984_v13 = vmul.f32 %v1980_v7, %v1872_v33 }
 0x27f   : > { %2653 = vrcp.f32 %v1880_v37  ;;  %v3202_v24 = vmul.f32 0.70710677, %v3199_v39  ;;  %v1846_v21 = vadd.f32 %v2634_v14, %v1838_v40  ;;  %v1895_v60 = vand.u32 2147483648, %v1880_v37 }
 0x280   : > { %v1893_v62 = vand.u32 2147483647, %v1880_v37  ;;  %vm1889_vm0 = vweird.f32 %v1880_v37  ;;  %v1988_v28 = vmul.f32 1.442695, %v1984_v13 }
 0x281   : > { %v3205_v43 = vand.u32 2147483647, %v3202_v24  ;;  %v1854_v44 = vmul.f32 %v2635_v25, %v1846_v21  ;;  %v1896_v2 = vor.u32 1.1754944e-38, %v1895_v60 }
 0x282   : > { %v1669_v45 = vpop.f32.mrf.mxu0  ;;  %vm1894_vm7 = vcmp.eq.f32.partialorder %v1893_v62, 8.507059e+37 }
 0x283   : > { %v1739_v57 = vadd.f32 %v1738_v41, %v1669_v45  ;;  %v1877_v46 = vmul.f32 0.3275911, %v3205_v43  ;;  %v3208_v49 = vadd.f32 %v2636_v26, %v1854_v44  ;;  %v1981_v31 = vsub.f32 0.0, %v3205_v43 }
 0x285   : > { %v2654_v53 = vpop.eup %2653  ;;  %v1839_v51 = vadd.f32 %v1833_v47, %v1739_v57  ;;  %v1881_v54 = vadd.f32 1.0, %v1877_v46  ;;  %v3211_v56 = vmul.f32 0.70710677, %v3208_v49  ;;  %v1985_v21 = vmul.f32 %v1981_v31, %v3205_v43 }
 0x286   : > { %v1885_v52 = vmul.f32 %v2654_v53, %v1880_v37  ;;  %vm1890_vm2 = vweird.f32 %v2654_v53 }
 0x287   : > { %v1847_v59 = vadd.f32 %v2634_v14, %v1839_v51  ;;  %2655 = vrcp.f32 %v1881_v54  ;;  %v3214_v61 = vand.u32 2147483647, %v3211_v56  ;;  %vm1891_vm6 = vmor %vm1889_vm0, %vm1890_vm2  ;;  %v1910_v42 = vand.u32 2147483648, %v1881_v54 }
 0x288   : > { %v1886_v4 = vsub.f32 1.0, %v1885_v52  ;;  %v1908_v18 = vand.u32 2147483647, %v1881_v54  ;;  %vm1904_vm4 = vweird.f32 %v1881_v54  ;;  %vm2005_vm0 = vcmp.ge.f32.partialorder %v3202_v24, 0.0 }
 0x289   : > { %v1855_v55 = vmul.f32 %v2635_v25, %v1847_v59  ;;  %v1878_v1 = vmul.f32 0.3275911, %v3214_v61  ;;  %v1911_v30 = vor.u32 1.1754944e-38, %v1910_v42 }
 0x28a   : > { %v1887_v48 = vmul.f32 %v2654_v53, %v1886_v4  ;;  %vm1909_vm8 = vcmp.eq.f32.partialorder %v1908_v18, 8.507059e+37  ;;  %v1982_v4 = vsub.f32 0.0, %v3214_v61 }
 0x28b   : > { %v3217_v32 = vadd.f32 %v2636_v26, %v1855_v55  ;;  %v1882_v0 = vadd.f32 1.0, %v1878_v1 }
 0x28c   : > { %v1888_v17 = vadd.f32 %v2654_v53, %v1887_v48  ;;  %v1986_v7 = vmul.f32 %v1982_v4, %v3214_v61 }
 0x28d   : > { %v2656_v5 = vpop.eup %2655  ;;  %v3220_v8 = vmul.f32 0.70710677, %v3217_v32  ;;  %2657 = vrcp.f32 %v1882_v0  ;;  %v1925_v35 = vand.u32 2147483648, %v1882_v0  ;;  %v1923_v37 = vand.u32 2147483647, %v1882_v0 }
 0x28e   : > { %v1892_v6 = vsel %vm1891_vm6, %v2654_v53, %v1888_v17  ;;  %v1900_v12 = vmul.f32 %v2656_v5, %v1881_v54  ;;  %vm1905_vm3 = vweird.f32 %v2656_v5  ;;  %vm1919_vm10 = vweird.f32 %v1882_v0 }
 0x28f   : > { %v1897_v9 = vsel %vm1894_vm7, %v1896_v2, %v1892_v6  ;;  %v3223_v3 = vand.u32 2147483647, %v3220_v8  ;;  %vm1906_vm5 = vmor %vm1904_vm4, %vm1905_vm3  ;;  %v1926_v46 = vor.u32 1.1754944e-38, %v1925_v35  ;;  %vm1924_vm12 = vcmp.eq.f32.partialorder %v1923_v37, 8.507059e+37 }
 0x290   : > { %v1944_v10 = vmul.f32 1.0614054, %v1897_v9  ;;  %v1901_v50 = vsub.f32 1.0, %v1900_v12  ;;  %v1990_v54 = vmul.f32 1.442695, %v1985_v21  ;;  %vm2006_vm6 = vcmp.ge.f32.partialorder %v3211_v56, 0.0 }
 0x291   : > { %v1879_v23 = vmul.f32 0.3275911, %v3223_v3  ;;  %v1992_v61 = vmul.f32 1.442695, %v1986_v7  ;;  %vm2007_vm7 = vcmp.ge.f32.partialorder %v3220_v8, 0.0 }
 0x292   : > { %v1948_v11 = vadd.f32 -1.4531521, %v1944_v10  ;;  %v1902_v14 = vmul.f32 %v2656_v5, %v1901_v50 }
 0x293   : > { %v2658_v25 = vpop.eup %2657  ;;  %v3226_v26 = vadd.f32 1.0, %v1879_v23 }
 0x294   : > { %v1952_v29 = vmul.f32 %v1948_v11, %v1897_v9  ;;  %v1903_v58 = vadd.f32 %v2656_v5, %v1902_v14  ;;  %v1915_v15 = vmul.f32 %v2658_v25, %v1882_v0  ;;  %vm1920_vm9 = vweird.f32 %v2658_v25 }
 0x295   : > { %2659 = vrcp.f32 %v3226_v26  ;;  %vm1921_vm11 = vmor %vm1919_vm10, %vm1920_vm9  ;;  %v1938_v1 = vand.u32 2147483647, %v3226_v26  ;;  %v1940_v17 = vand.u32 2147483648, %v3226_v26  ;;  %vm1934_vm14 = vweird.f32 %v3226_v26 }
 0x296   : > { %v1956_v27 = vadd.f32 1.4214138, %v1952_v29  ;;  %v1907_v63 = vsel %vm1906_vm5, %v2656_v5, %v1903_v58  ;;  %v1916_v20 = vsub.f32 1.0, %v1915_v15  ;;  %2661 = vpow2.f32 %v1988_v28 }
 0x297   : > { %v3230_v34 = vsel %vm1909_vm8, %v1911_v30, %v1907_v63  ;;  %2663 = vpow2.f32 %v1990_v54  ;;  %v1941_v11 = vor.u32 1.1754944e-38, %v1940_v17  ;;  %vm1939_vm2 = vcmp.eq.f32.partialorder %v1938_v1, 8.507059e+37 }
 0x298   : > { %v1960_v33 = vmul.f32 %v1956_v27, %v1897_v9  ;;  %v1945_v36 = vmul.f32 1.0614054, %v3230_v34  ;;  %v1917_v22 = vmul.f32 %v2658_v25, %v1916_v20  ;;  %v1983_v29 = vsub.f32 0.0, %v3223_v3 }
 0x299   : > { %2665 = vpow2.f32 %v1992_v61 }
 0x29a   : > { %v1964_v19 = vadd.f32 -0.28449672, %v1960_v33  ;;  %v1949_v40 = vadd.f32 -1.4531521, %v1945_v36  ;;  %v1918_v44 = vadd.f32 %v2658_v25, %v1917_v22  ;;  %v1987_v20 = vmul.f32 %v1983_v29, %v3223_v3 }
 0x29b   : > { %v2660_v45 = vpop.eup %2659  ;;  %v1865_v3 = vmul.f32 0.5, %v3199_v39  ;;  %v1866_v39 = vmul.f32 0.5, %v3208_v49  ;;  %v1867_v49 = vmul.f32 0.5, %v3217_v32 }
 0x29c   : > { %v1968_v41 = vmul.f32 %v1964_v19, %v1897_v9  ;;  %v1953_v57 = vmul.f32 %v1949_v40, %v3230_v34  ;;  %v1922_v53 = vsel %vm1921_vm11, %v2658_v25, %v1918_v44  ;;  %v1930_v51 = vmul.f32 %v2660_v45, %v3226_v26  ;;  %v2662_v62 = vpop.eup %2661 }
 0x29d   : > { %v1927_v59 = vsel %vm1924_vm12, %v1926_v46, %v1922_v53  ;;  %vm1935_vm13 = vweird.f32 %v2660_v45  ;;  %v2664_v27 = vpop.eup %2663  ;;  %v1994_v40 = vmul.f32 1.442695, %v1987_v20 }
 0x29e   : > { %v1972_v47 = vadd.f32 0.2548296, %v1968_v41  ;;  %v1957_v52 = vadd.f32 1.4214138, %v1953_v57  ;;  %v1946_v60 = vmul.f32 1.0614054, %v1927_v59  ;;  %vm1936_vm15 = vmor %vm1934_vm14, %vm1935_vm13 }
 0x29f   : > { %v1931_v48 = vsub.f32 1.0, %v1930_v51  ;;  %v2666_v41 = vpop.eup %2665  ;;  %2667 = vpow2.f32 %v1994_v40 }
 0x2a0   : > { %v1976_v43 = vmul.f32 %v1972_v47, %v1897_v9  ;;  %v1961_v55 = vmul.f32 %v1957_v52, %v3230_v34  ;;  %v1950_v0 = vadd.f32 -1.4531521, %v1946_v60 }
 0x2a1   : > { %v1932_v5 = vmul.f32 %v2660_v45, %v1931_v48 }
 0x2a2   : > { %v1996_v2 = vmul.f32 %v2662_v62, %v1976_v43  ;;  %v1965_v6 = vadd.f32 -0.28449672, %v1961_v55  ;;  %v1954_v12 = vmul.f32 %v1950_v0, %v1927_v59 }
 0x2a3   : > { %v1933_v10 = vadd.f32 %v2660_v45, %v1932_v5 }
 0x2a4   : > { %v2000_v9 = vsub.f32 1.0, %v1996_v2  ;;  %v1969_v50 = vmul.f32 %v1965_v6, %v3230_v34  ;;  %v1958_v42 = vadd.f32 1.4214138, %v1954_v12 }
 0x2a5   : > { %v1937_v14 = vsel %vm1936_vm15, %v2660_v45, %v1933_v10  ;;  %v2668_v4 = vpop.eup %2667 }
 0x2a6   : > { %v2008_v13 = vsub.f32 0.0, %v2000_v9  ;;  %v1973_v18 = vadd.f32 0.2548296, %v1969_v50  ;;  %v1942_v23 = vsel %vm1939_vm2, %v1941_v11, %v1937_v14  ;;  %v1962_v58 = vmul.f32 %v1958_v42, %v1927_v59 }
 0x2a7   : > { %v1947_v26 = vmul.f32 1.0614054, %v1942_v23 }
 0x2a8   : > { %v2012_v25 = vsel %vm2004_vm1, %v2000_v9, %v2008_v13  ;;  %v1977_v30 = vmul.f32 %v1973_v18, %v3230_v34  ;;  %v1966_v15 = vadd.f32 -0.28449672, %v1962_v58 }
 0x2a9   : > { %v2016_v28 = vadd.f32 1.0, %v2012_v25  ;;  %v1951_v63 = vadd.f32 -1.4531521, %v1947_v26 }
 0x2aa   : > { %v1997_v33 = vmul.f32 %v2664_v27, %v1977_v30  ;;  %v1970_v36 = vmul.f32 %v1966_v15, %v1927_v59 }
 0x2ab   : > { %v2020_v31 = vmul.f32 %v2016_v28, %v1864_v38  ;;  %v1955_v35 = vmul.f32 %v1951_v63, %v1942_v23 }
 0x2ac   : > { %v2001_v19 = vsub.f32 1.0, %v1997_v33  ;;  %v1974_v22 = vadd.f32 0.2548296, %v1970_v36 }
 0x2ad   : > { %2024 = vst [vmem:[%s3251_s17] sm:$0xff] %v2020_v31  ;;  %v1959_v37 = vadd.f32 1.4214138, %v1955_v35 }
 0x2ae   : > { %v2009_v16 = vsub.f32 0.0, %v2001_v19  ;;  %v1978_v34 = vmul.f32 %v1974_v22, %v1927_v59 }
 0x2af   : > { %v1963_v21 = vmul.f32 %v1959_v37, %v1942_v23 }
 0x2b0   : > { %v2013_v44 = vsel %vm2005_vm0, %v2001_v19, %v2009_v16  ;;  %v1998_v57 = vmul.f32 %v2666_v41, %v1978_v34 }
 0x2b1   : > { %v2017_v45 = vadd.f32 1.0, %v2013_v44  ;;  %v1967_v46 = vadd.f32 -0.28449672, %v1963_v21 }
 0x2b2   : > { %v2002_v53 = vsub.f32 1.0, %v1998_v57 }
 0x2b3   : > { %v2021_v47 = vmul.f32 %v2017_v45, %v1865_v3  ;;  %v1971_v51 = vmul.f32 %v1967_v46, %v1942_v23 }
 0x2b4   : > { %v2010_v52 = vsub.f32 0.0, %v2002_v53 }
 0x2b5   : > { %2025 = vst [vmem:[%s3251_s17 + $0x8] sm:$0xff] %v2021_v47  ;;  %v1975_v54 = vadd.f32 0.2548296, %v1971_v51 }
 0x2b6   : > { %v2014_v24 = vsel %vm2006_vm6, %v2002_v53, %v2010_v52 }
 0x2b7   : > { %v1979_v59 = vmul.f32 %v1975_v54, %v1942_v23  ;;  %v2018_v43 = vadd.f32 1.0, %v2014_v24 }
 0x2b9   : > { %v1999_v60 = vmul.f32 %v2668_v4, %v1979_v59  ;;  %v2022_v48 = vmul.f32 %v2018_v43, %v1866_v39 }
 0x2bb   : > { %v2003_v62 = vsub.f32 1.0, %v1999_v60  ;;  %2026 = vst [vmem:[%s3251_s17 + $0x10] sm:$0xff] %v2022_v48 }
 0x2bd   : > { %v2011_v55 = vsub.f32 0.0, %v2003_v62 }
 0x2bf   : > { %v2015_v56 = vsel %vm2007_vm7, %v2003_v62, %v2011_v55 }
 0x2c0   : > { %v2019_v1 = vadd.f32 1.0, %v2015_v56 }
 0x2c2   : > { %v2023_v17 = vmul.f32 %v2019_v1, %v1867_v49 }
 0x2c4   : > { %2027 = vst [vmem:[%s3251_s17 + $0x18] sm:$0xff] %v2023_v17 }
 0x2c5   : > { %2756 = shalt.err (!%p2753_p8)
}
 0x2c6   : > { %s2805_s30 = smov 128   ;;  %s2806_s17 = smov 8  }
 0x2c7   : > { %2574 = dma.vmem_to_hbm [thread:$0]  (%p2910_p5), %s2042_s28, 512, %s2044_s29, %s2029_s25, %s2805_s30, %s2805_s30, %s2806_s17  }
 0x2c8 PF: > { %p2591_p9 = scmp.ge.s32.totalorder %s2799_s24, 2  ;;  %s2058_s26 = sand.u32 1, %s2787_s21  }
 0x2c9   : > { %s2059_s27 = scalar_lea.sflag [#allocation6], %s2058_s26 }
 0x2ca   : > { %p2584_p10 = pnand %p2591_p9, %p2914_p6 }
 0x2cc   : > { %p2585_p11 = pneg %p2584_p10 }
 0x2ce   : > { %2782 = dma.done.wait (%p2585_p11), %s2059_s27, 512  }
 0x2cf   : > { %2784 = vsyncadd (%p2585_p11), %s2059_s27, 4294966784  ;;  %s3329_s24 = sld [smem:[#allocation14_spill]]  ;;  %s3332_s21 = smov %s2791_s22 }
 0x2d0   : > { %s3330_s16 = sld [smem:[#allocation13_spill]] }
 0x2d1   : > { %s3331_s23 = sld [smem:[#allocation15_spill]] }
 0x2d5   : > { %p24_p12 = scmp.ge.s32.totalorder %s3329_s24, 4  }
 0x2d6   : > { %s3333_s22 = smov %s3330_s16 }
 0x2d7   :  { %26 = sbr.rel (!%p24_p12) target bundleno = 5 (0x5), region = 120 }
 0x2dc   :  { %2065 = vsyncpa [#allocation5], 1 }
 0x2dd   :  { %2067 = vsyncpa [#allocation5 + $0x1], 1 }
 0x2de   :  { %2068 = vsyncpa [#allocation8], 1 }
 0x2df   :  { %2069 = vsyncpa [#allocation6], 1 }
 0x2e0   :  { %2071 = vsyncpa [#allocation6 + $0x1], 1 }

</bundles_post_ra>
